<compile_context>
chip_gen: v7x
topology: tpu7x:2x2x1
jax: 0.10.0
libtpu: 0.0.40
codegen_flags: <defaults>
</compile_context>

<pallas_src>
import functools
import math

import jax
import jax.numpy as jnp
from jax.experimental import pallas as pl
from jax.experimental.pallas import tpu as pltpu

F32 = jnp.float32
BF16 = jnp.bfloat16
NEG_INF = -1e9          # masked score value (same-batch / attn_mask semantics)


def _round_up(x, m):
    return (x + m - 1) // m * m


def _layer_norm(x, gamma, beta, eps=1e-5):
    mu = jnp.mean(x, axis=-1, keepdims=True)
    xc = x - mu
    var = jnp.mean(xc * xc, axis=-1, keepdims=True)
    return xc * jax.lax.rsqrt(var + eps) * gamma + beta


def _split_heads(x, num_heads):
    # (N, D) -> (H, N, hd): heads become a leading batch dim so every head is
    # handled by ONE batched MXU einsum (no per-head masked lane stores).
    n, d = x.shape
    hd = d // num_heads
    return jnp.swapaxes(x.reshape(n, num_heads, hd), 0, 1)


def _merge_heads(x):
    # (H, N, hd) -> (N, D)
    h, n, hd = x.shape
    return jnp.swapaxes(x, 0, 1).reshape(n, h * hd)


# ---------------------------------------------------------------------------
# Kernel 1: fused clicks path (masked_click_to_scene + click_to_click + FFN)
# grid = (N_points_pad // BK,), scene keys streamed, clicks resident in VMEM.
# ---------------------------------------------------------------------------
def _clicks_path_kernel(clicks_ref, cpe_ref, cb_col_ref, cb_row_ref,
                        scene_ref, spe_ref, sb_row_ref, *rest,
                        num_heads, use_pe, has_mask):
    if has_mask:
        mask_ref, *rest = rest
    else:
        mask_ref = None
    (wq1, bq1, wk1, bk1, wv1, bv1, wo1, bo1, g1, be1,
     wqk2, bqk2, wv2, bv2, wo2, bo2, g2, be2,
     fw1, fb1, fw2, fb2, g3, be3,
     out_ref, q_sc, m_sc, l_sc, acc_sc) = rest

    kstep = pl.program_id(0)
    nk = pl.num_programs(0)
    nc, d = clicks_ref.shape
    hd = d // num_heads
    scale = 1.0 / math.sqrt(hd)

    # ---- once: stage-1 clicks query projection + online-softmax state ------
    @pl.when(kstep == 0)
    def _init():
        q_in = (clicks_ref[...] + cpe_ref[...]) if use_pe else clicks_ref[...]
        q = jnp.dot(q_in.astype(BF16), wq1[...],
                    preferred_element_type=F32) + bq1[...]
        q_sc[...] = _split_heads(q * scale, num_heads)       # scale folded once
        m_sc[...] = jnp.full_like(m_sc, -1e30)
        l_sc[...] = jnp.zeros_like(l_sc)
        acc_sc[...] = jnp.zeros_like(acc_sc)

    # ---- stage 1: stream one (BK, D) scene block, flash-style softmax ------
    # K uses source+pe, V uses raw source, so K/V keep separate projections
    # (a fused (D,2D) matmul would not save work here).
    src = scene_ref[...]
    k_in = (src + spe_ref[...]) if use_pe else src
    kp = jnp.dot(k_in.astype(BF16), wk1[...], preferred_element_type=F32) + bk1[...]
    vp = jnp.dot(src.astype(BF16), wv1[...], preferred_element_type=F32) + bv1[...]
    kh = _split_heads(kp, num_heads)                        # (H, BK, hd)
    vh = _split_heads(vp, num_heads)                        # (H, BK, hd)

    s = jnp.einsum('hqd,hkd->hqk', q_sc[...].astype(BF16), kh.astype(BF16),
                   preferred_element_type=F32)              # (H, Nc, BK)
    allowed = cb_col_ref[...] == sb_row_ref[...]            # (Nc, BK)
    if has_mask:
        allowed = jnp.logical_and(allowed, mask_ref[...] == 0)
    s = jnp.where(allowed[None, :, :], s, NEG_INF)

    m_prev = m_sc[...]
    m_new = jnp.maximum(m_prev, jnp.max(s, axis=-1, keepdims=True))
    alpha = jnp.exp(m_prev - m_new)
    p = jnp.exp(s - m_new)
    l_sc[...] = alpha * l_sc[...] + jnp.sum(p, axis=-1, keepdims=True)
    acc_sc[...] = alpha * acc_sc[...] + jnp.einsum(
        'hqk,hkd->hqd', p.astype(BF16), vh.astype(BF16),
        preferred_element_type=F32)
    m_sc[...] = m_new

    # ---- last block: finish stage 1, then self-attention + FFN in VMEM -----
    @pl.when(kstep == nk - 1)
    def _finish():
        clicks0 = clicks_ref[...]
        attn1 = _merge_heads(acc_sc[...] *
                             pl.reciprocal(l_sc[...], approx=True))   # (Nc, D)
        x1 = clicks0 + jnp.dot(attn1.astype(BF16), wo1[...],
                               preferred_element_type=F32) + bo1[...]
        x1 = _layer_norm(x1, g1[...], be1[...])

        # stage 2: click<->click self-attention (fused (D, 2D) Q/K projection)
        qk_in = (x1 + cpe_ref[...]) if use_pe else x1
        qk = jnp.dot(qk_in.astype(BF16), wqk2[...],
                     preferred_element_type=F32) + bqk2[...]
        v2 = jnp.dot(x1.astype(BF16), wv2[...],
                     preferred_element_type=F32) + bv2[...]
        q2h = _split_heads(qk[:, :d] * scale, num_heads)
        k2h = _split_heads(qk[:, d:], num_heads)
        v2h = _split_heads(v2, num_heads)
        s2 = jnp.einsum('hqd,hkd->hqk', q2h.astype(BF16), k2h.astype(BF16),
                        preferred_element_type=F32)
        s2 = jnp.where((cb_col_ref[...] == cb_row_ref[...])[None, :, :],
                       s2, NEG_INF)
        s2 = s2 - jnp.max(s2, axis=-1, keepdims=True)
        p2 = jnp.exp(s2)
        p2 = p2 * pl.reciprocal(jnp.sum(p2, axis=-1, keepdims=True), approx=True)
        a2 = _merge_heads(jnp.einsum('hqk,hkd->hqd', p2.astype(BF16),
                                     v2h.astype(BF16),
                                     preferred_element_type=F32))
        x2 = x1 + jnp.dot(a2.astype(BF16), wo2[...],
                          preferred_element_type=F32) + bo2[...]
        x2 = _layer_norm(x2, g2[...], be2[...])

        # stage 3: FFN (linear -> relu -> linear) + residual + LN
        hmid = jnp.dot(x2.astype(BF16), fw1[...],
                       preferred_element_type=F32) + fb1[...]
        hmid = jnp.maximum(hmid, 0.0)
        y = jnp.dot(hmid.astype(BF16), fw2[...],
                    preferred_element_type=F32) + fb2[...]
        out_ref[...] = _layer_norm(x2 + y, g3[...], be3[...])


# ---------------------------------------------------------------------------
# Kernel 2: scene_to_click cross-attention, tiled over scene query rows.
# grid = (N_points_pad // BQ,), "parallel" -> megacore-shardable on v7x.
# ---------------------------------------------------------------------------
def _scene_attn_kernel(scene_ref, spe_ref, sb_col_ref,
                       clicks_ref, cpe_ref, cb_row_ref, *rest,
                       num_heads, use_pe, has_mask):
    if has_mask:
        mask_ref, *rest = rest
    else:
        mask_ref = None
    (wq, bq, wk, bk, wv, bv, wo, bo, g, be, out_ref) = rest

    _, d = scene_ref.shape
    hd = d // num_heads
    scale = 1.0 / math.sqrt(hd)

    scene = scene_ref[...]
    clicks = clicks_ref[...]
    q_in = (scene + spe_ref[...]) if use_pe else scene
    k_in = (clicks + cpe_ref[...]) if use_pe else clicks

    qproj = (jnp.dot(q_in.astype(BF16), wq[...],
                     preferred_element_type=F32) + bq[...]) * scale
    kproj = jnp.dot(k_in.astype(BF16), wk[...], preferred_element_type=F32) + bk[...]
    vproj = jnp.dot(clicks.astype(BF16), wv[...], preferred_element_type=F32) + bv[...]
    qh = _split_heads(qproj, num_heads)      # (H, BQ, hd)
    kh = _split_heads(kproj, num_heads)      # (H, Nc, hd)
    vh = _split_heads(vproj, num_heads)

    s = jnp.einsum('hqd,hkd->hqk', qh.astype(BF16), kh.astype(BF16),
                   preferred_element_type=F32)                  # (H, BQ, Nc)
    allowed = sb_col_ref[...] == cb_row_ref[...]                # (BQ, Nc)
    if has_mask:
        allowed = jnp.logical_and(allowed, mask_ref[...] == 0)
    s = jnp.where(allowed[None, :, :], s, NEG_INF)

    s = s - jnp.max(s, axis=-1, keepdims=True)
    p = jnp.exp(s)
    p = p * pl.reciprocal(jnp.sum(p, axis=-1, keepdims=True), approx=True)
    a = _merge_heads(jnp.einsum('hqk,hkd->hqd', p.astype(BF16), vh.astype(BF16),
                                preferred_element_type=F32))     # (BQ, D)
    y = scene + jnp.dot(a.astype(BF16), wo[...],
                        preferred_element_type=F32) + bo[...]
    out_ref[...] = _layer_norm(y, g[...], be[...])


# ---------------------------------------------------------------------------
# Wrapper
# ---------------------------------------------------------------------------
def agile3d_decoder_block(scene, clicks, scene_pe, clicks_pe,
                          scene_batch, clicks_batch, params, *,
                          attn_mask=None, skip_first_layer_pe=False, num_heads,
                          block_q=256, block_k=512,
                          vmem_limit_bytes=32 * 1024 * 1024):
    """Forward pass of Agile3dDecoderBlock.  Returns (scene_out, clicks_out)."""
    n_points, d = scene.shape
    n_clicks = clicks.shape[0]
    assert d % num_heads == 0
    use_pe = not skip_first_layer_pe
    has_mask = attn_mask is not None

    # ---- padding so every grid block satisfies the (8,128) tiling rules ----
    nc_pad = _round_up(n_clicks, 8)
    np8 = _round_up(n_points, 8)
    if np8 <= block_q:
        np_pad = bq_tile = bk_tile = np8          # single block on both grids
    else:
        assert block_q % 128 == 0 and block_k % block_q == 0
        np_pad = _round_up(n_points, block_k)
        bq_tile, bk_tile = block_q, block_k

    pn, pc = np_pad - n_points, nc_pad - n_clicks
    scene_p = jnp.pad(scene.astype(F32), ((0, pn), (0, 0)))
    spe_p = jnp.pad(scene_pe.astype(F32), ((0, pn), (0, 0)))
    clicks_p = jnp.pad(clicks.astype(F32), ((0, pc), (0, 0)))
    cpe_p = jnp.pad(clicks_pe.astype(F32), ((0, pc), (0, 0)))
    # padded rows get batch ids that never match any real row (or each other)
    sb = jnp.pad(scene_batch.astype(jnp.int32), (0, pn), constant_values=-1)
    cb = jnp.pad(clicks_batch.astype(jnp.int32), (0, pc), constant_values=-2)
    cb_col, cb_row = cb.reshape(nc_pad, 1), cb.reshape(1, nc_pad)
    sb_col, sb_row = sb.reshape(np_pad, 1), sb.reshape(1, np_pad)

    if has_mask:
        m1 = jnp.pad(attn_mask.astype(jnp.int8), ((0, pc), (0, pn)))
        # TODO(synk): the PyTorch block forwards the (N_clicks, N_points) mask
        # unchanged to scene_to_click; with scene as the query we apply its
        # transpose (N_points, N_clicks) — confirm the intended semantics.
        m2 = jnp.pad(attn_mask.T.astype(jnp.int8), ((0, pn), (0, pc)))

    h = num_heads
    hd = d // h
    p1, p2, p3, p4 = (params["masked_click_to_scene"], params["click_to_click"],
                      params["mlp"], params["scene_to_click"])

    def cparams(sem):
        return pltpu.CompilerParams(dimension_semantics=sem,
                                    vmem_limit_bytes=vmem_limit_bytes)

    def _res(arr):  # resident full-array (rank-2) input
        return pl.BlockSpec(arr.shape, lambda i: (0, 0))

    # ------------- kernel 1: fused clicks path (steps 1-3) ------------------
    grid_k = np_pad // bk_tile
    specs1 = [_res(clicks_p), _res(cpe_p), _res(cb_col), _res(cb_row),
              pl.BlockSpec((bk_tile, d), lambda i: (i, 0)),
              pl.BlockSpec((bk_tile, d), lambda i: (i, 0)),
              pl.BlockSpec((1, bk_tile), lambda i: (0, i))]
    args1 = [clicks_p, cpe_p, cb_col, cb_row, scene_p, spe_p, sb_row]
    if has_mask:
        specs1.append(pl.BlockSpec((nc_pad, bk_tile), lambda i: (0, i)))
        args1.append(m1)
    weights1 = [p1["wq"], p1["bq"], p1["wk"], p1["bk"], p1["wv"], p1["bv"],
                p1["wo"], p1["bo"], p1["gamma"], p1["beta"],
                p2["wqk"], p2["bqk"], p2["wv"], p2["bv"],
                p2["wo"], p2["bo"], p2["gamma"], p2["beta"],
                p3["w1"], p3["b1"], p3["w2"], p3["b2"], p3["gamma"], p3["beta"]]
    specs1 += [_res(w) for w in weights1]
    args1 += weights1

    clicks_out = pl.pallas_call(
        functools.partial(_clicks_path_kernel, num_heads=h,
                          use_pe=use_pe, has_mask=has_mask),
        out_shape=jax.ShapeDtypeStruct((nc_pad, d), F32),
        grid_spec=pltpu.PrefetchScalarGridSpec(
            num_scalar_prefetch=0,
            grid=(grid_k,),
            in_specs=specs1,
            out_specs=pl.BlockSpec((nc_pad, d), lambda i: (0, 0)),
            scratch_shapes=[pltpu.VMEM((h, nc_pad, hd), F32),   # stage-1 Q heads
                            pltpu.VMEM((h, nc_pad, 1), F32),    # running max
                            pltpu.VMEM((h, nc_pad, 1), F32),    # running sum
                            pltpu.VMEM((h, nc_pad, hd), F32)]), # running acc
        compiler_params=cparams(("arbitrary",)),   # streaming-softmax reduction
    )(*args1)

    # ------------- kernel 2: scene <- clicks cross-attention ----------------
    grid_q = np_pad // bq_tile
    specs2 = [pl.BlockSpec((bq_tile, d), lambda i: (i, 0)),
              pl.BlockSpec((bq_tile, d), lambda i: (i, 0)),
              pl.BlockSpec((bq_tile, 1), lambda i: (i, 0)),
              _res(clicks_out), _res(cpe_p), _res(cb_row)]
    args2 = [scene_p, spe_p, sb_col, clicks_out, cpe_p, cb_row]
    if has_mask:
        specs2.append(pl.BlockSpec((bq_tile, nc_pad), lambda i: (i, 0)))
        args2.append(m2)
    weights2 = [p4["wq"], p4["bq"], p4["wk"], p4["bk"], p4["wv"], p4["bv"],
                p4["wo"], p4["bo"], p4["gamma"], p4["beta"]]
    specs2 += [_res(w) for w in weights2]
    args2 += weights2

    scene_out = pl.pallas_call(
        functools.partial(_scene_attn_kernel, num_heads=h,
                          use_pe=use_pe, has_mask=has_mask),
        out_shape=jax.ShapeDtypeStruct((np_pad, d), F32),
        grid_spec=pltpu.PrefetchScalarGridSpec(
            num_scalar_prefetch=0,
            grid=(grid_q,),
            in_specs=specs2,
            out_specs=pl.BlockSpec((bq_tile, d), lambda i: (i, 0))),
        compiler_params=cparams(("parallel",)),    # independent row tiles
    )(*args2)

    return scene_out[:n_points], clicks_out[:n_clicks]


# ---------------------------------------------------------------------------
# Deterministic parameter init (synthetic; no checkpoint) + bf16/fusion prep
# ---------------------------------------------------------------------------
def _init_attn_params(key, d):
    ks = jax.random.split(key, 4)
    lim = 1.0 / math.sqrt(d)
    w = lambda k: jax.random.uniform(k, (d, d), F32, -lim, lim)
    z = lambda n: jnp.zeros((1, n), F32)
    return dict(wq=w(ks[0]), bq=z(d), wk=w(ks[1]), bk=z(d),
                wv=w(ks[2]), bv=z(d), wo=w(ks[3]), bo=z(d),
                gamma=jnp.ones((1, d), F32), beta=z(d))


def _init_ffn_params(key, d, m):
    k1, k2 = jax.random.split(key)
    s1, s2 = 1.0 / math.sqrt(d), 1.0 / math.sqrt(m)
    return dict(w1=jax.random.uniform(k1, (d, m), F32, -s1, s1),
                b1=jnp.zeros((1, m), F32),
                w2=jax.random.uniform(k2, (m, d), F32, -s2, s2),
                b2=jnp.zeros((1, d), F32),
                gamma=jnp.ones((1, d), F32), beta=jnp.zeros((1, d), F32))


def init_block_params(key, d, mlp_dim):
    k1, k2, k3, k4 = jax.random.split(key, 4)
    return dict(masked_click_to_scene=_init_attn_params(k1, d),
                click_to_click=_init_attn_params(k2, d),
                mlp=_init_ffn_params(k3, d, mlp_dim),
                scene_to_click=_init_attn_params(k4, d))


def prepare_params(params):
    """Cast weight matrices to bf16 (MXU operands) and fuse the self-attention
    Q/K projection into a single (D, 2D) matmul; biases / LN params stay f32."""
    def cross(p):
        return dict(wq=p["wq"].astype(BF16), bq=p["bq"],
                    wk=p["wk"].astype(BF16), bk=p["bk"],
                    wv=p["wv"].astype(BF16), bv=p["bv"],
                    wo=p["wo"].astype(BF16), bo=p["bo"],
                    gamma=p["gamma"], beta=p["beta"])

    def self_attn(p):
        return dict(wqk=jnp.concatenate([p["wq"], p["wk"]], axis=1).astype(BF16),
                    bqk=jnp.concatenate([p["bq"], p["bk"]], axis=1),
                    wv=p["wv"].astype(BF16), bv=p["bv"],
                    wo=p["wo"].astype(BF16), bo=p["bo"],
                    gamma=p["gamma"], beta=p["beta"])

    def ffn(p):
        return dict(w1=p["w1"].astype(BF16), b1=p["b1"],
                    w2=p["w2"].astype(BF16), b2=p["b2"],
                    gamma=p["gamma"], beta=p["beta"])

    return dict(masked_click_to_scene=cross(params["masked_click_to_scene"]),
                click_to_click=self_attn(params["click_to_click"]),
                mlp=ffn(params["mlp"]),
                scene_to_click=cross(params["scene_to_click"]))


# ---------------------------------------------------------------------------
if __name__ == "__main__":
    key = jax.random.PRNGKey(0)
    N_POINTS, N_CLICKS, D, HEADS, MLP_DIM = 384, 8, 64, 4, 128

    kp, kc, kpp, kcp, kparams = jax.random.split(key, 5)
    scene = jax.random.normal(kp, (N_POINTS, D), F32)
    clicks = jax.random.normal(kc, (N_CLICKS, D), F32)
    scene_pe = jax.random.normal(kpp, (N_POINTS, D), F32)
    clicks_pe = jax.random.normal(kcp, (N_CLICKS, D), F32)
    # two batches, each with half of the points / clicks
    scene_batch = jnp.concatenate([jnp.zeros(N_POINTS // 2, jnp.int32),
                                   jnp.ones(N_POINTS // 2, jnp.int32)])
    clicks_batch = jnp.concatenate([jnp.zeros(N_CLICKS // 2, jnp.int32),
                                    jnp.ones(N_CLICKS // 2, jnp.int32)])

    params = prepare_params(init_block_params(kparams, D, MLP_DIM))

    # small tiles so the demo exercises both grids (3 key blocks, 3 query blocks)
    scene_out, clicks_out = agile3d_decoder_block(
        scene, clicks, scene_pe, clicks_pe, scene_batch, clicks_batch, params,
        attn_mask=None, skip_first_layer_pe=False, num_heads=HEADS,
        block_q=128, block_k=128)

    scene_out = jax.block_until_ready(scene_out)
    clicks_out = jax.block_until_ready(clicks_out)

    assert scene_out.shape == (N_POINTS, D)
    assert clicks_out.shape == (N_CLICKS, D)
    assert bool(jnp.all(jnp.isfinite(scene_out)))
    assert bool(jnp.all(jnp.isfinite(clicks_out)))
    print("KERNEL_OK")
</pallas_src>

<mosaic_0001>
module attributes {stable_mosaic.version = 11 : i64} {
  func.func @_clicks_path_kernel(%arg0: i32, %arg1: memref<8x64xf32, #tpu.memory_space<vmem>>, %arg2: memref<8x64xf32, #tpu.memory_space<vmem>>, %arg3: memref<8x1xi32, #tpu.memory_space<vmem>>, %arg4: memref<1x8xi32, #tpu.memory_space<vmem>>, %arg5: memref<128x64xf32, #tpu.memory_space<vmem>>, %arg6: memref<128x64xf32, #tpu.memory_space<vmem>>, %arg7: memref<1x128xi32, #tpu.memory_space<vmem>>, %arg8: memref<64x64xbf16, #tpu.memory_space<vmem>>, %arg9: memref<1x64xf32, #tpu.memory_space<vmem>>, %arg10: memref<64x64xbf16, #tpu.memory_space<vmem>>, %arg11: memref<1x64xf32, #tpu.memory_space<vmem>>, %arg12: memref<64x64xbf16, #tpu.memory_space<vmem>>, %arg13: memref<1x64xf32, #tpu.memory_space<vmem>>, %arg14: memref<64x64xbf16, #tpu.memory_space<vmem>>, %arg15: memref<1x64xf32, #tpu.memory_space<vmem>>, %arg16: memref<1x64xf32, #tpu.memory_space<vmem>>, %arg17: memref<1x64xf32, #tpu.memory_space<vmem>>, %arg18: memref<64x128xbf16, #tpu.memory_space<vmem>>, %arg19: memref<1x128xf32, #tpu.memory_space<vmem>>, %arg20: memref<64x64xbf16, #tpu.memory_space<vmem>>, %arg21: memref<1x64xf32, #tpu.memory_space<vmem>>, %arg22: memref<64x64xbf16, #tpu.memory_space<vmem>>, %arg23: memref<1x64xf32, #tpu.memory_space<vmem>>, %arg24: memref<1x64xf32, #tpu.memory_space<vmem>>, %arg25: memref<1x64xf32, #tpu.memory_space<vmem>>, %arg26: memref<64x128xbf16, #tpu.memory_space<vmem>>, %arg27: memref<1x128xf32, #tpu.memory_space<vmem>>, %arg28: memref<128x64xbf16, #tpu.memory_space<vmem>>, %arg29: memref<1x64xf32, #tpu.memory_space<vmem>>, %arg30: memref<1x64xf32, #tpu.memory_space<vmem>>, %arg31: memref<1x64xf32, #tpu.memory_space<vmem>>, %arg32: memref<8x64xf32, #tpu.memory_space<vmem>>, %arg33: memref<4x8x16xf32, #tpu.memory_space<vmem>>, %arg34: memref<4x8x1xf32, #tpu.memory_space<vmem>>, %arg35: memref<4x8x1xf32, #tpu.memory_space<vmem>>, %arg36: memref<4x8x16xf32, #tpu.memory_space<vmem>>) attributes {dimension_semantics = [#tpu.dimension_semantics<arbitrary>], iteration_bounds = array<i64: 3>, scalar_prefetch = 0 : i64, scratch_operands = 4 : i64, tpu.core_type = #tpu.core_type<tc>, window_params = [{pipeline_mode = #tpu.pipeline_mode<synchronous>, transform_indices = @transform_0, window_bounds = array<i64: 8, 64>}, {pipeline_mode = #tpu.pipeline_mode<synchronous>, transform_indices = @transform_1, window_bounds = array<i64: 8, 64>}, {pipeline_mode = #tpu.pipeline_mode<synchronous>, transform_indices = @transform_2, window_bounds = array<i64: 8, 1>}, {pipeline_mode = #tpu.pipeline_mode<synchronous>, transform_indices = @transform_3, window_bounds = array<i64: 1, 8>}, {transform_indices = @transform_4, window_bounds = array<i64: 128, 64>}, {transform_indices = @transform_5, window_bounds = array<i64: 128, 64>}, {transform_indices = @transform_6, window_bounds = array<i64: 1, 128>}, {pipeline_mode = #tpu.pipeline_mode<synchronous>, transform_indices = @transform_7, window_bounds = array<i64: 64, 64>}, {pipeline_mode = #tpu.pipeline_mode<synchronous>, transform_indices = @transform_8, window_bounds = array<i64: 1, 64>}, {pipeline_mode = #tpu.pipeline_mode<synchronous>, transform_indices = @transform_9, window_bounds = array<i64: 64, 64>}, {pipeline_mode = #tpu.pipeline_mode<synchronous>, transform_indices = @transform_10, window_bounds = array<i64: 1, 64>}, {pipeline_mode = #tpu.pipeline_mode<synchronous>, transform_indices = @transform_11, window_bounds = array<i64: 64, 64>}, {pipeline_mode = #tpu.pipeline_mode<synchronous>, transform_indices = @transform_12, window_bounds = array<i64: 1, 64>}, {pipeline_mode = #tpu.pipeline_mode<synchronous>, transform_indices = @transform_13, window_bounds = array<i64: 64, 64>}, {pipeline_mode = #tpu.pipeline_mode<synchronous>, transform_indices = @transform_14, window_bounds = array<i64: 1, 64>}, {pipeline_mode = #tpu.pipeline_mode<synchronous>, transform_indices = @transform_15, window_bounds = array<i64: 1, 64>}, {pipeline_mode = #tpu.pipeline_mode<synchronous>, transform_indices = @transform_16, window_bounds = array<i64: 1, 64>}, {pipeline_mode = #tpu.pipeline_mode<synchronous>, transform_indices = @transform_17, window_bounds = array<i64: 64, 128>}, {pipeline_mode = #tpu.pipeline_mode<synchronous>, transform_indices = @transform_18, window_bounds = array<i64: 1, 128>}, {pipeline_mode = #tpu.pipeline_mode<synchronous>, transform_indices = @transform_19, window_bounds = array<i64: 64, 64>}, {pipeline_mode = #tpu.pipeline_mode<synchronous>, transform_indices = @transform_20, window_bounds = array<i64: 1, 64>}, {pipeline_mode = #tpu.pipeline_mode<synchronous>, transform_indices = @transform_21, window_bounds = array<i64: 64, 64>}, {pipeline_mode = #tpu.pipeline_mode<synchronous>, transform_indices = @transform_22, window_bounds = array<i64: 1, 64>}, {pipeline_mode = #tpu.pipeline_mode<synchronous>, transform_indices = @transform_23, window_bounds = array<i64: 1, 64>}, {pipeline_mode = #tpu.pipeline_mode<synchronous>, transform_indices = @transform_24, window_bounds = array<i64: 1, 64>}, {pipeline_mode = #tpu.pipeline_mode<synchronous>, transform_indices = @transform_25, window_bounds = array<i64: 64, 128>}, {pipeline_mode = #tpu.pipeline_mode<synchronous>, transform_indices = @transform_26, window_bounds = array<i64: 1, 128>}, {pipeline_mode = #tpu.pipeline_mode<synchronous>, transform_indices = @transform_27, window_bounds = array<i64: 128, 64>}, {pipeline_mode = #tpu.pipeline_mode<synchronous>, transform_indices = @transform_28, window_bounds = array<i64: 1, 64>}, {pipeline_mode = #tpu.pipeline_mode<synchronous>, transform_indices = @transform_29, window_bounds = array<i64: 1, 64>}, {pipeline_mode = #tpu.pipeline_mode<synchronous>, transform_indices = @transform_30, window_bounds = array<i64: 1, 64>}, {pipeline_mode = #tpu.pipeline_mode<synchronous>, transform_indices = @transform_31, window_bounds = array<i64: 8, 64>}]} {
    %c0_i32 = arith.constant 0 : i32
    %0 = arith.cmpi eq, %arg0, %c0_i32 : i32
    %1 = arith.extui %0 : i1 to i32
    %c0_i32_0 = arith.constant 0 : i32
    %2 = arith.cmpi ne, %1, %c0_i32_0 : i32
    scf.if %2 {
      %c0_44 = arith.constant 0 : index
      %c0_45 = arith.constant 0 : index
      %63 = vector.load %arg1[%c0_44, %c0_45] : memref<8x64xf32, #tpu.memory_space<vmem>>, vector<8x64xf32>
      %c0_46 = arith.constant 0 : index
      %c0_47 = arith.constant 0 : index
      %64 = vector.load %arg2[%c0_46, %c0_47] : memref<8x64xf32, #tpu.memory_space<vmem>>, vector<8x64xf32>
      %65 = arith.addf %63, %64 : vector<8x64xf32>
      %66 = arith.truncf %65 : vector<8x64xf32> to vector<8x64xbf16>
      %c0_48 = arith.constant 0 : index
      %c0_49 = arith.constant 0 : index
      %67 = vector.load %arg8[%c0_48, %c0_49] : memref<64x64xbf16, #tpu.memory_space<vmem>>, vector<64x64xbf16>
      %cst_50 = arith.constant dense<0.000000e+00> : vector<8x64xf32>
      %68 = tpu.matmul %66, %67, %cst_50 {dimension_numbers = #tpu.dot_dimension_numbers<[1], [0], [0], [1], [0, 0, 1, 1], [], []>} : vector<8x64xbf16>, vector<64x64xbf16>, vector<8x64xf32> -> vector<8x64xf32>
      %c0_51 = arith.constant 0 : index
      %c0_52 = arith.constant 0 : index
      %69 = vector.load %arg9[%c0_51, %c0_52] : memref<1x64xf32, #tpu.memory_space<vmem>>, vector<1x64xf32>
      %70 = vector.broadcast %69 : vector<1x64xf32> to vector<8x64xf32>
      %71 = arith.addf %68, %70 : vector<8x64xf32>
      %cst_53 = arith.constant 2.500000e-01 : f32
      %72 = vector.broadcast %cst_53 : f32 to vector<8x64xf32>
      %73 = arith.mulf %71, %72 : vector<8x64xf32>
      %74 = vector.shape_cast %73 : vector<8x64xf32> to vector<8x4x16xf32>
      %75 = tpu.transpose %74, [1, 0, 2] : vector<8x4x16xf32> -> vector<4x8x16xf32>
      %c0_54 = arith.constant 0 : index
      %c0_55 = arith.constant 0 : index
      %c0_56 = arith.constant 0 : index
      %76 = vector.load %arg33[%c0_54, %c0_55, %c0_56] : memref<4x8x16xf32, #tpu.memory_space<vmem>>, vector<4x8x16xf32>
      tpu.vector_store %arg33[%c0_54, %c0_55, %c0_56], %75 {strides = array<i32>} : memref<4x8x16xf32, #tpu.memory_space<vmem>>, vector<4x8x16xf32>,
      %cst_57 = arith.constant -1.000000e+30 : f32
      %77 = vector.broadcast %cst_57 : f32 to vector<4x8x1xf32>
      %c0_58 = arith.constant 0 : index
      %c0_59 = arith.constant 0 : index
      %c0_60 = arith.constant 0 : index
      %78 = vector.load %arg34[%c0_58, %c0_59, %c0_60] : memref<4x8x1xf32, #tpu.memory_space<vmem>>, vector<4x8x1xf32>
      tpu.vector_store %arg34[%c0_58, %c0_59, %c0_60], %77 {strides = array<i32>} : memref<4x8x1xf32, #tpu.memory_space<vmem>>, vector<4x8x1xf32>,
      %cst_61 = arith.constant 0.000000e+00 : f32
      %79 = vector.broadcast %cst_61 : f32 to vector<4x8x1xf32>
      %c0_62 = arith.constant 0 : index
      %c0_63 = arith.constant 0 : index
      %c0_64 = arith.constant 0 : index
      %80 = vector.load %arg35[%c0_62, %c0_63, %c0_64] : memref<4x8x1xf32, #tpu.memory_space<vmem>>, vector<4x8x1xf32>
      tpu.vector_store %arg35[%c0_62, %c0_63, %c0_64], %79 {strides = array<i32>} : memref<4x8x1xf32, #tpu.memory_space<vmem>>, vector<4x8x1xf32>,
      %cst_65 = arith.constant 0.000000e+00 : f32
      %81 = vector.broadcast %cst_65 : f32 to vector<4x8x16xf32>
      %c0_66 = arith.constant 0 : index
      %c0_67 = arith.constant 0 : index
      %c0_68 = arith.constant 0 : index
      %82 = vector.load %arg36[%c0_66, %c0_67, %c0_68] : memref<4x8x16xf32, #tpu.memory_space<vmem>>, vector<4x8x16xf32>
      tpu.vector_store %arg36[%c0_66, %c0_67, %c0_68], %81 {strides = array<i32>} : memref<4x8x16xf32, #tpu.memory_space<vmem>>, vector<4x8x16xf32>,
    } else {
    }
    %c0 = arith.constant 0 : index
    %c0_1 = arith.constant 0 : index
    %3 = vector.load %arg5[%c0, %c0_1] : memref<128x64xf32, #tpu.memory_space<vmem>>, vector<128x64xf32>
    %c0_2 = arith.constant 0 : index
    %c0_3 = arith.constant 0 : index
    %4 = vector.load %arg6[%c0_2, %c0_3] : memref<128x64xf32, #tpu.memory_space<vmem>>, vector<128x64xf32>
    %5 = arith.addf %3, %4 : vector<128x64xf32>
    %6 = arith.truncf %5 : vector<128x64xf32> to vector<128x64xbf16>
    %c0_4 = arith.constant 0 : index
    %c0_5 = arith.constant 0 : index
    %7 = vector.load %arg10[%c0_4, %c0_5] : memref<64x64xbf16, #tpu.memory_space<vmem>>, vector<64x64xbf16>
    %cst = arith.constant dense<0.000000e+00> : vector<128x64xf32>
    %8 = tpu.matmul %6, %7, %cst {dimension_numbers = #tpu.dot_dimension_numbers<[1], [0], [0], [1], [0, 0, 1, 1], [], []>} : vector<128x64xbf16>, vector<64x64xbf16>, vector<128x64xf32> -> vector<128x64xf32>
    %c0_6 = arith.constant 0 : index
    %c0_7 = arith.constant 0 : index
    %9 = vector.load %arg11[%c0_6, %c0_7] : memref<1x64xf32, #tpu.memory_space<vmem>>, vector<1x64xf32>
    %10 = vector.broadcast %9 : vector<1x64xf32> to vector<128x64xf32>
    %11 = arith.addf %8, %10 : vector<128x64xf32>
    %12 = arith.truncf %3 : vector<128x64xf32> to vector<128x64xbf16>
    %c0_8 = arith.constant 0 : index
    %c0_9 = arith.constant 0 : index
    %13 = vector.load %arg12[%c0_8, %c0_9] : memref<64x64xbf16, #tpu.memory_space<vmem>>, vector<64x64xbf16>
    %cst_10 = arith.constant dense<0.000000e+00> : vector<128x64xf32>
    %14 = tpu.matmul %12, %13, %cst_10 {dimension_numbers = #tpu.dot_dimension_numbers<[1], [0], [0], [1], [0, 0, 1, 1], [], []>} : vector<128x64xbf16>, vector<64x64xbf16>, vector<128x64xf32> -> vector<128x64xf32>
    %c0_11 = arith.constant 0 : index
    %c0_12 = arith.constant 0 : index
    %15 = vector.load %arg13[%c0_11, %c0_12] : memref<1x64xf32, #tpu.memory_space<vmem>>, vector<1x64xf32>
    %16 = vector.broadcast %15 : vector<1x64xf32> to vector<128x64xf32>
    %17 = arith.addf %14, %16 : vector<128x64xf32>
    %18 = vector.shape_cast %11 : vector<128x64xf32> to vector<128x4x16xf32>
    %19 = tpu.transpose %18, [1, 0, 2] : vector<128x4x16xf32> -> vector<4x128x16xf32>
    %20 = vector.shape_cast %17 : vector<128x64xf32> to vector<128x4x16xf32>
    %21 = tpu.transpose %20, [1, 0, 2] : vector<128x4x16xf32> -> vector<4x128x16xf32>
    %c0_13 = arith.constant 0 : index
    %c0_14 = arith.constant 0 : index
    %c0_15 = arith.constant 0 : index
    %22 = vector.load %arg33[%c0_13, %c0_14, %c0_15] : memref<4x8x16xf32, #tpu.memory_space<vmem>>, vector<4x8x16xf32>
    %23 = arith.truncf %22 : vector<4x8x16xf32> to vector<4x8x16xbf16>
    %24 = arith.truncf %19 : vector<4x128x16xf32> to vector<4x128x16xbf16>
    "tpu.trace_start"() <{level = 10 : i32, message = "hqd,hkd->hqk"}> : () -> ()
    %cst_16 = arith.constant dense<0.000000e+00> : vector<4x8x128xf32>
    %25 = tpu.matmul %23, %24, %cst_16 {dimension_numbers = #tpu.dot_dimension_numbers<[2], [2], [1], [1], [0, 0, 0, 1, 1, 1], [0], [0]>} : vector<4x8x16xbf16>, vector<4x128x16xbf16>, vector<4x8x128xf32> -> vector<4x8x128xf32>
    "tpu.trace_stop"() : () -> ()
    %c0_17 = arith.constant 0 : index
    %c0_18 = arith.constant 0 : index
    %26 = vector.load %arg3[%c0_17, %c0_18] : memref<8x1xi32, #tpu.memory_space<vmem>>, vector<8x1xi32>
    %c0_19 = arith.constant 0 : index
    %c0_20 = arith.constant 0 : index
    %27 = vector.load %arg7[%c0_19, %c0_20] : memref<1x128xi32, #tpu.memory_space<vmem>>, vector<1x128xi32>
    %28 = vector.broadcast %26 : vector<8x1xi32> to vector<8x128xi32>
    %29 = vector.broadcast %27 : vector<1x128xi32> to vector<8x128xi32>
    %30 = arith.cmpi eq, %28, %29 : vector<8x128xi32>
    %31 = vector.shape_cast %30 : vector<8x128xi1> to vector<1x8x128xi1>
    %cst_21 = arith.constant -1.000000e+09 : f32
    %32 = vector.shape_cast %31 : vector<1x8x128xi1> to vector<1x8x128xi1>
    %33 = vector.broadcast %32 : vector<1x8x128xi1> to vector<4x8x128xi1>
    %34 = vector.broadcast %cst_21 : f32 to vector<4x8x128xf32>
    %35 = arith.select %33, %25, %34 : vector<4x8x128xi1>, vector<4x8x128xf32>
    %c0_22 = arith.constant 0 : index
    %c0_23 = arith.constant 0 : index
    %c0_24 = arith.constant 0 : index
    %36 = vector.load %arg34[%c0_22, %c0_23, %c0_24] : memref<4x8x1xf32, #tpu.memory_space<vmem>>, vector<4x8x1xf32>
    %cst_25 = arith.constant dense<0xFF800000> : vector<4x8xf32>
    %37 = vector.multi_reduction <maximumf>, %35, %cst_25 [2] : vector<4x8x128xf32> to vector<4x8xf32>
    %38 = vector.shape_cast %37 : vector<4x8xf32> to vector<4x8x1xf32>
    %39 = arith.maximumf %36, %38 : vector<4x8x1xf32>
    %40 = arith.subf %36, %39 : vector<4x8x1xf32>
    %41 = math.exp %40 : vector<4x8x1xf32>
    %42 = vector.broadcast %39 : vector<4x8x1xf32> to vector<4x8x128xf32>
    %43 = arith.subf %35, %42 : vector<4x8x128xf32>
    %44 = math.exp %43 : vector<4x8x128xf32>
    %c0_26 = arith.constant 0 : index
    %c0_27 = arith.constant 0 : index
    %c0_28 = arith.constant 0 : index
    %45 = vector.load %arg35[%c0_26, %c0_27, %c0_28] : memref<4x8x1xf32, #tpu.memory_space<vmem>>, vector<4x8x1xf32>
    %46 = arith.mulf %41, %45 : vector<4x8x1xf32>
    %cst_29 = arith.constant dense<0.000000e+00> : vector<4x8xf32>
    %47 = vector.multi_reduction <add>, %44, %cst_29 [2] : vector<4x8x128xf32> to vector<4x8xf32>
    %48 = vector.shape_cast %47 : vector<4x8xf32> to vector<4x8x1xf32>
    %49 = arith.addf %46, %48 : vector<4x8x1xf32>
    %c0_30 = arith.constant 0 : index
    %c0_31 = arith.constant 0 : index
    %c0_32 = arith.constant 0 : index
    %50 = vector.load %arg35[%c0_30, %c0_31, %c0_32] : memref<4x8x1xf32, #tpu.memory_space<vmem>>, vector<4x8x1xf32>
    tpu.vector_store %arg35[%c0_30, %c0_31, %c0_32], %49 {strides = array<i32>} : memref<4x8x1xf32, #tpu.memory_space<vmem>>, vector<4x8x1xf32>,
    %c0_33 = arith.constant 0 : index
    %c0_34 = arith.constant 0 : index
    %c0_35 = arith.constant 0 : index
    %51 = vector.load %arg36[%c0_33, %c0_34, %c0_35] : memref<4x8x16xf32, #tpu.memory_space<vmem>>, vector<4x8x16xf32>
    %52 = vector.broadcast %41 : vector<4x8x1xf32> to vector<4x8x16xf32>
    %53 = arith.mulf %52, %51 : vector<4x8x16xf32>
    %54 = arith.truncf %44 : vector<4x8x128xf32> to vector<4x8x128xbf16>
    %55 = arith.truncf %21 : vector<4x128x16xf32> to vector<4x128x16xbf16>
    "tpu.trace_start"() <{level = 10 : i32, message = "hqk,hkd->hqd"}> : () -> ()
    %cst_36 = arith.constant dense<0.000000e+00> : vector<4x8x16xf32>
    %56 = tpu.matmul %54, %55, %cst_36 {dimension_numbers = #tpu.dot_dimension_numbers<[2], [1], [1], [2], [0, 0, 0, 1, 1, 2], [0], [0]>} : vector<4x8x128xbf16>, vector<4x128x16xbf16>, vector<4x8x16xf32> -> vector<4x8x16xf32>
    "tpu.trace_stop"() : () -> ()
    %57 = arith.addf %53, %56 : vector<4x8x16xf32>
    %c0_37 = arith.constant 0 : index
    %c0_38 = arith.constant 0 : index
    %c0_39 = arith.constant 0 : index
    %58 = vector.load %arg36[%c0_37, %c0_38, %c0_39] : memref<4x8x16xf32, #tpu.memory_space<vmem>>, vector<4x8x16xf32>
    tpu.vector_store %arg36[%c0_37, %c0_38, %c0_39], %57 {strides = array<i32>} : memref<4x8x16xf32, #tpu.memory_space<vmem>>, vector<4x8x16xf32>,
    %c0_40 = arith.constant 0 : index
    %c0_41 = arith.constant 0 : index
    %c0_42 = arith.constant 0 : index
    %59 = vector.load %arg34[%c0_40, %c0_41, %c0_42] : memref<4x8x1xf32, #tpu.memory_space<vmem>>, vector<4x8x1xf32>
    tpu.vector_store %arg34[%c0_40, %c0_41, %c0_42], %39 {strides = array<i32>} : memref<4x8x1xf32, #tpu.memory_space<vmem>>, vector<4x8x1xf32>,
    %c2_i32 = arith.constant 2 : i32
    %60 = arith.cmpi eq, %arg0, %c2_i32 : i32
    %61 = arith.extui %60 : i1 to i32
    %c0_i32_43 = arith.constant 0 : i32
    %62 = arith.cmpi ne, %61, %c0_i32_43 : i32
    scf.if %62 {
      %c0_44 = arith.constant 0 : index
      %c0_45 = arith.constant 0 : index
      %63 = vector.load %arg1[%c0_44, %c0_45] : memref<8x64xf32, #tpu.memory_space<vmem>>, vector<8x64xf32>
      %c0_46 = arith.constant 0 : index
      %c0_47 = arith.constant 0 : index
      %c0_48 = arith.constant 0 : index
      %64 = vector.load %arg36[%c0_46, %c0_47, %c0_48] : memref<4x8x16xf32, #tpu.memory_space<vmem>>, vector<4x8x16xf32>
      %c0_49 = arith.constant 0 : index
      %c0_50 = arith.constant 0 : index
      %c0_51 = arith.constant 0 : index
      %65 = vector.load %arg35[%c0_49, %c0_50, %c0_51] : memref<4x8x1xf32, #tpu.memory_space<vmem>>, vector<4x8x1xf32>
      %66 = tpu.reciprocal %65 {approx = true} : vector<4x8x1xf32> -> vector<4x8x1xf32>
      %67 = vector.broadcast %66 : vector<4x8x1xf32> to vector<4x8x16xf32>
      %68 = arith.mulf %64, %67 : vector<4x8x16xf32>
      %69 = tpu.transpose %68, [1, 0, 2] : vector<4x8x16xf32> -> vector<8x4x16xf32>
      %70 = vector.shape_cast %69 : vector<8x4x16xf32> to vector<8x64xf32>
      %71 = arith.truncf %70 : vector<8x64xf32> to vector<8x64xbf16>
      %c0_52 = arith.constant 0 : index
      %c0_53 = arith.constant 0 : index
      %72 = vector.load %arg14[%c0_52, %c0_53] : memref<64x64xbf16, #tpu.memory_space<vmem>>, vector<64x64xbf16>
      %cst_54 = arith.constant dense<0.000000e+00> : vector<8x64xf32>
      %73 = tpu.matmul %71, %72, %cst_54 {dimension_numbers = #tpu.dot_dimension_numbers<[1], [0], [0], [1], [0, 0, 1, 1], [], []>} : vector<8x64xbf16>, vector<64x64xbf16>, vector<8x64xf32> -> vector<8x64xf32>
      %74 = arith.addf %63, %73 : vector<8x64xf32>
      %c0_55 = arith.constant 0 : index
      %c0_56 = arith.constant 0 : index
      %75 = vector.load %arg15[%c0_55, %c0_56] : memref<1x64xf32, #tpu.memory_space<vmem>>, vector<1x64xf32>
      %76 = vector.broadcast %75 : vector<1x64xf32> to vector<8x64xf32>
      %77 = arith.addf %74, %76 : vector<8x64xf32>
      %c0_57 = arith.constant 0 : index
      %c0_58 = arith.constant 0 : index
      %78 = vector.load %arg16[%c0_57, %c0_58] : memref<1x64xf32, #tpu.memory_space<vmem>>, vector<1x64xf32>
      %c0_59 = arith.constant 0 : index
      %c0_60 = arith.constant 0 : index
      %79 = vector.load %arg17[%c0_59, %c0_60] : memref<1x64xf32, #tpu.memory_space<vmem>>, vector<1x64xf32>
      %cst_61 = arith.constant dense<0.000000e+00> : vector<8xf32>
      %80 = vector.multi_reduction <add>, %77, %cst_61 [1] : vector<8x64xf32> to vector<8xf32>
      %81 = vector.shape_cast %80 : vector<8xf32> to vector<8x1xf32>
      %cst_62 = arith.constant 6.400000e+01 : f32
      %82 = vector.broadcast %cst_62 : f32 to vector<8x1xf32>
      %83 = arith.divf %81, %82 : vector<8x1xf32>
      %84 = vector.broadcast %83 : vector<8x1xf32> to vector<8x64xf32>
      %85 = arith.subf %77, %84 : vector<8x64xf32>
      %86 = arith.mulf %85, %85 : vector<8x64xf32>
      %cst_63 = arith.constant dense<0.000000e+00> : vector<8xf32>
      %87 = vector.multi_reduction <add>, %86, %cst_63 [1] : vector<8x64xf32> to vector<8xf32>
      %88 = vector.shape_cast %87 : vector<8xf32> to vector<8x1xf32>
      %cst_64 = arith.constant 6.400000e+01 : f32
      %89 = vector.broadcast %cst_64 : f32 to vector<8x1xf32>
      %90 = arith.divf %88, %89 : vector<8x1xf32>
      %cst_65 = arith.constant 9.99999974E-6 : f32
      %91 = vector.broadcast %cst_65 : f32 to vector<8x1xf32>
      %92 = arith.addf %90, %91 : vector<8x1xf32>
      %93 = math.rsqrt %92 : vector<8x1xf32>
      %94 = vector.broadcast %93 : vector<8x1xf32> to vector<8x64xf32>
      %95 = arith.mulf %85, %94 : vector<8x64xf32>
      %96 = vector.broadcast %78 : vector<1x64xf32> to vector<8x64xf32>
      %97 = arith.mulf %95, %96 : vector<8x64xf32>
      %98 = vector.broadcast %79 : vector<1x64xf32> to vector<8x64xf32>
      %99 = arith.addf %97, %98 : vector<8x64xf32>
      %c0_66 = arith.constant 0 : index
      %c0_67 = arith.constant 0 : index
      %100 = vector.load %arg2[%c0_66, %c0_67] : memref<8x64xf32, #tpu.memory_space<vmem>>, vector<8x64xf32>
      %101 = arith.addf %99, %100 : vector<8x64xf32>
      %102 = arith.truncf %101 : vector<8x64xf32> to vector<8x64xbf16>
      %c0_68 = arith.constant 0 : index
      %c0_69 = arith.constant 0 : index
      %103 = vector.load %arg18[%c0_68, %c0_69] : memref<64x128xbf16, #tpu.memory_space<vmem>>, vector<64x128xbf16>
      %cst_70 = arith.constant dense<0.000000e+00> : vector<8x128xf32>
      %104 = tpu.matmul %102, %103, %cst_70 {dimension_numbers = #tpu.dot_dimension_numbers<[1], [0], [0], [1], [0, 0, 1, 1], [], []>} : vector<8x64xbf16>, vector<64x128xbf16>, vector<8x128xf32> -> vector<8x128xf32>
      %c0_71 = arith.constant 0 : index
      %c0_72 = arith.constant 0 : index
      %105 = vector.load %arg19[%c0_71, %c0_72] : memref<1x128xf32, #tpu.memory_space<vmem>>, vector<1x128xf32>
      %106 = vector.broadcast %105 : vector<1x128xf32> to vector<8x128xf32>
      %107 = arith.addf %104, %106 : vector<8x128xf32>
      %108 = arith.truncf %99 : vector<8x64xf32> to vector<8x64xbf16>
      %c0_73 = arith.constant 0 : index
      %c0_74 = arith.constant 0 : index
      %109 = vector.load %arg20[%c0_73, %c0_74] : memref<64x64xbf16, #tpu.memory_space<vmem>>, vector<64x64xbf16>
      %cst_75 = arith.constant dense<0.000000e+00> : vector<8x64xf32>
      %110 = tpu.matmul %108, %109, %cst_75 {dimension_numbers = #tpu.dot_dimension_numbers<[1], [0], [0], [1], [0, 0, 1, 1], [], []>} : vector<8x64xbf16>, vector<64x64xbf16>, vector<8x64xf32> -> vector<8x64xf32>
      %c0_76 = arith.constant 0 : index
      %c0_77 = arith.constant 0 : index
      %111 = vector.load %arg21[%c0_76, %c0_77] : memref<1x64xf32, #tpu.memory_space<vmem>>, vector<1x64xf32>
      %112 = vector.broadcast %111 : vector<1x64xf32> to vector<8x64xf32>
      %113 = arith.addf %110, %112 : vector<8x64xf32>
      %114 = vector.extract_strided_slice %107 {offsets = [0, 0], sizes = [8, 64], strides = [1, 1]} : vector<8x128xf32> to vector<8x64xf32>
      %cst_78 = arith.constant 2.500000e-01 : f32
      %115 = vector.broadcast %cst_78 : f32 to vector<8x64xf32>
      %116 = arith.mulf %114, %115 : vector<8x64xf32>
      %117 = vector.shape_cast %116 : vector<8x64xf32> to vector<8x4x16xf32>
      %118 = tpu.transpose %117, [1, 0, 2] : vector<8x4x16xf32> -> vector<4x8x16xf32>
      %119 = vector.extract_strided_slice %107 {offsets = [0, 64], sizes = [8, 64], strides = [1, 1]} : vector<8x128xf32> to vector<8x64xf32>
      %120 = vector.shape_cast %119 : vector<8x64xf32> to vector<8x4x16xf32>
      %121 = tpu.transpose %120, [1, 0, 2] : vector<8x4x16xf32> -> vector<4x8x16xf32>
      %122 = vector.shape_cast %113 : vector<8x64xf32> to vector<8x4x16xf32>
      %123 = tpu.transpose %122, [1, 0, 2] : vector<8x4x16xf32> -> vector<4x8x16xf32>
      %124 = arith.truncf %118 : vector<4x8x16xf32> to vector<4x8x16xbf16>
      %125 = arith.truncf %121 : vector<4x8x16xf32> to vector<4x8x16xbf16>
      "tpu.trace_start"() <{level = 10 : i32, message = "hqd,hkd->hqk"}> : () -> ()
      %cst_79 = arith.constant dense<0.000000e+00> : vector<4x8x8xf32>
      %126 = tpu.matmul %124, %125, %cst_79 {dimension_numbers = #tpu.dot_dimension_numbers<[2], [2], [1], [1], [0, 0, 0, 1, 1, 1], [0], [0]>} : vector<4x8x16xbf16>, vector<4x8x16xbf16>, vector<4x8x8xf32> -> vector<4x8x8xf32>
      "tpu.trace_stop"() : () -> ()
      %c0_80 = arith.constant 0 : index
      %c0_81 = arith.constant 0 : index
      %127 = vector.load %arg3[%c0_80, %c0_81] : memref<8x1xi32, #tpu.memory_space<vmem>>, vector<8x1xi32>
      %c0_82 = arith.constant 0 : index
      %c0_83 = arith.constant 0 : index
      %128 = vector.load %arg4[%c0_82, %c0_83] : memref<1x8xi32, #tpu.memory_space<vmem>>, vector<1x8xi32>
      %129 = vector.broadcast %127 : vector<8x1xi32> to vector<8x8xi32>
      %130 = vector.broadcast %128 : vector<1x8xi32> to vector<8x8xi32>
      %131 = arith.cmpi eq, %129, %130 : vector<8x8xi32>
      %132 = vector.shape_cast %131 : vector<8x8xi1> to vector<1x8x8xi1>
      %cst_84 = arith.constant -1.000000e+09 : f32
      %133 = vector.shape_cast %132 : vector<1x8x8xi1> to vector<1x8x8xi1>
      %134 = vector.broadcast %133 : vector<1x8x8xi1> to vector<4x8x8xi1>
      %135 = vector.broadcast %cst_84 : f32 to vector<4x8x8xf32>
      %136 = arith.select %134, %126, %135 : vector<4x8x8xi1>, vector<4x8x8xf32>
      %cst_85 = arith.constant dense<0xFF800000> : vector<4x8xf32>
      %137 = vector.multi_reduction <maximumf>, %136, %cst_85 [2] : vector<4x8x8xf32> to vector<4x8xf32>
      %138 = vector.shape_cast %137 : vector<4x8xf32> to vector<4x8x1xf32>
      %139 = vector.broadcast %138 : vector<4x8x1xf32> to vector<4x8x8xf32>
      %140 = arith.subf %136, %139 : vector<4x8x8xf32>
      %141 = math.exp %140 : vector<4x8x8xf32>
      %cst_86 = arith.constant dense<0.000000e+00> : vector<4x8xf32>
      %142 = vector.multi_reduction <add>, %141, %cst_86 [2] : vector<4x8x8xf32> to vector<4x8xf32>
      %143 = vector.shape_cast %142 : vector<4x8xf32> to vector<4x8x1xf32>
      %144 = tpu.reciprocal %143 {approx = true} : vector<4x8x1xf32> -> vector<4x8x1xf32>
      %145 = vector.broadcast %144 : vector<4x8x1xf32> to vector<4x8x8xf32>
      %146 = arith.mulf %141, %145 : vector<4x8x8xf32>
      %147 = arith.truncf %146 : vector<4x8x8xf32> to vector<4x8x8xbf16>
      %148 = arith.truncf %123 : vector<4x8x16xf32> to vector<4x8x16xbf16>
      "tpu.trace_start"() <{level = 10 : i32, message = "hqk,hkd->hqd"}> : () -> ()
      %cst_87 = arith.constant dense<0.000000e+00> : vector<4x8x16xf32>
      %149 = tpu.matmul %147, %148, %cst_87 {dimension_numbers = #tpu.dot_dimension_numbers<[2], [1], [1], [2], [0, 0, 0, 1, 1, 2], [0], [0]>} : vector<4x8x8xbf16>, vector<4x8x16xbf16>, vector<4x8x16xf32> -> vector<4x8x16xf32>
      "tpu.trace_stop"() : () -> ()
      %150 = tpu.transpose %149, [1, 0, 2] : vector<4x8x16xf32> -> vector<8x4x16xf32>
      %151 = vector.shape_cast %150 : vector<8x4x16xf32> to vector<8x64xf32>
      %152 = arith.truncf %151 : vector<8x64xf32> to vector<8x64xbf16>
      %c0_88 = arith.constant 0 : index
      %c0_89 = arith.constant 0 : index
      %153 = vector.load %arg22[%c0_88, %c0_89] : memref<64x64xbf16, #tpu.memory_space<vmem>>, vector<64x64xbf16>
      %cst_90 = arith.constant dense<0.000000e+00> : vector<8x64xf32>
      %154 = tpu.matmul %152, %153, %cst_90 {dimension_numbers = #tpu.dot_dimension_numbers<[1], [0], [0], [1], [0, 0, 1, 1], [], []>} : vector<8x64xbf16>, vector<64x64xbf16>, vector<8x64xf32> -> vector<8x64xf32>
      %155 = arith.addf %99, %154 : vector<8x64xf32>
      %c0_91 = arith.constant 0 : index
      %c0_92 = arith.constant 0 : index
      %156 = vector.load %arg23[%c0_91, %c0_92] : memref<1x64xf32, #tpu.memory_space<vmem>>, vector<1x64xf32>
      %157 = vector.broadcast %156 : vector<1x64xf32> to vector<8x64xf32>
      %158 = arith.addf %155, %157 : vector<8x64xf32>
      %c0_93 = arith.constant 0 : index
      %c0_94 = arith.constant 0 : index
      %159 = vector.load %arg24[%c0_93, %c0_94] : memref<1x64xf32, #tpu.memory_space<vmem>>, vector<1x64xf32>
      %c0_95 = arith.constant 0 : index
      %c0_96 = arith.constant 0 : index
      %160 = vector.load %arg25[%c0_95, %c0_96] : memref<1x64xf32, #tpu.memory_space<vmem>>, vector<1x64xf32>
      %cst_97 = arith.constant dense<0.000000e+00> : vector<8xf32>
      %161 = vector.multi_reduction <add>, %158, %cst_97 [1] : vector<8x64xf32> to vector<8xf32>
      %162 = vector.shape_cast %161 : vector<8xf32> to vector<8x1xf32>
      %cst_98 = arith.constant 6.400000e+01 : f32
      %163 = vector.broadcast %cst_98 : f32 to vector<8x1xf32>
      %164 = arith.divf %162, %163 : vector<8x1xf32>
      %165 = vector.broadcast %164 : vector<8x1xf32> to vector<8x64xf32>
      %166 = arith.subf %158, %165 : vector<8x64xf32>
      %167 = arith.mulf %166, %166 : vector<8x64xf32>
      %cst_99 = arith.constant dense<0.000000e+00> : vector<8xf32>
      %168 = vector.multi_reduction <add>, %167, %cst_99 [1] : vector<8x64xf32> to vector<8xf32>
      %169 = vector.shape_cast %168 : vector<8xf32> to vector<8x1xf32>
      %cst_100 = arith.constant 6.400000e+01 : f32
      %170 = vector.broadcast %cst_100 : f32 to vector<8x1xf32>
      %171 = arith.divf %169, %170 : vector<8x1xf32>
      %cst_101 = arith.constant 9.99999974E-6 : f32
      %172 = vector.broadcast %cst_101 : f32 to vector<8x1xf32>
      %173 = arith.addf %171, %172 : vector<8x1xf32>
      %174 = math.rsqrt %173 : vector<8x1xf32>
      %175 = vector.broadcast %174 : vector<8x1xf32> to vector<8x64xf32>
      %176 = arith.mulf %166, %175 : vector<8x64xf32>
      %177 = vector.broadcast %159 : vector<1x64xf32> to vector<8x64xf32>
      %178 = arith.mulf %176, %177 : vector<8x64xf32>
      %179 = vector.broadcast %160 : vector<1x64xf32> to vector<8x64xf32>
      %180 = arith.addf %178, %179 : vector<8x64xf32>
      %181 = arith.truncf %180 : vector<8x64xf32> to vector<8x64xbf16>
      %c0_102 = arith.constant 0 : index
      %c0_103 = arith.constant 0 : index
      %182 = vector.load %arg26[%c0_102, %c0_103] : memref<64x128xbf16, #tpu.memory_space<vmem>>, vector<64x128xbf16>
      %cst_104 = arith.constant dense<0.000000e+00> : vector<8x128xf32>
      %183 = tpu.matmul %181, %182, %cst_104 {dimension_numbers = #tpu.dot_dimension_numbers<[1], [0], [0], [1], [0, 0, 1, 1], [], []>} : vector<8x64xbf16>, vector<64x128xbf16>, vector<8x128xf32> -> vector<8x128xf32>
      %c0_105 = arith.constant 0 : index
      %c0_106 = arith.constant 0 : index
      %184 = vector.load %arg27[%c0_105, %c0_106] : memref<1x128xf32, #tpu.memory_space<vmem>>, vector<1x128xf32>
      %185 = vector.broadcast %184 : vector<1x128xf32> to vector<8x128xf32>
      %186 = arith.addf %183, %185 : vector<8x128xf32>
      %cst_107 = arith.constant 0.000000e+00 : f32
      %187 = vector.broadcast %cst_107 : f32 to vector<8x128xf32>
      %188 = arith.maximumf %186, %187 : vector<8x128xf32>
      %189 = arith.truncf %188 : vector<8x128xf32> to vector<8x128xbf16>
      %c0_108 = arith.constant 0 : index
      %c0_109 = arith.constant 0 : index
      %190 = vector.load %arg28[%c0_108, %c0_109] : memref<128x64xbf16, #tpu.memory_space<vmem>>, vector<128x64xbf16>
      %cst_110 = arith.constant dense<0.000000e+00> : vector<8x64xf32>
      %191 = tpu.matmul %189, %190, %cst_110 {dimension_numbers = #tpu.dot_dimension_numbers<[1], [0], [0], [1], [0, 0, 1, 1], [], []>} : vector<8x128xbf16>, vector<128x64xbf16>, vector<8x64xf32> -> vector<8x64xf32>
      %c0_111 = arith.constant 0 : index
      %c0_112 = arith.constant 0 : index
      %192 = vector.load %arg29[%c0_111, %c0_112] : memref<1x64xf32, #tpu.memory_space<vmem>>, vector<1x64xf32>
      %193 = vector.broadcast %192 : vector<1x64xf32> to vector<8x64xf32>
      %194 = arith.addf %191, %193 : vector<8x64xf32>
      %195 = arith.addf %180, %194 : vector<8x64xf32>
      %c0_113 = arith.constant 0 : index
      %c0_114 = arith.constant 0 : index
      %196 = vector.load %arg30[%c0_113, %c0_114] : memref<1x64xf32, #tpu.memory_space<vmem>>, vector<1x64xf32>
      %c0_115 = arith.constant 0 : index
      %c0_116 = arith.constant 0 : index
      %197 = vector.load %arg31[%c0_115, %c0_116] : memref<1x64xf32, #tpu.memory_space<vmem>>, vector<1x64xf32>
      %cst_117 = arith.constant dense<0.000000e+00> : vector<8xf32>
      %198 = vector.multi_reduction <add>, %195, %cst_117 [1] : vector<8x64xf32> to vector<8xf32>
      %199 = vector.shape_cast %198 : vector<8xf32> to vector<8x1xf32>
      %cst_118 = arith.constant 6.400000e+01 : f32
      %200 = vector.broadcast %cst_118 : f32 to vector<8x1xf32>
      %201 = arith.divf %199, %200 : vector<8x1xf32>
      %202 = vector.broadcast %201 : vector<8x1xf32> to vector<8x64xf32>
      %203 = arith.subf %195, %202 : vector<8x64xf32>
      %204 = arith.mulf %203, %203 : vector<8x64xf32>
      %cst_119 = arith.constant dense<0.000000e+00> : vector<8xf32>
      %205 = vector.multi_reduction <add>, %204, %cst_119 [1] : vector<8x64xf32> to vector<8xf32>
      %206 = vector.shape_cast %205 : vector<8xf32> to vector<8x1xf32>
      %cst_120 = arith.constant 6.400000e+01 : f32
      %207 = vector.broadcast %cst_120 : f32 to vector<8x1xf32>
      %208 = arith.divf %206, %207 : vector<8x1xf32>
      %cst_121 = arith.constant 9.99999974E-6 : f32
      %209 = vector.broadcast %cst_121 : f32 to vector<8x1xf32>
      %210 = arith.addf %208, %209 : vector<8x1xf32>
      %211 = math.rsqrt %210 : vector<8x1xf32>
      %212 = vector.broadcast %211 : vector<8x1xf32> to vector<8x64xf32>
      %213 = arith.mulf %203, %212 : vector<8x64xf32>
      %214 = vector.broadcast %196 : vector<1x64xf32> to vector<8x64xf32>
      %215 = arith.mulf %213, %214 : vector<8x64xf32>
      %216 = vector.broadcast %197 : vector<1x64xf32> to vector<8x64xf32>
      %217 = arith.addf %215, %216 : vector<8x64xf32>
      %c0_122 = arith.constant 0 : index
      %c0_123 = arith.constant 0 : index
      %218 = vector.load %arg32[%c0_122, %c0_123] : memref<8x64xf32, #tpu.memory_space<vmem>>, vector<8x64xf32>
      tpu.vector_store %arg32[%c0_122, %c0_123], %217 {strides = array<i32>} : memref<8x64xf32, #tpu.memory_space<vmem>>, vector<8x64xf32>,
    } else {
    }
    return
  }
  func.func @transform_0(%arg0: i32) -> (i32, i32) {
    %c0_i32 = arith.constant 0 : i32
    %c0_i32_0 = arith.constant 0 : i32
    %c0_i32_1 = arith.constant 0 : i32
    return %c0_i32, %c0_i32_0 : i32, i32
  }
  func.func @transform_1(%arg0: i32) -> (i32, i32) {
    %c0_i32 = arith.constant 0 : i32
    %c0_i32_0 = arith.constant 0 : i32
    %c0_i32_1 = arith.constant 0 : i32
    return %c0_i32, %c0_i32_0 : i32, i32
  }
  func.func @transform_2(%arg0: i32) -> (i32, i32) {
    %c0_i32 = arith.constant 0 : i32
    %c0_i32_0 = arith.constant 0 : i32
    %c0_i32_1 = arith.constant 0 : i32
    return %c0_i32, %c0_i32_0 : i32, i32
  }
  func.func @transform_3(%arg0: i32) -> (i32, i32) {
    %c0_i32 = arith.constant 0 : i32
    %c0_i32_0 = arith.constant 0 : i32
    %c0_i32_1 = arith.constant 0 : i32
    return %c0_i32, %c0_i32_0 : i32, i32
  }
  func.func @transform_4(%arg0: i32) -> (i32, i32) {
    %c0_i32 = arith.constant 0 : i32
    %c0_i32_0 = arith.constant 0 : i32
    return %arg0, %c0_i32 : i32, i32
  }
  func.func @transform_5(%arg0: i32) -> (i32, i32) {
    %c0_i32 = arith.constant 0 : i32
    %c0_i32_0 = arith.constant 0 : i32
    return %arg0, %c0_i32 : i32, i32
  }
  func.func @transform_6(%arg0: i32) -> (i32, i32) {
    %c0_i32 = arith.constant 0 : i32
    %c0_i32_0 = arith.constant 0 : i32
    return %c0_i32, %arg0 : i32, i32
  }
  func.func @transform_7(%arg0: i32) -> (i32, i32) {
    %c0_i32 = arith.constant 0 : i32
    %c0_i32_0 = arith.constant 0 : i32
    %c0_i32_1 = arith.constant 0 : i32
    return %c0_i32, %c0_i32_0 : i32, i32
  }
  func.func @transform_8(%arg0: i32) -> (i32, i32) {
    %c0_i32 = arith.constant 0 : i32
    %c0_i32_0 = arith.constant 0 : i32
    %c0_i32_1 = arith.constant 0 : i32
    return %c0_i32, %c0_i32_0 : i32, i32
  }
  func.func @transform_9(%arg0: i32) -> (i32, i32) {
    %c0_i32 = arith.constant 0 : i32
    %c0_i32_0 = arith.constant 0 : i32
    %c0_i32_1 = arith.constant 0 : i32
    return %c0_i32, %c0_i32_0 : i32, i32
  }
  func.func @transform_10(%arg0: i32) -> (i32, i32) {
    %c0_i32 = arith.constant 0 : i32
    %c0_i32_0 = arith.constant 0 : i32
    %c0_i32_1 = arith.constant 0 : i32
    return %c0_i32, %c0_i32_0 : i32, i32
  }
  func.func @transform_11(%arg0: i32) -> (i32, i32) {
    %c0_i32 = arith.constant 0 : i32
    %c0_i32_0 = arith.constant 0 : i32
    %c0_i32_1 = arith.constant 0 : i32
    return %c0_i32, %c0_i32_0 : i32, i32
  }
  func.func @transform_12(%arg0: i32) -> (i32, i32) {
    %c0_i32 = arith.constant 0 : i32
    %c0_i32_0 = arith.constant 0 : i32
    %c0_i32_1 = arith.constant 0 : i32
    return %c0_i32, %c0_i32_0 : i32, i32
  }
  func.func @transform_13(%arg0: i32) -> (i32, i32) {
    %c0_i32 = arith.constant 0 : i32
    %c0_i32_0 = arith.constant 0 : i32
    %c0_i32_1 = arith.constant 0 : i32
    return %c0_i32, %c0_i32_0 : i32, i32
  }
  func.func @transform_14(%arg0: i32) -> (i32, i32) {
    %c0_i32 = arith.constant 0 : i32
    %c0_i32_0 = arith.constant 0 : i32
    %c0_i32_1 = arith.constant 0 : i32
    return %c0_i32, %c0_i32_0 : i32, i32
  }
  func.func @transform_15(%arg0: i32) -> (i32, i32) {
    %c0_i32 = arith.constant 0 : i32
    %c0_i32_0 = arith.constant 0 : i32
    %c0_i32_1 = arith.constant 0 : i32
    return %c0_i32, %c0_i32_0 : i32, i32
  }
  func.func @transform_16(%arg0: i32) -> (i32, i32) {
    %c0_i32 = arith.constant 0 : i32
    %c0_i32_0 = arith.constant 0 : i32
    %c0_i32_1 = arith.constant 0 : i32
    return %c0_i32, %c0_i32_0 : i32, i32
  }
  func.func @transform_17(%arg0: i32) -> (i32, i32) {
    %c0_i32 = arith.constant 0 : i32
    %c0_i32_0 = arith.constant 0 : i32
    %c0_i32_1 = arith.constant 0 : i32
    return %c0_i32, %c0_i32_0 : i32, i32
  }
  func.func @transform_18(%arg0: i32) -> (i32, i32) {
    %c0_i32 = arith.constant 0 : i32
    %c0_i32_0 = arith.constant 0 : i32
    %c0_i32_1 = arith.constant 0 : i32
    return %c0_i32, %c0_i32_0 : i32, i32
  }
  func.func @transform_19(%arg0: i32) -> (i32, i32) {
    %c0_i32 = arith.constant 0 : i32
    %c0_i32_0 = arith.constant 0 : i32
    %c0_i32_1 = arith.constant 0 : i32
    return %c0_i32, %c0_i32_0 : i32, i32
  }
  func.func @transform_20(%arg0: i32) -> (i32, i32) {
    %c0_i32 = arith.constant 0 : i32
    %c0_i32_0 = arith.constant 0 : i32
    %c0_i32_1 = arith.constant 0 : i32
    return %c0_i32, %c0_i32_0 : i32, i32
  }
  func.func @transform_21(%arg0: i32) -> (i32, i32) {
    %c0_i32 = arith.constant 0 : i32
    %c0_i32_0 = arith.constant 0 : i32
    %c0_i32_1 = arith.constant 0 : i32
    return %c0_i32, %c0_i32_0 : i32, i32
  }
  func.func @transform_22(%arg0: i32) -> (i32, i32) {
    %c0_i32 = arith.constant 0 : i32
    %c0_i32_0 = arith.constant 0 : i32
    %c0_i32_1 = arith.constant 0 : i32
    return %c0_i32, %c0_i32_0 : i32, i32
  }
  func.func @transform_23(%arg0: i32) -> (i32, i32) {
    %c0_i32 = arith.constant 0 : i32
    %c0_i32_0 = arith.constant 0 : i32
    %c0_i32_1 = arith.constant 0 : i32
    return %c0_i32, %c0_i32_0 : i32, i32
  }
  func.func @transform_24(%arg0: i32) -> (i32, i32) {
    %c0_i32 = arith.constant 0 : i32
    %c0_i32_0 = arith.constant 0 : i32
    %c0_i32_1 = arith.constant 0 : i32
    return %c0_i32, %c0_i32_0 : i32, i32
  }
  func.func @transform_25(%arg0: i32) -> (i32, i32) {
    %c0_i32 = arith.constant 0 : i32
    %c0_i32_0 = arith.constant 0 : i32
    %c0_i32_1 = arith.constant 0 : i32
    return %c0_i32, %c0_i32_0 : i32, i32
  }
  func.func @transform_26(%arg0: i32) -> (i32, i32) {
    %c0_i32 = arith.constant 0 : i32
    %c0_i32_0 = arith.constant 0 : i32
    %c0_i32_1 = arith.constant 0 : i32
    return %c0_i32, %c0_i32_0 : i32, i32
  }
  func.func @transform_27(%arg0: i32) -> (i32, i32) {
    %c0_i32 = arith.constant 0 : i32
    %c0_i32_0 = arith.constant 0 : i32
    %c0_i32_1 = arith.constant 0 : i32
    return %c0_i32, %c0_i32_0 : i32, i32
  }
  func.func @transform_28(%arg0: i32) -> (i32, i32) {
    %c0_i32 = arith.constant 0 : i32
    %c0_i32_0 = arith.constant 0 : i32
    %c0_i32_1 = arith.constant 0 : i32
    return %c0_i32, %c0_i32_0 : i32, i32
  }
  func.func @transform_29(%arg0: i32) -> (i32, i32) {
    %c0_i32 = arith.constant 0 : i32
    %c0_i32_0 = arith.constant 0 : i32
    %c0_i32_1 = arith.constant 0 : i32
    return %c0_i32, %c0_i32_0 : i32, i32
  }
  func.func @transform_30(%arg0: i32) -> (i32, i32) {
    %c0_i32 = arith.constant 0 : i32
    %c0_i32_0 = arith.constant 0 : i32
    %c0_i32_1 = arith.constant 0 : i32
    return %c0_i32, %c0_i32_0 : i32, i32
  }
  func.func @transform_31(%arg0: i32) -> (i32, i32) {
    %c0_i32 = arith.constant 0 : i32
    %c0_i32_0 = arith.constant 0 : i32
    %c0_i32_1 = arith.constant 0 : i32
    return %c0_i32, %c0_i32_0 : i32, i32
  }
}

</mosaic_0001>

<bundles_post_ra>
// kernel: tpu_custom_call.1
= control target key start
LH: loop header
LB: loop body
LE: loop exit
PB: predicated region body
PF: predicated region fallthrough
CT: control target
= control target key end

     0   :  { %s9786_s6 = smov 1   ;;  %s9787_s10 = smov 2   ;;  %s12250_s0 = inlined_call_operand.smem [shape: u32[32], index: -1, kind: input, shape index: {}] }
   0x1   :  { %s9852_s5 = sld [smem:[%s12250_s0]]   ;;  %s9788_s14 = smov 3  }
   0x2   :  { %s9857_s9 = sld [smem:[%s12250_s0 + %s9786_s6]]   ;;  %s9789_s18 = smov 4  }
   0x3   :  { %s9862_s13 = sld [smem:[%s12250_s0 + %s9787_s10]]   ;;  %s9790_s22 = smov 5  }
   0x4   :  { %s9867_s17 = sld [smem:[%s12250_s0 + %s9788_s14]]   ;;  %s9791_s26 = smov 6  }
   0x5   :  { %s9872_s21 = sld [smem:[%s12250_s0 + %s9789_s18]]   ;;  %s9792_s30 = smov 7  }
   0x6   :  { %s9877_s25 = sld [smem:[%s12250_s0 + %s9790_s22]]   ;;  %s9793_s4 = smov 8  }
   0x7   :  { %s9882_s29 = sld [smem:[%s12250_s0 + %s9791_s26]]   ;;  %s9794_s10 = smov 9  }
   0x8   :  { %s9887_s3 = sld [smem:[%s12250_s0 + %s9792_s30]]   ;;  %s9795_s15 = smov 10  }
   0x9   :  { %s9892_s8 = sld [smem:[%s12250_s0 + %s9793_s4]]   ;;  %s9796_s20 = smov 11  }
   0xa   :  { %12298 = sst [smem:[#allocation9_spill]] %s9867_s17  ;;  %s9797_s26 = smov 12  }
   0xb   :  { %s9897_s14 = sld [smem:[%s12250_s0 + %s9794_s10]]   ;;  %s9798_s1 = smov 13  }
   0xc   :  { %s9902_s19 = sld [smem:[%s12250_s0 + %s9795_s15]]   ;;  %s9799_s7 = smov 14  }
   0xd   :  { %s9907_s24 = sld [smem:[%s12250_s0 + %s9796_s20]]   ;;  %s9800_s15 = smov 15  }
   0xe   :  { %s9912_s30 = sld [smem:[%s12250_s0 + %s9797_s26]]   ;;  %s9801_s22 = smov 16  }
   0xf   :  { %s9917_s6 = sld [smem:[%s12250_s0 + %s9798_s1]]   ;;  %s9802_s28 = smov 17  }
  0x10   :  { %s9922_s12 = sld [smem:[%s12250_s0 + %s9799_s7]]   ;;  %s9803_s7 = smov 18  }
  0x11   :  { %s9927_s20 = sld [smem:[%s12250_s0 + %s9800_s15]]   ;;  %s9804_s15 = smov 19  }
  0x12   :  { %s9932_s27 = sld [smem:[%s12250_s0 + %s9801_s22]]   ;;  %s9805_s22 = smov 20  }
  0x13   :  { %s9937_s4 = sld [smem:[%s12250_s0 + %s9802_s28]]   ;;  %s9806_s28 = smov 21  }
  0x14   :  { %s9942_s17 = sld [smem:[%s12250_s0 + %s9803_s7]]   ;;  %s9807_s7 = smov 22  }
  0x17   :  { %12299 = sst [smem:[#allocation10_spill]] %s9927_s20 }
  0x18   :  { %12300 = sst [smem:[#allocation11_spill]] %s9932_s27 }
  0x19   :  { %12301 = sst [smem:[#allocation12_spill]] %s9937_s4 }
  0x1a   :  { %12302 = sst [smem:[#allocation13_spill]] %s9942_s17 }
  0x1b   :  { %s9947_s20 = sld [smem:[%s12250_s0 + %s9804_s15]]   ;;  %s9808_s15 = smov 23  }
  0x1c   :  { %s9952_s27 = sld [smem:[%s12250_s0 + %s9805_s22]]   ;;  %s9809_s22 = smov 24  }
  0x1d   :  { %s9957_s4 = sld [smem:[%s12250_s0 + %s9806_s28]]   ;;  %s9810_s28 = smov 25  }
  0x1e   :  { %s9962_s17 = sld [smem:[%s12250_s0 + %s9807_s7]]   ;;  %s9811_s7 = smov 26  }
  0x21   :  { %12303 = sst [smem:[#allocation14_spill]] %s9947_s20 }
  0x22   :  { %12304 = sst [smem:[#allocation15_spill]] %s9952_s27 }
  0x23   :  { %12305 = sst [smem:[#allocation16_spill]] %s9957_s4 }
  0x24   :  { %12306 = sst [smem:[#allocation17_spill]] %s9962_s17 }
  0x25   :  { %s9967_s20 = sld [smem:[%s12250_s0 + %s9808_s15]]   ;;  %s9812_s15 = smov 27  }
  0x26   :  { %s9972_s27 = sld [smem:[%s12250_s0 + %s9809_s22]]   ;;  %s9813_s22 = smov 28  }
  0x27   :  { %s9977_s4 = sld [smem:[%s12250_s0 + %s9810_s28]]   ;;  %s9814_s28 = smov 29  }
  0x28   :  { %s9982_s17 = sld [smem:[%s12250_s0 + %s9811_s7]]   ;;  %s9815_s7 = smov 30  }
  0x2b   :  { %12307 = sst [smem:[#allocation18_spill]] %s9967_s20 }
  0x2c   :  { %12308 = sst [smem:[#allocation19_spill]] %s9972_s27 }
  0x2d   :  { %12309 = sst [smem:[#allocation20_spill]] %s9977_s4 }
  0x2e   :  { %12310 = sst [smem:[#allocation21_spill]] %s9982_s17 }
  0x2f   :  { %s9987_s20 = sld [smem:[%s12250_s0 + %s9812_s15]]   ;;  %s9816_s15 = smov 31  }
  0x30   :  { %s9992_s27 = sld [smem:[%s12250_s0 + %s9813_s22]]  }
  0x31   :  { %s9997_s4 = sld [smem:[%s12250_s0 + %s9814_s28]]  }
  0x32   :  { %s10002_s17 = sld [smem:[%s12250_s0 + %s9815_s7]]  }
  0x35   :  { %12311 = sst [smem:[#allocation22_spill]] %s9987_s20 }
  0x36   :  { %s10007_s20 = sld [smem:[%s12250_s0 + %s9816_s15]]  }
  0x37   :  { %68 = vsyncpa [#allocation7], 0  ;;  %s10009_s22 = smov 0  }
  0x38 LB: > { %s10015_s23 = sadd.s32 4294967295, %s9784_s22   ;;  %p8907_p0 = scmp.ge.s32.totalorder %s9784_s22, 1  ;;  %s9784_s22 = sphi %s10009_s22, %s74_s22  }
  0x39   : > { %p885_p1 = scmp.lt.s32.totalorder %s9784_s22, 4 }
  0x3b   : > { %p886_p2 = pnand %p8907_p0, %p885_p1 }
  0x3d   : > { %889 = sbr.rel (%p886_p2) target bundleno = 5210 (0x145a), region = 144 }
  0x44   : > { %s8908_s0 = sshll.u32 %s10015_s23, 4  ;;  %p980_p3 = scmp.lt.s32.totalorder %s10015_s23, 2 }
  0x45   : > { %p969_p4 = scmp.lt.s32.totalorder %s8908_s0, 47  ;;  %p8912_p5 = scmp.ne.s32.totalorder %s10015_s23, 0 }
  0x46   : > { %s10022_s26 = scalar_select %p980_p3, %s10015_s23, 2 }
  0x47   : > { %s12419_s0 = smov (!%p969_p4, %s8908_s0), 47  ;;  %987 = sbr.rel (%p8912_p5) target bundleno = 444 (0x1bc), region = 148 }
  0x48   : > { %s982_s28 = scalar_lea.vmem %s9882_s29, %s10022_s26  ;;  %s8909_s1 = sshll.u32 %s12419_s0, 3  ;;  %vm1227_vm0 = vcmask (!%p8912_p5), 7168   ;;  %v9817_v0 = vmov (!%p8912_p5), 0.0   ;;  %v9818_v1 = vmov (!%p8912_p5), -1e+30   ;;  %v9656_v2 = vld [vmem:[%s9887_s3] sm:$0xff] (!%p8912_p5)   ;;  %v1091_v19 = vlaneseq (!%p8912_p5) }
  0x49   : > { %s10027_s2 = scalar_lea.vmem %s9872_s21, %s8909_s1  ;;  %s10030_s7 = scalar_lea.vmem %s9877_s25, %s8909_s1  ;;  %9236 = vmatprep.subr.bf16.mxu0 (!%p8912_p5), %v9817_v0  ;;  %1228 = vst.msk [vmem:[#allocation3] sm:$0xff] (!%p8912_p5), %vm1227_vm0, %v9818_v1  ;;  %1229 = vst.msk [vmem:[#allocation3 + $0x8] sm:$0xff] (!%p8912_p5), %vm1227_vm0, %v9818_v1  ;;  %vm9819_vm1 = vmmov (!%p8912_p5), 0   ;;  %v9657_v3 = vld [vmem:[%s9887_s3 + $0x8] sm:$0xff] (!%p8912_p5)   ;;  %v9658_v4 = vld [vmem:[%s9887_s3 + $0x10] sm:$0xff] (!%p8912_p5)   ;;  %vm1031_vm2 = vcmask (!%p8912_p5), 523264  }
  0x4a   : > { %1230 = vst.msk [vmem:[#allocation3 + $0x10] sm:$0xff] (!%p8912_p5), %vm1227_vm0, %v9818_v1  ;;  %1231 = vst.msk [vmem:[#allocation3 + $0x18] sm:$0xff] (!%p8912_p5), %vm1227_vm0, %v9818_v1  ;;  %9244 = vmatprep.mubr.msk.bf16.mxu0 (!%p8912_p5), %vm9819_vm1, %v9817_v0  ;;  %9237 = vmatpush3.bf16.msra.mxu0 (!%p8912_p5), %v9656_v2  ;;  %v988_v5 = vld [vmem:[%s9852_s5] sm:$0xff] (!%p8912_p5)  ;;  %v9659_v8 = vld [vmem:[%s9887_s3 + $0x18] sm:$0xff] (!%p8912_p5)   ;;  %vm1222_vm3 = vcmask (!%p8912_p5), 130048   ;;  %s9820_s10 = smov (!%p8912_p5), 80  }
  0x4b   : > { %1232 = vst.msk [vmem:[#allocation4] sm:$0xff] (!%p8912_p5), %vm1227_vm0, %v9817_v0  ;;  %1233 = vst.msk [vmem:[#allocation4 + $0x8] sm:$0xff] (!%p8912_p5), %vm1227_vm0, %v9817_v0  ;;  %9238 = vmatprep.subr.bf16.mxu0 (!%p8912_p5), %v9817_v0  ;;  %v989_v6 = vld [vmem:[%s9857_s9] sm:$0xff] (!%p8912_p5)  ;;  %s9821_s11 = smov (!%p8912_p5), 112   ;;  %s9822_s15 = smov (!%p8912_p5), 96   ;;  %v1092_v23 = vshrl.u32 (!%p8912_p5), %v1091_v19, 7 }
  0x4c   : > { %1234 = vst.msk [vmem:[#allocation4 + $0x10] sm:$0xff] (!%p8912_p5), %vm1227_vm0, %v9817_v0  ;;  %1235 = vst.msk [vmem:[#allocation4 + $0x18] sm:$0xff] (!%p8912_p5), %vm1227_vm0, %v9817_v0  ;;  %v990_v7 = vadd.f32 (!%p8912_p5), %v989_v6, %v988_v5  ;;  %v8913_v10 = vld [vmem:[%s9892_s8] ss:$0 sm:$0xff] (!%p8912_p5)  ;;  %v9823_v17 = vmov (!%p8912_p5), 1983009808  }
  0x4d   : > { %1236 = vst.msk [vmem:[#allocation5] sm:$0xff] (!%p8912_p5), %vm1222_vm3, %v9817_v0  ;;  %1237 = vst.msk [vmem:[#allocation5 + $0x8] sm:$0xff] (!%p8912_p5), %vm1222_vm3, %v9817_v0  ;;  %v1089_v18 = vunpack.c.l.s4 (!%p8912_p5), %v9823_v17  ;;  %v9824_v20 = vmov (!%p8912_p5), 1934713408  }
  0x4e   : > { %9239 = vmatpush3.bf16.msra.mxu0 %v9657_v3  ;;  %v991_v9 = vpack.c.bf16 %v990_v7, %v990_v7  ;;  %1238 = vst.msk [vmem:[#allocation5 + $0x10] sm:$0xff] %vm1222_vm3, %v9817_v0  ;;  %1239 = vst.msk [vmem:[#allocation5 + $0x18] sm:$0xff] %vm1222_vm3, %v9817_v0  ;;  %v1121_v21 = vunpack.c.l.s4 %v9824_v20 }
  0x4f   : > { %9240 = vmatprep.subr.bf16.mxu0 %v9817_v0  ;;  %v1090_v22 = vunpack.c.0.s8 %v1089_v18 }
  0x50   : > { %v1122_v26 = vunpack.c.0.s8 %v1121_v21 }
  0x51   : > { %v1093_v27 = vsub.s32 %v1090_v22, %v1092_v23 }
  0x52   : > { %9241 = vmatpush3.bf16.msra.mxu0 %v9658_v4  ;;  %v1125_v33 = vsub.s32 %v1122_v26, %v1092_v23 }
  0x53   : > { %9242 = vmatprep.subr.bf16.mxu0 %v9817_v0 }
  0x56   : > { %9243 = vmatpush3.bf16.msra.mxu0 %v9659_v8 }
  0x59   : > { %9245 = vmatmul.mubr.msk.bf16.vlgmr.msra.gmra.mrb[0].mxu0 %vm1031_vm2, %v991_v9 }
 0x12c   : > { %v1069_v11 = vpop.f32.mrb[0].mxu0 }
 0x12d   : > { %v1070_v12 = vadd.f32 %v8913_v10, %v1069_v11  ;;  %v9246_v13 = vpop.f32.mrb[1].mxu0 }
 0x12e   : > { %v1072_v14 = vpop.f32.mrb[2].mxu0 }
 0x12f   : > { %v1075_v15 = vmul.f32 0.25, %v1070_v12  ;;  %v9247_v16 = vpop.f32.mrb[3].mxu0 }
 0x131   : > { %1083 = vrot.lane.b32.xlu1 %v1075_v15, %s9820_s10  ;;  %1077 = vrot.lane.b32.xlu0 %v1075_v15, %s9821_s11 }
 0x135   : > { %1080 = vrot.lane.b32.xlu0 %v1075_v15, %s9822_s15 }
 0x1a3   : > { %v1084_v24 = vpop.permute.xlu1 %1083  ;;  %v1078_v25 = vpop.permute.xlu0 %1077 }
 0x1a4   : > { %v1102_v28 = vcombine.low %v1078_v25, %v1084_v24  ;;  %v1103_v29 = vcombine.high %v1078_v25, %v1084_v24 }
 0x1a6   : > { %v1110_v34 = vrot.slane %v1102_v28, %v1093_v27  ;;  %v1117_v35 = vrot.slane %v1103_v29, %v1093_v27 }
 0x1a7   : > { %v1081_v30 = vpop.permute.xlu0 %1080 }
 0x1a8   : > { %v1086_v31 = vcombine.low %v1075_v15, %v1081_v30  ;;  %v1087_v32 = vcombine.high %v1075_v15, %v1081_v30 }
 0x1aa   : > { %v1094_v36 = vrot.slane %v1086_v31, %v1093_v27  ;;  %v1101_v37 = vrot.slane %v1087_v32, %v1093_v27 }
 0x1ac   : > { %v1118_v38 = vcombine.low %v1094_v36, %v1110_v34  ;;  %v1119_v39 = vcombine.high %v1094_v36, %v1110_v34  ;;  %v1134_v40 = vcombine.low %v1101_v37, %v1117_v35  ;;  %v1135_v41 = vcombine.high %v1101_v37, %v1117_v35 }
 0x1ae   : > { %v1126_v42 = vrot.slane %v1118_v38, %v1125_v33  ;;  %v1133_v43 = vrot.slane %v1119_v39, %v1125_v33  ;;  %v1142_v44 = vrot.slane %v1134_v40, %v1125_v33  ;;  %v1149_v45 = vrot.slane %v1135_v41, %v1125_v33 }
 0x1b0   : > { %v1154_v46 = vcombine.low %v1126_v42, %v1133_v43  ;;  %v8919_v47 = vcombine.high %v1126_v42, %v1133_v43  ;;  %v1170_v48 = vcombine.low %v1142_v44, %v1149_v45  ;;  %v8920_v49 = vcombine.high %v1142_v44, %v1149_v45 }
 0x1b2   : > { %v1161_v50 = vrot.slane %v1154_v46, %v1093_v27  ;;  %v1169_v51 = vrot.slane %v8919_v47, %v1093_v27  ;;  %v1177_v52 = vrot.slane %v1170_v48, %v1093_v27  ;;  %v1185_v53 = vrot.slane %v8920_v49, %v1093_v27 }
 0x1b4   : > { %v1186_v54 = vcombine.low %v1161_v50, %v1169_v51  ;;  %v1187_v55 = vcombine.high %v1161_v50, %v1169_v51  ;;  %v1202_v56 = vcombine.low %v1177_v52, %v1185_v53  ;;  %v1203_v57 = vcombine.high %v1177_v52, %v1185_v53 }
 0x1b6   : > { %v1194_v58 = vrot.slane %v1186_v54, %v1125_v33  ;;  %v1201_v59 = vrot.slane %v1187_v55, %v1125_v33  ;;  %v1210_v60 = vrot.slane %v1202_v56, %v1125_v33  ;;  %v1217_v61 = vrot.slane %v1203_v57, %v1125_v33 }
 0x1b8   : > { %v1218_v62 = vcombine.low %v1194_v58, %v1210_v60  ;;  %v1219_v63 = vcombine.high %v1194_v58, %v1210_v60  ;;  %v1220_v0 = vcombine.low %v1201_v59, %v1217_v61  ;;  %v1221_v1 = vcombine.high %v1201_v59, %v1217_v61 }
 0x1ba   : > { %1223 = vst.msk [vmem:[#allocation2] sm:$0xff] %vm1222_vm3, %v1218_v62  ;;  %1224 = vst.msk [vmem:[#allocation2 + $0x8] sm:$0xff] %vm1222_vm3, %v1219_v63 }
 0x1bb   : > { %1225 = vst.msk [vmem:[#allocation2 + $0x10] sm:$0xff] %vm1222_vm3, %v1220_v0  ;;  %1226 = vst.msk [vmem:[#allocation2 + $0x18] sm:$0xff] %vm1222_vm3, %v1221_v1 }
 0x1bc PF: > { %v9662_v2 = vld [vmem:[%s9897_s14] sm:$0xff]   ;;  %v9663_v3 = vld [vmem:[%s9897_s14 + $0x8] sm:$0xff]   ;;  %v9664_v4 = vld [vmem:[%s9897_s14 + $0x10] sm:$0xff]   ;;  %vm1335_vm4 = vcmask 523264   ;;  %s9825_s16 = smov 112   ;;  %s9826_s18 = smov 96  }
 0x1bd   : > { %9248 = vmatprep.subr.bf16.mxu0 %v9662_v2  ;;  %v1240_v5 = vld [vmem:[%s10027_s2] sm:$0xff]  ;;  %v1241_v6 = vld [vmem:[%s10027_s2 + $0x8] sm:$0xff]  ;;  %v9665_v11 = vld [vmem:[%s9897_s14 + $0x18] sm:$0xff]   ;;  %s9827_s0 = smov 80   ;;  %vm6337_vm5 = vcmask 130048   ;;  %vm9832_vm6 = vmmov 0  }
 0x1be   : > { %9249 = vmatpush3.bf16.msra.mxu0 %v9662_v2  ;;  %v1256_v7 = vld [vmem:[%s10030_s7] sm:$0xff]  ;;  %v1257_v8 = vld [vmem:[%s10030_s7 + $0x8] sm:$0xff]  ;;  %v1457_v10 = vpack.c.bf16 %v1241_v6, %v1240_v5  ;;  %v10057_v13 = vld [vmem:[%s10027_s2 + $0x10] sm:$0xff]  ;;  %vm6702_vm8 = vcmask 7168   ;;  %p9016_p6 = scmp.ne.s32.totalorder %s10015_s23, 2 }
 0x1bf   : > { %9250 = vmatprep.subr.bf16.mxu0 %v9663_v3  ;;  %v1272_v9 = vadd.f32 %v1256_v7, %v1240_v5  ;;  %v1273_v12 = vadd.f32 %v1257_v8, %v1241_v6  ;;  %v10060_v14 = vld [vmem:[%s10027_s2 + $0x18] sm:$0xff]  ;;  %v1258_v15 = vld [vmem:[%s10030_s7 + $0x10] sm:$0xff]  ;;  %v10065_v17 = vld [vmem:[%s10027_s2 + $0x20] sm:$0xff]  ;;  %vm9835_vm9 = vmmov (!%p9016_p6), 0   ;;  %s9836_s26 = smov (!%p9016_p6), 32   ;;  %s9838_s1 = smov (!%p9016_p6), 48  }
 0x1c0   : > { %v1259_v16 = vld [vmem:[%s10030_s7 + $0x18] sm:$0xff]  ;;  %9280 = vmatprep.mubr.msk.bf16.mxu1 %vm1335_vm4, %v1457_v10  ;;  %v10069_v19 = vld [vmem:[%s10027_s2 + $0x28] sm:$0xff]  ;;  %v1260_v20 = vld [vmem:[%s10030_s7 + $0x20] sm:$0xff]  ;;  %v1274_v22 = vadd.f32 %v1258_v15, %v10057_v13  ;;  %v1458_v58 = vpack.c.bf16 %v10060_v14, %v10057_v13  ;;  %vm7133_vm10 = vcmask (!%p9016_p6), 261120   ;;  %vm7135_vm11 = vcmask (!%p9016_p6), 392192   ;;  %s12406_s10 = sld [smem:[#allocation10_spill]] (!%p9016_p6) }
 0x1c1   : > { %v1288_v18 = vpack.c.bf16 %v1273_v12, %v1272_v9  ;;  %v1261_v21 = vld [vmem:[%s10030_s7 + $0x28] sm:$0xff]  ;;  %v1275_v23 = vadd.f32 %v1259_v16, %v10060_v14  ;;  %v1276_v24 = vadd.f32 %v1260_v20, %v10065_v17  ;;  %v10079_v26 = vld [vmem:[%s10027_s2 + $0x30] sm:$0xff]  ;;  %v1247_v27 = vld [vmem:[%s10027_s2 + $0x38] sm:$0xff]  ;;  %s12407_s11 = sld [smem:[#allocation11_spill]] (!%p9016_p6)  ;;  %s12408_s15 = sld [smem:[#allocation13_spill]] (!%p9016_p6)  ;;  %vm8076_vm12 = vcmask (!%p9016_p6), 64512  }
 0x1c2   : > { %9251 = vmatpush3.bf16.msra.mxu0 %v9663_v3  ;;  %v1277_v25 = vadd.f32 %v1261_v21, %v10069_v19  ;;  %v1262_v28 = vld [vmem:[%s10030_s7 + $0x30] sm:$0xff]  ;;  %v1263_v29 = vld [vmem:[%s10030_s7 + $0x38] sm:$0xff]  ;;  %v1248_v31 = vld [vmem:[%s10027_s2 + $0x40] sm:$0xff]  ;;  %v1460_v5 = vpack.c.bf16 %v1247_v27, %v10079_v26  ;;  %vm8132_vm14 = vcmask (!%p9016_p6), 1043456  }
 0x1c3   : > { %9252 = vmatprep.subr.bf16.mxu0 %v9664_v4  ;;  %9256 = vmatprep.mubr.msk.bf16.mxu0 %vm1335_vm4, %v1288_v18  ;;  %v1289_v30 = vpack.c.bf16 %v1275_v23, %v1274_v22  ;;  %v1249_v32 = vld [vmem:[%s10027_s2 + $0x48] sm:$0xff]  ;;  %v1264_v33 = vld [vmem:[%s10030_s7 + $0x40] sm:$0xff]  ;;  %v1278_v38 = vadd.f32 %v1262_v28, %v10079_v26  ;;  %v1279_v39 = vadd.f32 %v1263_v29, %v1247_v27  ;;  %v9668_v42 = vld [vmem:[%s9907_s24 + $0x10] sm:$0xff]  }
 0x1c4   : > { %v1265_v34 = vld [vmem:[%s10030_s7 + $0x48] sm:$0xff]  ;;  %v1290_v35 = vpack.c.bf16 %v1277_v25, %v1276_v24  ;;  %v9666_v36 = vld [vmem:[%s9907_s24] sm:$0xff]   ;;  %v1280_v40 = vadd.f32 %v1264_v33, %v1248_v31  ;;  %v1250_v44 = vld [vmem:[%s10027_s2 + $0x50] sm:$0xff]  ;;  %v1461_v6 = vpack.c.bf16 %v1249_v32, %v1248_v31 }
 0x1c5   : > { %v9667_v37 = vld [vmem:[%s9907_s24 + $0x8] sm:$0xff]   ;;  %9272 = vmatprep.subr.bf16.mxu1 %v9666_v36  ;;  %v1281_v41 = vadd.f32 %v1265_v34, %v1249_v32  ;;  %v1291_v43 = vpack.c.bf16 %v1279_v39, %v1278_v38  ;;  %v1251_v45 = vld [vmem:[%s10027_s2 + $0x58] sm:$0xff]  ;;  %v1266_v46 = vld [vmem:[%s10030_s7 + $0x50] sm:$0xff] }
 0x1c6   : > { %9253 = vmatpush3.bf16.msra.mxu0 %v9664_v4  ;;  %9273 = vmatpush3.bf16.msra.mxu1 %v9666_v36  ;;  %v1267_v48 = vld [vmem:[%s10030_s7 + $0x58] sm:$0xff]  ;;  %v1252_v49 = vld [vmem:[%s10027_s2 + $0x60] sm:$0xff]  ;;  %v1253_v51 = vld [vmem:[%s10027_s2 + $0x68] sm:$0xff]  ;;  %v1282_v54 = vadd.f32 %v1266_v46, %v1250_v44  ;;  %v1459_v4 = vpack.c.bf16 %v10069_v19, %v10065_v17  ;;  %v1462_v7 = vpack.c.bf16 %v1251_v45, %v1250_v44  ;;  %v9829_v44 = vmov 0  }
 0x1c7   : > { %9254 = vmatprep.subr.bf16.mxu0 %v9665_v11  ;;  %9274 = vmatprep.subr.bf16.mxu1 %v9667_v37  ;;  %v1292_v47 = vpack.c.bf16 %v1281_v41, %v1280_v40  ;;  %v9669_v50 = vld [vmem:[%s9907_s24 + $0x18] sm:$0xff]   ;;  %v1268_v52 = vld [vmem:[%s10030_s7 + $0x60] sm:$0xff]  ;;  %v1269_v53 = vld [vmem:[%s10030_s7 + $0x68] sm:$0xff]  ;;  %v1283_v55 = vadd.f32 %v1267_v48, %v1251_v45  ;;  %v1463_v8 = vpack.c.bf16 %v1253_v51, %v1252_v49 }
 0x1c8   : > { %v1284_v56 = vadd.f32 %v1268_v52, %v1252_v49  ;;  %v1285_v57 = vadd.f32 %v1269_v53, %v1253_v51  ;;  %v1254_v60 = vld [vmem:[%s10027_s2 + $0x70] sm:$0xff]  ;;  %v1255_v62 = vld [vmem:[%s10027_s2 + $0x78] sm:$0xff]  ;;  %v10125_v10 = vld [vmem:[%s9902_s19] ss:$0 sm:$0xff]  ;;  %9660 = vset.pattern.permute.xlu0 %v9829_v44  ;;  %9661 = vset.pattern.permute.xlu1 %v9829_v44  ;;  %v9830_v51 = vmov 1983009808   ;;  %v1790_v53 = vlaneseq }
 0x1c9   : > { %v1293_v59 = vpack.c.bf16 %v1283_v55, %v1282_v54  ;;  %v1270_v63 = vld [vmem:[%s10030_s7 + $0x70] sm:$0xff]  ;;  %v1271_v0 = vld [vmem:[%s10030_s7 + $0x78] sm:$0xff]  ;;  %v1464_v9 = vpack.c.bf16 %v1255_v62, %v1254_v60  ;;  %v6606_v45 = vld [vmem:[%s9862_s13] sm:$0xff]  ;;  %v1788_v52 = vunpack.c.l.s4 %v9830_v51  ;;  %s12404_s2 = sld [smem:[#allocation14_spill]] (!%p9016_p6)  ;;  %s12405_s7 = sld [smem:[#allocation12_spill]] (!%p9016_p6) }
 0x1ca   : > { %9255 = vmatpush3.bf16.msra.mxu0 %v9665_v11  ;;  %9275 = vmatpush3.bf16.msra.mxu1 %v9667_v37  ;;  %v1294_v61 = vpack.c.bf16 %v1285_v57, %v1284_v56  ;;  %v1286_v1 = vadd.f32 %v1270_v63, %v1254_v60  ;;  %v1287_v2 = vadd.f32 %v1271_v0, %v1255_v62  ;;  %v12256_v37 = vmov 0.0  }
 0x1cb   : > { %9276 = vmatprep.subr.bf16.mxu1 %v9668_v42  ;;  %9296 = vmatprep.subr.bf16.mxu0 %v12256_v37  ;;  %v9831_v56 = vmov 1934713408   ;;  %v1789_v60 = vunpack.c.0.s8 %v1788_v52 }
 0x1cc   : > { %v1295_v3 = vpack.c.bf16 %v1287_v2, %v1286_v1  ;;  %v1820_v57 = vunpack.c.l.s4 %v9831_v56 }
 0x1cd   : > { %9257 = vmatmul.mubr.msk.bf16.vlgmr.msra.gmra.mrb[0].mxu0 %vm1335_vm4, %v1289_v30 }
 0x1ce   : > { %9260 = vmatprep.mubr.msk.bf16.mxu0 %vm1335_vm4, %v1290_v35  ;;  %9277 = vmatpush3.bf16.msra.mxu1 %v9668_v42  ;;  %v1821_v0 = vunpack.c.0.s8 %v1820_v57 }
 0x1cf   : > { %9278 = vmatprep.subr.bf16.mxu1 %v9669_v50 }
 0x1d2   : > { %9279 = vmatpush3.bf16.msra.mxu1 %v9669_v50 }
 0x1d3   : > { %9316 = vmatprep.subr.bf16.mxu1 %v12256_v37 }
 0x1d5   : > { %9261 = vmatmul.mubr.msk.bf16.gmra.mrb[4].mxu0 %vm1335_vm4, %v1291_v43  ;;  %9281 = vmatmul.mubr.msk.bf16.vlgmr.msra.gmra.mrb[0].mxu1 %vm1335_vm4, %v1458_v58 }
 0x1d6   : > { %9264 = vmatprep.mubr.msk.bf16.mxu0 %vm1335_vm4, %v1292_v47  ;;  %9284 = vmatprep.mubr.msk.bf16.mxu1 %vm1335_vm4, %v1459_v4  ;;  %v8934_v47 = vld [vmem:[%s9912_s30] ss:$0 sm:$0xff] }
 0x1dd   : > { %9265 = vmatmul.mubr.msk.bf16.gmra.mrb[8].mxu0 %vm1335_vm4, %v1293_v59  ;;  %9285 = vmatmul.mubr.msk.bf16.gmra.mrb[4].mxu1 %vm1335_vm4, %v1460_v5 }
 0x1de   : > { %9268 = vmatprep.mubr.msk.bf16.mxu0 %vm1335_vm4, %v1294_v61  ;;  %9288 = vmatprep.mubr.msk.bf16.mxu1 %vm1335_vm4, %v1461_v6  ;;  %v1791_v61 = vshrl.u32 %v1790_v53, 7 }
 0x1e5   : > { %9269 = vmatmul.mubr.msk.bf16.gmra.mrb[12].mxu0 %vm1335_vm4, %v1295_v3  ;;  %9289 = vmatmul.mubr.msk.bf16.gmra.mrb[8].mxu1 %vm1335_vm4, %v1462_v7  ;;  %v10289_v3 = vsub.s32 %v1789_v60, %v1791_v61 }
 0x1e6   : > { %9292 = vmatprep.mubr.msk.bf16.mxu1 %vm1335_vm4, %v1463_v8 }
 0x1e7   : > { %12314 = vst [vmem:[#allocation25_spill] sm:$0xff] %v10289_v3 }
 0x1ed   : > { %9293 = vmatmul.mubr.msk.bf16.gmra.mrb[12].mxu1 %vm1335_vm4, %v1464_v9 }
 0x2a0   : > { %v9258_v11 = vpop.f32.mrb[0].mxu0 }
 0x2a1   : > { %v10128_v12 = vadd.f32 %v9258_v11, %v10125_v10  ;;  %v1394_v13 = vpop.f32.mrb[1].mxu0  ;;  %v10299_v11 = vsub.s32 %v1821_v0, %v1791_v61 }
 0x2a2   : > { %v10131_v14 = vadd.f32 %v10125_v10, %v1394_v13  ;;  %v9259_v15 = vpop.f32.mrb[2].mxu0 }
 0x2a3   : > { %1645 = vrot.lane.b32.xlu0 %v10128_v12, %s9825_s16  ;;  %v1397_v16 = vpop.f32.mrb[3].mxu0  ;;  %v10138_v17 = vadd.f32 %v9259_v15, %v10125_v10 }
 0x2a4   : > { %1689 = vrot.lane.b32.xlu1 %v10131_v14, %s9826_s18  ;;  %v10153_v24 = vadd.f32 %v10125_v10, %v1397_v16 }
 0x2a7   : > { %1693 = vrot.lane.b32.xlu0 %v10128_v12, %s9826_s18 }
 0x2a8   : > { %1647 = vrot.lane.b32.xlu1 %v10138_v17, %s9825_s16  ;;  %v9262_v18 = vpop.f32.mrb[4].mxu0  ;;  %v9282_v46 = vpop.f32.mrb[0].mxu1 }
 0x2a9   : > { %v1410_v19 = vpop.f32.mrb[5].mxu0  ;;  %v10160_v27 = vadd.f32 %v9262_v18, %v10125_v10  ;;  %v1562_v48 = vpop.f32.mrb[1].mxu1 }
 0x2aa   : > { %v9263_v20 = vpop.f32.mrb[6].mxu0  ;;  %v10196_v38 = vadd.f32 %v10125_v10, %v1410_v19  ;;  %v10275_v49 = vadd.f32 %v8934_v47, %v1562_v48  ;;  %v9283_v55 = vpop.f32.mrb[2].mxu1 }
 0x2ab   : > { %1741 = vrot.lane.b32.xlu0 %v10128_v12, %s9827_s0  ;;  %v1413_v21 = vpop.f32.mrb[7].mxu0  ;;  %v10170_v31 = vadd.f32 %v9263_v20, %v10125_v10  ;;  %v1565_v58 = vpop.f32.mrb[3].mxu1  ;;  %v10291_v8 = vadd.f32 %v9283_v55, %v8934_v47 }
 0x2ac   : > { %1695 = vrot.lane.b32.xlu1 %v10138_v17, %s9826_s18  ;;  %v10199_v39 = vadd.f32 %v10125_v10, %v1413_v21  ;;  %12312 = vst [vmem:[#allocation23_spill] sm:$0xff] %v10275_v49  ;;  %v10281_v59 = vadd.f32 %v8934_v47, %v1565_v58 }
 0x2ad   : > { %12315 = vst [vmem:[#allocation26_spill] sm:$0xff] %v10291_v8 }
 0x2ae   : > { %12313 = vst [vmem:[#allocation24_spill] sm:$0xff] %v10281_v59 }
 0x2af   : > { %1641 = vrot.lane.b32.xlu0 %v10131_v14, %s9825_s16 }
 0x2b0   : > { %1743 = vrot.lane.b32.xlu1 %v10138_v17, %s9827_s0  ;;  %v9266_v22 = vpop.f32.mrb[8].mxu0  ;;  %v10323_v53 = vpop.f32.mrb[4].mxu1 }
 0x2b1   : > { %v1426_v23 = vpop.f32.mrb[9].mxu0  ;;  %v10210_v40 = vadd.f32 %v9266_v22, %v10125_v10  ;;  %v10327_v60 = vpop.f32.mrb[5].mxu1 }
 0x2b2   : > { %v9267_v25 = vpop.f32.mrb[10].mxu0  ;;  %v10232_v42 = vadd.f32 %v10125_v10, %v1426_v23 }
 0x2b3   : > { %1737 = vrot.lane.b32.xlu0 %v10131_v14, %s9827_s0  ;;  %v1429_v26 = vpop.f32.mrb[11].mxu0  ;;  %v10217_v41 = vadd.f32 %v9267_v25, %v10125_v10 }
 0x2b4   : > { %1691 = vrot.lane.b32.xlu1 %v10153_v24, %s9826_s18  ;;  %v10235_v43 = vadd.f32 %v10125_v10, %v1429_v26 }
 0x2b7   : > { %1643 = vrot.lane.b32.xlu0 %v10153_v24, %s9825_s16 }
 0x2b8   : > { %1739 = vrot.lane.b32.xlu1 %v10153_v24, %s9827_s0  ;;  %v9270_v28 = vpop.f32.mrb[12].mxu0 }
 0x2b9   : > { %v10167_v29 = vadd.f32 %v9270_v28, %v10125_v10  ;;  %v1442_v30 = vpop.f32.mrb[13].mxu0 }
 0x2ba   : > { %v10173_v32 = vadd.f32 %v10125_v10, %v1442_v30  ;;  %v9271_v33 = vpop.f32.mrb[14].mxu0 }
 0x2bb   : > { %1653 = vrot.lane.b32.xlu0 %v10160_v27, %s9825_s16  ;;  %v10178_v34 = vadd.f32 %v9271_v33, %v10125_v10  ;;  %v1445_v35 = vpop.f32.mrb[15].mxu0 }
 0x2bc   : > { %1655 = vrot.lane.b32.xlu1 %v10170_v31, %s9825_s16  ;;  %v10183_v36 = vadd.f32 %v10125_v10, %v1445_v35 }
 0x2bf   : > { %1701 = vrot.lane.b32.xlu0 %v10160_v27, %s9826_s18 }
 0x2c0   : > { %1703 = vrot.lane.b32.xlu1 %v10170_v31, %s9826_s18 }
 0x2c3   : > { %1749 = vrot.lane.b32.xlu0 %v10160_v27, %s9827_s0 }
 0x2c4   : > { %1751 = vrot.lane.b32.xlu1 %v10170_v31, %s9827_s0 }
 0x2c7   : > { %1649 = vrot.lane.b32.xlu0 %v10196_v38, %s9825_s16 }
 0x2c8   : > { %1651 = vrot.lane.b32.xlu1 %v10199_v39, %s9825_s16 }
 0x2cb   : > { %1697 = vrot.lane.b32.xlu0 %v10196_v38, %s9826_s18 }
 0x2cc   : > { %1699 = vrot.lane.b32.xlu1 %v10199_v39, %s9826_s18 }
 0x2cf   : > { %1745 = vrot.lane.b32.xlu0 %v10196_v38, %s9827_s0 }
 0x2d0   : > { %1747 = vrot.lane.b32.xlu1 %v10199_v39, %s9827_s0 }
 0x2d3   : > { %1661 = vrot.lane.b32.xlu0 %v10210_v40, %s9825_s16 }
 0x2d4   : > { %1663 = vrot.lane.b32.xlu1 %v10217_v41, %s9825_s16 }
 0x2d7   : > { %1709 = vrot.lane.b32.xlu0 %v10210_v40, %s9826_s18 }
 0x2d8   : > { %1711 = vrot.lane.b32.xlu1 %v10217_v41, %s9826_s18 }
 0x2db   : > { %1757 = vrot.lane.b32.xlu0 %v10210_v40, %s9827_s0 }
 0x2dc   : > { %1759 = vrot.lane.b32.xlu1 %v10217_v41, %s9827_s0 }
 0x2df   : > { %1657 = vrot.lane.b32.xlu0 %v10232_v42, %s9825_s16 }
 0x2e0   : > { %1659 = vrot.lane.b32.xlu1 %v10235_v43, %s9825_s16 }
 0x2e3   : > { %1705 = vrot.lane.b32.xlu0 %v10232_v42, %s9826_s18 }
 0x2e4   : > { %1707 = vrot.lane.b32.xlu1 %v10235_v43, %s9826_s18 }
 0x2e7   : > { %1753 = vrot.lane.b32.xlu0 %v10232_v42, %s9827_s0 }
 0x2e8   : > { %1755 = vrot.lane.b32.xlu1 %v10235_v43, %s9827_s0 }
 0x2eb   : > { %1669 = vrot.lane.b32.xlu0 %v10167_v29, %s9825_s16 }
 0x2ec   : > { %1671 = vrot.lane.b32.xlu1 %v10178_v34, %s9825_s16 }
 0x2ef   : > { %1665 = vrot.lane.b32.xlu0 %v10173_v32, %s9825_s16 }
 0x2f0   : > { %1667 = vrot.lane.b32.xlu1 %v10183_v36, %s9825_s16 }
 0x2f3   : > { %1713 = vrot.lane.b32.xlu0 %v10173_v32, %s9826_s18 }
 0x2f4   : > { %1715 = vrot.lane.b32.xlu1 %v10183_v36, %s9826_s18 }
 0x2f7   : > { %1761 = vrot.lane.b32.xlu0 %v10173_v32, %s9827_s0 }
 0x2f8   : > { %1763 = vrot.lane.b32.xlu1 %v10183_v36, %s9827_s0 }
 0x2fb   : > { %1717 = vrot.lane.b32.xlu0 %v10167_v29, %s9826_s18 }
 0x2fc   : > { %1719 = vrot.lane.b32.xlu1 %v10178_v34, %s9826_s18 }
 0x2ff   : > { %1765 = vrot.lane.b32.xlu0 %v10167_v29, %s9827_s0 }
 0x300   : > { %1767 = vrot.lane.b32.xlu1 %v10178_v34, %s9827_s0 }
 0x303   : > { %6609 = vperm.xlu0 %9660, %v6606_v45  }
 0x304   : > { %3977 = vrot.lane.b32.xlu1 %v10275_v49, %s9825_s16 }
 0x307   : > { %3979 = vrot.lane.b32.xlu0 %v10281_v59, %s9825_s16 }
 0x308   : > { %4025 = vrot.lane.b32.xlu1 %v10275_v49, %s9826_s18 }
 0x30b   : > { %4073 = vrot.lane.b32.xlu0 %v10275_v49, %s9827_s0 }
 0x30c   : > { %4027 = vrot.lane.b32.xlu1 %v10281_v59, %s9826_s18 }
 0x310   : > { %4075 = vrot.lane.b32.xlu1 %v10281_v59, %s9827_s0 }
 0x314   : > { %3983 = vrot.lane.b32.xlu1 %v10291_v8, %s9825_s16 }
 0x315   : > { %v1646_v50 = vpop.permute.xlu0 %1645 }
 0x316   : > { %v1690_v54 = vpop.permute.xlu1 %1689 }
 0x317   : > { %v1785_v9 = vcombine.low %v10131_v14, %v1690_v54  ;;  %v1786_v10 = vcombine.high %v10131_v14, %v1690_v54 }
 0x318   : > { %4031 = vrot.lane.b32.xlu1 %v10291_v8, %s9826_s18 }
 0x319   : > { %v1694_v62 = vpop.permute.xlu0 %1693  ;;  %v1793_v28 = vrot.slane %v1785_v9, %v10289_v3  ;;  %v1800_v30 = vrot.slane %v1786_v10, %v10289_v3 }
 0x31a   : > { %v1648_v63 = vpop.permute.xlu1 %1647  ;;  %v1921_v1 = vcombine.low %v10128_v12, %v1694_v62  ;;  %v1922_v2 = vcombine.high %v10128_v12, %v1694_v62  ;;  %v10301_v12 = vadd.f32 %v9282_v46, %v8934_v47 }
 0x31c   : > { %12316 = vst [vmem:[#allocation27_spill] sm:$0xff] %v10301_v12  ;;  %v1929_v13 = vrot.slane %v1921_v1, %v10289_v3  ;;  %v1936_v15 = vrot.slane %v1922_v2, %v10289_v3  ;;  %3981 = vrot.lane.b32.xlu0 %v10301_v12, %s9825_s16  ;;  %4079 = vrot.lane.b32.xlu1 %v10291_v8, %s9827_s0 }
 0x31d   : > { %v1742_v4 = vpop.permute.xlu0 %1741 }
 0x31e   : > { %v1937_v5 = vcombine.low %v1646_v50, %v1742_v4  ;;  %v1938_v6 = vcombine.high %v1646_v50, %v1742_v4  ;;  %v1696_v7 = vpop.permute.xlu1 %1695 }
 0x31f   : > { %v1989_v19 = vcombine.low %v10138_v17, %v1696_v7  ;;  %v1990_v20 = vcombine.high %v10138_v17, %v1696_v7 }
 0x320   : > { %v1945_v16 = vrot.slane %v1937_v5, %v10289_v3  ;;  %v1952_v18 = vrot.slane %v1938_v6, %v10289_v3  ;;  %4029 = vrot.lane.b32.xlu0 %v10301_v12, %s9826_s18 }
 0x321   : > { %v1642_v21 = vpop.permute.xlu0 %1641  ;;  %v1997_v47 = vrot.slane %v1989_v19, %v10289_v3  ;;  %v2004_v48 = vrot.slane %v1990_v20, %v10289_v3 }
 0x322   : > { %v1953_v22 = vcombine.low %v1929_v13, %v1945_v16  ;;  %v1954_v23 = vcombine.high %v1929_v13, %v1945_v16  ;;  %v1969_v14 = vcombine.low %v1936_v15, %v1952_v18  ;;  %v1970_v25 = vcombine.high %v1936_v15, %v1952_v18  ;;  %v1744_v26 = vpop.permute.xlu1 %1743 }
 0x323   : > { %v2005_v33 = vcombine.low %v1648_v63, %v1744_v26  ;;  %v2006_v35 = vcombine.high %v1648_v63, %v1744_v26 }
 0x324   : > { %v1961_v17 = vrot.slane %v1953_v22, %v10299_v11  ;;  %v1968_v44 = vrot.slane %v1954_v23, %v10299_v11  ;;  %v1977_v45 = vrot.slane %v1969_v14, %v10299_v11  ;;  %v1984_v46 = vrot.slane %v1970_v25, %v10299_v11  ;;  %4077 = vrot.lane.b32.xlu0 %v10301_v12, %s9827_s0 }
 0x325   : > { %v2013_v50 = vrot.slane %v2005_v33, %v10289_v3  ;;  %v2020_v51 = vrot.slane %v2006_v35, %v10289_v3  ;;  %v1738_v52 = vpop.permute.xlu0 %1737 }
 0x326   : > { %v3009_v54 = vcombine.low %v1961_v17, %v1968_v44  ;;  %v8951_v55 = vcombine.high %v1961_v17, %v1968_v44  ;;  %v3025_v56 = vcombine.low %v1977_v45, %v1984_v46  ;;  %v8952_v57 = vcombine.high %v1977_v45, %v1984_v46  ;;  %v1692_v58 = vpop.permute.xlu1 %1691 }
 0x327   : > { %v2021_v61 = vcombine.low %v1997_v47, %v2013_v50  ;;  %v2022_v62 = vcombine.high %v1997_v47, %v2013_v50  ;;  %v2037_v63 = vcombine.low %v2004_v48, %v2020_v51  ;;  %v2038_v0 = vcombine.high %v2004_v48, %v2020_v51  ;;  %v10367_v47 = vpop.f32.mrb[6].mxu1 }
 0x328   : > { %v1801_v1 = vcombine.low %v1642_v21, %v1738_v52  ;;  %v1802_v2 = vcombine.high %v1642_v21, %v1738_v52  ;;  %v1853_v4 = vcombine.low %v10153_v24, %v1692_v58  ;;  %v1854_v5 = vcombine.high %v10153_v24, %v1692_v58  ;;  %12319 = vst [vmem:[#allocation30_spill] sm:$0xff] %v10367_v47  ;;  %v10373_v52 = vpop.f32.mrb[7].mxu1 }
 0x329   : > { %v10334_v6 = vrot.slane %v2021_v61, %v10299_v11  ;;  %v10337_v7 = vrot.slane %v2022_v62, %v10299_v11  ;;  %v10340_v9 = vrot.slane %v2037_v63, %v10299_v11  ;;  %v10343_v10 = vrot.slane %v2038_v0, %v10299_v11  ;;  %v1644_v13 = vpop.permute.xlu0 %1643 }
 0x32a   : > { %v1809_v15 = vrot.slane %v1801_v1, %v10289_v3  ;;  %v1816_v16 = vrot.slane %v1802_v2, %v10289_v3  ;;  %v1861_v18 = vrot.slane %v1853_v4, %v10289_v3  ;;  %v1868_v24 = vrot.slane %v1854_v5, %v10289_v3  ;;  %v1740_v19 = vpop.permute.xlu1 %1739 }
 0x32b   : > { %v1869_v35 = vcombine.low %v1644_v13, %v1740_v19  ;;  %v1870_v17 = vcombine.high %v1644_v13, %v1740_v19  ;;  %v10362_v45 = vrot.slane %v3009_v54, %v10289_v3  ;;  %v10365_v46 = vrot.slane %v8951_v55, %v10289_v3 }
 0x32c   : > { %v1817_v14 = vcombine.low %v1793_v28, %v1809_v15  ;;  %v1818_v25 = vcombine.high %v1793_v28, %v1809_v15  ;;  %v1833_v26 = vcombine.low %v1800_v30, %v1816_v16  ;;  %v1834_v33 = vcombine.high %v1800_v30, %v1816_v16 }
 0x32d   : > { %v1654_v44 = vpop.permute.xlu0 %1653  ;;  %12317 = vst [vmem:[#allocation28_spill] sm:$0xff] %v10362_v45  ;;  %12318 = vst [vmem:[#allocation29_spill] sm:$0xff] %v10365_v46  ;;  %v1877_v58 = vrot.slane %v1869_v35, %v10289_v3  ;;  %v1884_v54 = vrot.slane %v1870_v17, %v10289_v3  ;;  %v10378_v55 = vrot.slane %v3025_v56, %v10289_v3 }
 0x32e   : > { %v1825_v48 = vrot.slane %v1817_v14, %v10299_v11  ;;  %v1832_v50 = vrot.slane %v1818_v25, %v10299_v11  ;;  %v1841_v51 = vrot.slane %v1833_v26, %v10299_v11  ;;  %v1848_v28 = vrot.slane %v1834_v33, %v10299_v11  ;;  %v1656_v30 = vpop.permute.xlu1 %1655 }
 0x32f   : > { %12320 = vst [vmem:[#allocation31_spill] sm:$0xff] %v10378_v55  ;;  %v10381_v61 = vrot.slane %v8952_v57, %v10289_v3  ;;  %v1885_v2 = vcombine.low %v1861_v18, %v1877_v58  ;;  %v1886_v4 = vcombine.high %v1861_v18, %v1877_v58  ;;  %v1901_v5 = vcombine.low %v1868_v24, %v1884_v54 }
 0x330   : > { %v2873_v62 = vcombine.low %v1825_v48, %v1832_v50  ;;  %v8947_v63 = vcombine.high %v1825_v48, %v1832_v50  ;;  %v2889_v0 = vcombine.low %v1841_v51, %v1848_v28  ;;  %v8948_v1 = vcombine.high %v1841_v51, %v1848_v28 }
 0x331   : > { %12321 = vst [vmem:[#allocation32_spill] sm:$0xff] %v10381_v61  ;;  %v1902_v13 = vcombine.high %v1868_v24, %v1884_v54  ;;  %v1702_v15 = vpop.permute.xlu0 %1701  ;;  %v1893_v25 = vrot.slane %v1885_v2, %v10299_v11  ;;  %v1900_v26 = vrot.slane %v1886_v4, %v10299_v11  ;;  %v10394_v18 = vrot.slane %v1901_v5, %v10299_v11 }
 0x332   : > { %v2193_v16 = vcombine.low %v10160_v27, %v1702_v15  ;;  %v2194_v19 = vcombine.high %v10160_v27, %v1702_v15  ;;  %v1704_v14 = vpop.permute.xlu1 %1703  ;;  %v10386_v56 = vrot.slane %v2873_v62, %v10289_v3  ;;  %v10389_v57 = vrot.slane %v8947_v63, %v10289_v3 }
 0x333   : > { %v10397_v24 = vrot.slane %v1902_v13, %v10299_v11  ;;  %v2261_v35 = vcombine.low %v10170_v31, %v1704_v14  ;;  %v2262_v17 = vcombine.high %v10170_v31, %v1704_v14  ;;  %v2941_v48 = vcombine.low %v1893_v25, %v1900_v26 }
 0x334   : > { %12322 = vst [vmem:[#allocation33_spill] sm:$0xff] %v10386_v56  ;;  %v2201_v33 = vrot.slane %v2193_v16, %v10289_v3  ;;  %v2208_v27 = vrot.slane %v2194_v19, %v10289_v3  ;;  %v8949_v50 = vcombine.high %v1893_v25, %v1900_v26  ;;  %v10410_v31 = vrot.slane %v2889_v0, %v10289_v3 }
 0x335   : > { %v2957_v51 = vcombine.low %v10394_v18, %v10397_v24  ;;  %v1750_v58 = vpop.permute.xlu0 %1749  ;;  %v2269_v54 = vrot.slane %v2261_v35, %v10289_v3  ;;  %v2276_v62 = vrot.slane %v2262_v17, %v10289_v3  ;;  %v10413_v15 = vrot.slane %v8948_v1, %v10289_v3 }
 0x336   : > { %v2209_v63 = vcombine.low %v1654_v44, %v1750_v58  ;;  %v2210_v2 = vcombine.high %v1654_v44, %v1750_v58  ;;  %v1752_v4 = vpop.permute.xlu1 %1751  ;;  %12323 = vst [vmem:[#allocation34_spill] sm:$0xff] %v10410_v31  ;;  %v2905_v14 = vcombine.low %v10386_v56, %v10389_v57  ;;  %v10420_v25 = vrot.slane %v2941_v48, %v10289_v3 }
 0x337   : > { %v2277_v5 = vcombine.low %v1656_v30, %v1752_v4  ;;  %v2278_v13 = vcombine.high %v1656_v30, %v1752_v4  ;;  %12324 = vst [vmem:[#allocation35_spill] sm:$0xff] %v10413_v15  ;;  %v2921_v0 = vcombine.low %v10410_v31, %v10413_v15  ;;  %v10429_v1 = vrot.slane %v8949_v50, %v10289_v3 }
 0x338   : > { %v2217_v16 = vrot.slane %v2209_v63, %v10289_v3  ;;  %v2224_v19 = vrot.slane %v2210_v2, %v10289_v3  ;;  %v3057_v49 = vcombine.low %v10378_v55, %v10381_v61 }
 0x339   : > { %v2285_v44 = vrot.slane %v2277_v5, %v10289_v3  ;;  %v2292_v30 = vrot.slane %v2278_v13, %v10289_v3  ;;  %v10424_v26 = vpop.permute.xlu0 %1649 }
 0x33a   : > { %v2225_v35 = vcombine.low %v2201_v33, %v2217_v16  ;;  %v2226_v17 = vcombine.high %v2201_v33, %v2217_v16  ;;  %v2241_v58 = vcombine.low %v2208_v27, %v2224_v19  ;;  %v2242_v63 = vcombine.high %v2208_v27, %v2224_v19  ;;  %v10431_v2 = vpop.permute.xlu1 %1651 }
 0x33b   : > { %v2293_v48 = vcombine.low %v2269_v54, %v2285_v44  ;;  %v2294_v4 = vcombine.high %v2269_v54, %v2285_v44  ;;  %v2309_v23 = vcombine.low %v2276_v62, %v2292_v30  ;;  %v2310_v5 = vcombine.high %v2276_v62, %v2292_v30  ;;  %v10441_v54 = vpop.f32.mrb[8].mxu1 }
 0x33c   : > { %v2233_v13 = vrot.slane %v2225_v35, %v10299_v11  ;;  %v2240_v22 = vrot.slane %v2226_v17, %v10299_v11  ;;  %v2249_v21 = vrot.slane %v2241_v58, %v10299_v11  ;;  %v2256_v20 = vrot.slane %v2242_v63, %v10299_v11  ;;  %12325 = vst [vmem:[#allocation36_spill] sm:$0xff] %v10441_v54  ;;  %v10443_v37 = vpop.f32.mrb[9].mxu1 }
 0x33d   : > { %v2301_v50 = vrot.slane %v2293_v48, %v10299_v11  ;;  %v2308_v33 = vrot.slane %v2294_v4, %v10299_v11  ;;  %v2317_v27 = vrot.slane %v2309_v23, %v10299_v11  ;;  %v2324_v16 = vrot.slane %v2310_v5, %v10299_v11  ;;  %v1698_v19 = vpop.permute.xlu0 %1697  ;;  %12326 = vst [vmem:[#allocation37_spill] sm:$0xff] %v10443_v37 }
 0x33e   : > { %v3281_v62 = vcombine.low %v2233_v13, %v2240_v22  ;;  %v8959_v44 = vcombine.high %v2233_v13, %v2240_v22  ;;  %v3297_v30 = vcombine.low %v2249_v21, %v2256_v20  ;;  %v8960_v35 = vcombine.high %v2249_v21, %v2256_v20  ;;  %v1700_v17 = vpop.permute.xlu1 %1699 }
 0x33f   : > { %v3349_v58 = vcombine.low %v2301_v50, %v2308_v33  ;;  %v8961_v63 = vcombine.high %v2301_v50, %v2308_v33  ;;  %v3365_v28 = vcombine.low %v2317_v27, %v2324_v16  ;;  %v8962_v48 = vcombine.high %v2317_v27, %v2324_v16 }
 0x340   : > { %v10446_v4 = vrot.slane %v3281_v62, %v10289_v3  ;;  %v10449_v23 = vrot.slane %v8959_v44, %v10289_v3  ;;  %v10452_v5 = vrot.slane %v3297_v30, %v10289_v3  ;;  %v10455_v22 = vrot.slane %v8960_v35, %v10289_v3 }
 0x341   : > { %v10458_v20 = vrot.slane %v3349_v58, %v10289_v3  ;;  %v10461_v21 = vrot.slane %v8961_v63, %v10289_v3  ;;  %v10464_v13 = vrot.slane %v3365_v28, %v10289_v3  ;;  %v10467_v50 = vrot.slane %v8962_v48, %v10289_v3  ;;  %v1746_v33 = vpop.permute.xlu0 %1745 }
 0x342   : > { %12327 = vst [vmem:[#allocation38_spill] sm:$0xff] %v10446_v4  ;;  %12328 = vst [vmem:[#allocation39_spill] sm:$0xff] %v10449_v23  ;;  %v2057_v27 = vcombine.low %v10196_v38, %v1698_v19  ;;  %v2058_v16 = vcombine.high %v10196_v38, %v1698_v19  ;;  %v2125_v62 = vcombine.low %v10199_v39, %v1700_v17  ;;  %v1748_v30 = vpop.permute.xlu1 %1747 }
 0x343   : > { %12329 = vst [vmem:[#allocation40_spill] sm:$0xff] %v10452_v5  ;;  %12330 = vst [vmem:[#allocation41_spill] sm:$0xff] %v10455_v22  ;;  %v2126_v44 = vcombine.high %v10199_v39, %v1700_v17  ;;  %v2913_v35 = vrot.slane %v2905_v14, %v10299_v11  ;;  %v2929_v58 = vrot.slane %v2921_v0, %v10299_v11 }
 0x344   : > { %12331 = vst [vmem:[#allocation42_spill] sm:$0xff] %v10464_v13  ;;  %12332 = vst [vmem:[#allocation43_spill] sm:$0xff] %v10467_v50  ;;  %v10479_v28 = vrot.slane %v2957_v51, %v10289_v3  ;;  %v12333_v63 = vcombine.high %v10394_v18, %v10397_v24  ;;  %v2065_v19 = vrot.slane %v2057_v27, %v10289_v3 }
 0x345   : > { %v2072_v39 = vrot.slane %v2058_v16, %v10289_v3  ;;  %v2133_v14 = vrot.slane %v2125_v62, %v10289_v3  ;;  %v10491_v0 = vrot.slane %v2126_v44, %v10289_v3  ;;  %v2937_v17 = vcombine.low %v2913_v35, %v2929_v58  ;;  %v10497_v24 = vpop.permute.xlu0 %1661 }
 0x346   : > { %v10485_v38 = vrot.slane %v12333_v63, %v10289_v3  ;;  %v2973_v51 = vcombine.low %v10420_v25, %v10429_v1  ;;  %v2938_v18 = vcombine.high %v2913_v35, %v2929_v58  ;;  %v10499_v63 = vpop.f32.mrb[10].mxu1  ;;  %v2073_v27 = vcombine.low %v10424_v26, %v1746_v33  ;;  %v10505_v12 = vpop.permute.xlu1 %1663 }
 0x347   : > { %12334 = vst [vmem:[#allocation44_spill] sm:$0xff] %v10499_v63  ;;  %v2074_v16 = vcombine.high %v10424_v26, %v1746_v33  ;;  %v2141_v62 = vcombine.low %v10431_v2, %v1748_v30  ;;  %v2142_v44 = vcombine.high %v10431_v2, %v1748_v30  ;;  %v10507_v8 = vpop.f32.mrb[11].mxu1  ;;  %v3041_v58 = vcombine.low %v10362_v45, %v10365_v46 }
 0x348   : > { %v2989_v48 = vcombine.low %v10479_v28, %v10485_v38  ;;  %12335 = vst [vmem:[#allocation45_spill] sm:$0xff] %v10507_v8  ;;  %v2981_v59 = vrot.slane %v2973_v51, %v10299_v11  ;;  %v2081_v26 = vrot.slane %v2073_v27, %v10289_v3 }
 0x349   : > { %v2088_v33 = vrot.slane %v2074_v16, %v10289_v3  ;;  %v2149_v2 = vrot.slane %v2141_v62, %v10289_v3  ;;  %v2156_v30 = vrot.slane %v2142_v44, %v10289_v3  ;;  %v10520_v51 = vrot.slane %v3041_v58, %v10299_v11  ;;  %v10525_v37 = vpop.permute.xlu0 %1709 }
 0x34a   : > { %v2997_v35 = vrot.slane %v2989_v48, %v10299_v11  ;;  %v10523_v48 = vrot.slane %v3057_v49, %v10299_v11  ;;  %v2089_v54 = vcombine.low %v2065_v19, %v2081_v26  ;;  %v2090_v55 = vcombine.high %v2065_v19, %v2081_v26  ;;  %v10527_v47 = vpop.permute.xlu1 %1711 }
 0x34b   : > { %v2105_v61 = vcombine.low %v2072_v39, %v2088_v33  ;;  %v2106_v27 = vcombine.high %v2072_v39, %v2088_v33  ;;  %v2157_v45 = vcombine.low %v2133_v14, %v2149_v2  ;;  %v2158_v44 = vcombine.high %v2133_v14, %v2149_v2 }
 0x34c   : > { %v3005_v63 = vcombine.low %v2981_v59, %v2997_v35  ;;  %v3006_v8 = vcombine.high %v2981_v59, %v2997_v35  ;;  %v2097_v59 = vrot.slane %v2089_v54, %v10299_v11  ;;  %v2104_v35 = vrot.slane %v2090_v55, %v10299_v11 }
 0x34d   : > { %v2113_v58 = vrot.slane %v2105_v61, %v10299_v11  ;;  %v2120_v49 = vrot.slane %v2106_v27, %v10299_v11  ;;  %v2165_v39 = vrot.slane %v2157_v45, %v10299_v11  ;;  %v2172_v26 = vrot.slane %v2158_v44, %v10299_v11 }
 0x34e   : > { %v6305_v16 = vpack.c.bf16 %v3005_v63, %v2937_v17  ;;  %v6313_v62 = vpack.c.bf16 %v3006_v8, %v2938_v18  ;;  %v1758_v17 = vpop.permute.xlu0 %1757  ;;  %v3145_v8 = vcombine.low %v2097_v59, %v2104_v35  ;;  %v8955_v14 = vcombine.high %v2097_v59, %v2104_v35  ;;  %v1760_v18 = vpop.permute.xlu1 %1759 }
 0x34f   : > { %v3161_v54 = vcombine.low %v2113_v58, %v2120_v49  ;;  %v8956_v55 = vcombine.high %v2113_v58, %v2120_v49  ;;  %v2173_v61 = vcombine.low %v10491_v0, %v2156_v30  ;;  %v2174_v63 = vcombine.high %v10491_v0, %v2156_v30 }
 0x350   : > { %v6342_v46 = vsel %vm6337_vm5, %v6305_v16, 0  ;;  %v6409_v19 = vsel %vm6337_vm5, %v6313_v62, 0  ;;  %v3213_v33 = vcombine.low %v2165_v39, %v2172_v26  ;;  %v12336_v2 = vmov 0.0  }
 0x351   : > { %9297 = vmatpush3.bf16.xpose.msra.mxu0 %v6342_v46  ;;  %9317 = vmatpush3.bf16.xpose.msra.mxu1 %v6409_v19  ;;  %v10541_v27 = vrot.slane %v3145_v8, %v10289_v3  ;;  %v10544_v45 = vrot.slane %v8955_v14, %v10289_v3  ;;  %v10547_v46 = vrot.slane %v3161_v54, %v10289_v3 }
 0x352   : > { %9298 = vmatprep.subr.bf16.mxu0 %v12336_v2  ;;  %v8957_v16 = vcombine.high %v2165_v39, %v2172_v26  ;;  %9318 = vmatprep.subr.bf16.mxu1 %v12336_v2  ;;  %v10551_v62 = vrot.slane %v8956_v55, %v10289_v3  ;;  %v2181_v0 = vrot.slane %v2173_v61, %v10299_v11  ;;  %v10558_v59 = vpop.permute.xlu0 %1657  ;;  %v10579_v8 = vpop.permute.xlu1 %1659 }
 0x353   : > { %v2188_v30 = vrot.slane %v2174_v63, %v10299_v11  ;;  %v10556_v44 = vrot.slane %v3213_v33, %v10289_v3  ;;  %9312 = vmatprep.mubr.msk.bf16.mxu0 %vm9832_vm6, %v12336_v2  ;;  %v3073_v58 = vcombine.low %v10520_v51, %v10523_v48  ;;  %v12339_v49 = vcombine.low %v10334_v6, %v10337_v7 }
 0x354   : > { %v10563_v35 = vrot.slane %v8957_v16, %v10289_v3  ;;  %v12341_v39 = vcombine.high %v10334_v6, %v10337_v7  ;;  %9332 = vmatprep.mubr.msk.bf16.mxu1 %vm9832_vm6, %v12336_v2  ;;  %v12343_v55 = vcombine.low %v10340_v9, %v10343_v10  ;;  %v12345_v63 = vcombine.high %v10340_v9, %v10343_v10 }
 0x355   : > { %12337 = vst [vmem:[#allocation46_spill] sm:$0xff] %v10556_v44  ;;  %v10571_v19 = vrot.slane %v12339_v49, %v10289_v3  ;;  %v3229_v14 = vcombine.low %v2181_v0, %v2188_v30  ;;  %v8958_v54 = vcombine.high %v2181_v0, %v2188_v30  ;;  %v3074_v33 = vcombine.high %v10520_v51, %v10523_v48 }
 0x356   : > { %12338 = vst [vmem:[#allocation47_spill] sm:$0xff] %v10563_v35  ;;  %v10577_v26 = vrot.slane %v12341_v39, %v10289_v3  ;;  %v10587_v61 = vrot.slane %v12343_v55, %v10289_v3  ;;  %v10593_v6 = vrot.slane %v12345_v63, %v10289_v3  ;;  %v2465_v16 = vcombine.low %v10210_v40, %v10525_v37  ;;  %v1706_v39 = vpop.permute.xlu0 %1705 }
 0x357   : > { %12340 = vst [vmem:[#allocation48_spill] sm:$0xff] %v10571_v19  ;;  %v2466_v0 = vcombine.high %v10210_v40, %v10525_v37  ;;  %v10604_v30 = vrot.slane %v3229_v14, %v10289_v3  ;;  %v10607_v49 = vrot.slane %v8958_v54, %v10289_v3  ;;  %v2533_v10 = vcombine.low %v10217_v41, %v10527_v47 }
 0x358   : > { %12342 = vst [vmem:[#allocation49_spill] sm:$0xff] %v10577_v26  ;;  %12344 = vst [vmem:[#allocation50_spill] sm:$0xff] %v10587_v61  ;;  %v3109_v7 = vcombine.low %v10571_v19, %v10577_v26  ;;  %v3125_v9 = vcombine.low %v10587_v61, %v10593_v6  ;;  %v2473_v48 = vrot.slane %v2465_v16, %v10289_v3  ;;  %v1708_v61 = vpop.permute.xlu1 %1707 }
 0x359   : > { %12346 = vst [vmem:[#allocation51_spill] sm:$0xff] %v10593_v6  ;;  %12347 = vst [vmem:[#allocation52_spill] sm:$0xff] %v10604_v30  ;;  %v2480_v55 = vrot.slane %v2466_v0, %v10289_v3  ;;  %v2534_v37 = vcombine.high %v10217_v41, %v10527_v47  ;;  %v2541_v14 = vrot.slane %v2533_v10, %v10289_v3 }
 0x35a   : > { %12348 = vst [vmem:[#allocation53_spill] sm:$0xff] %v10607_v49  ;;  %v3117_v51 = vrot.slane %v3109_v7, %v10299_v11  ;;  %v3133_v40 = vrot.slane %v3125_v9, %v10299_v11  ;;  %v2481_v54 = vcombine.low %v10497_v24, %v1758_v17  ;;  %v2482_v63 = vcombine.high %v10497_v24, %v1758_v17 }
 0x35b   : > { %v2548_v6 = vrot.slane %v2534_v37, %v10289_v3  ;;  %v2549_v7 = vcombine.low %v10505_v12, %v1760_v18  ;;  %v2550_v16 = vcombine.high %v10505_v12, %v1760_v18  ;;  %v2329_v0 = vcombine.low %v10232_v42, %v1706_v39  ;;  %v10634_v37 = vpop.permute.xlu0 %1753 }
 0x35c   : > { %v3141_v19 = vcombine.low %v3117_v51, %v3133_v40  ;;  %v3142_v26 = vcombine.high %v3117_v51, %v3133_v40  ;;  %v2489_v41 = vrot.slane %v2481_v54, %v10289_v3  ;;  %v2496_v47 = vrot.slane %v2482_v63, %v10289_v3 }
 0x35d   : > { %v2557_v9 = vrot.slane %v2549_v7, %v10289_v3  ;;  %v2564_v10 = vrot.slane %v2550_v16, %v10289_v3  ;;  %v2330_v24 = vcombine.high %v10232_v42, %v1706_v39  ;;  %v10632_v17 = vrot.slane %v2329_v0, %v10289_v3  ;;  %v1756_v39 = vpop.permute.xlu1 %1755 }
 0x35e   : > { %v6306_v12 = vpack.c.bf16 %v3141_v19, %v3073_v58  ;;  %v6314_v18 = vpack.c.bf16 %v3142_v26, %v3074_v33  ;;  %v2497_v31 = vcombine.low %v2473_v48, %v2489_v41  ;;  %v2498_v15 = vcombine.high %v2473_v48, %v2489_v41 }
 0x35f   : > { %v2513_v51 = vcombine.low %v2480_v55, %v2496_v47  ;;  %v2514_v40 = vcombine.high %v2480_v55, %v2496_v47  ;;  %v2565_v54 = vcombine.low %v2541_v14, %v2557_v9  ;;  %v2566_v56 = vcombine.high %v2541_v14, %v2557_v9  ;;  %v10647_v47 = vpop.permute.xlu0 %1669 }
 0x360   : > { %v6345_v63 = vsel %vm6337_vm5, %v6306_v12, 0  ;;  %v6412_v7 = vsel %vm6337_vm5, %v6314_v18, 0  ;;  %v2505_v16 = vrot.slane %v2497_v31, %v10299_v11  ;;  %v2512_v42 = vrot.slane %v2498_v15, %v10299_v11 }
 0x361   : > { %9299 = vmatpush3.bf16.xpose.msra.mxu0 %v6345_v63  ;;  %9319 = vmatpush3.bf16.xpose.msra.mxu1 %v6412_v7  ;;  %v2521_v58 = vrot.slane %v2513_v51, %v10299_v11  ;;  %v2528_v19 = vrot.slane %v2514_v40, %v10299_v11  ;;  %v2573_v26 = vrot.slane %v2565_v54, %v10299_v11 }
 0x362   : > { %v3553_v33 = vcombine.low %v2505_v16, %v2512_v42  ;;  %v8967_v48 = vcombine.high %v2505_v16, %v2512_v42  ;;  %v2580_v55 = vrot.slane %v2566_v56, %v10299_v11  ;;  %v2581_v14 = vcombine.low %v2548_v6, %v2564_v10  ;;  %9300 = vmatprep.subr.bf16.mxu0 %v12336_v2  ;;  %v10670_v16 = vpop.permute.xlu1 %1671 }
 0x363   : > { %v3569_v0 = vcombine.low %v2521_v58, %v2528_v19  ;;  %v8968_v31 = vcombine.high %v2521_v58, %v2528_v19  ;;  %v2582_v41 = vcombine.high %v2548_v6, %v2564_v10  ;;  %v2344_v15 = vrot.slane %v2330_v24, %v10289_v3  ;;  %9320 = vmatprep.subr.bf16.mxu1 %v12336_v2 }
 0x364   : > { %v10650_v9 = vrot.slane %v3553_v33, %v10289_v3  ;;  %v10653_v12 = vrot.slane %v8967_v48, %v10289_v3  ;;  %v2589_v56 = vrot.slane %v2581_v14, %v10299_v11  ;;  %v3621_v18 = vcombine.low %v2573_v26, %v2580_v55 }
 0x365   : > { %v10657_v51 = vrot.slane %v3569_v0, %v10289_v3  ;;  %v10660_v6 = vrot.slane %v8968_v31, %v10289_v3  ;;  %v2596_v10 = vrot.slane %v2582_v41, %v10299_v11  ;;  %v8969_v24 = vcombine.high %v2573_v26, %v2580_v55  ;;  %v10684_v55 = vpop.f32.mrb[12].mxu1 }
 0x366   : > { %v10664_v40 = vrot.slane %v3621_v18, %v10289_v3  ;;  %v2397_v54 = vcombine.low %v10235_v43, %v1708_v61  ;;  %v2398_v63 = vcombine.high %v10235_v43, %v1708_v61  ;;  %v3177_v7 = vcombine.low %v10541_v27, %v10544_v45  ;;  %12349 = vst [vmem:[#allocation54_spill] sm:$0xff] %v10684_v55  ;;  %v10697_v18 = vpop.f32.mrb[13].mxu1 }
 0x367   : > { %v10673_v42 = vrot.slane %v8969_v24, %v10289_v3  ;;  %v3637_v58 = vcombine.low %v2589_v56, %v2596_v10  ;;  %v8970_v19 = vcombine.high %v2589_v56, %v2596_v10  ;;  %v3193_v26 = vcombine.low %v10547_v46, %v10551_v62  ;;  %v10695_v56 = vpop.permute.xlu0 %1665  ;;  %12350 = vst [vmem:[#allocation55_spill] sm:$0xff] %v10697_v18 }
 0x368   : > { %v2405_v33 = vrot.slane %v2397_v54, %v10289_v3  ;;  %v10679_v48 = vrot.slane %v2398_v63, %v10289_v3  ;;  %v3185_v43 = vrot.slane %v3177_v7, %v10299_v11  ;;  %v3245_v61 = vcombine.low %v10556_v44, %v10563_v35 }
 0x369   : > { %v10687_v14 = vrot.slane %v3637_v58, %v10289_v3  ;;  %v10690_v0 = vrot.slane %v8970_v19, %v10289_v3  ;;  %v3201_v31 = vrot.slane %v3193_v26, %v10299_v11  ;;  %v3261_v41 = vcombine.low %v10604_v30, %v10607_v49  ;;  %v10712_v49 = vpop.permute.xlu1 %1667 }
 0x36a   : > { %v3253_v10 = vrot.slane %v3245_v61, %v10299_v11  ;;  %v2345_v24 = vcombine.low %v10558_v59, %v10634_v37  ;;  %v2346_v54 = vcombine.high %v10558_v59, %v10634_v37  ;;  %v2413_v63 = vcombine.low %v10579_v8, %v1756_v39 }
 0x36b   : > { %v3209_v7 = vcombine.low %v3185_v43, %v3201_v31  ;;  %v3269_v58 = vrot.slane %v3261_v41, %v10299_v11  ;;  %v3210_v19 = vcombine.high %v3185_v43, %v3201_v31  ;;  %v2414_v26 = vcombine.high %v10579_v8, %v1756_v39 }
 0x36c   : > { %v2353_v55 = vrot.slane %v2345_v24, %v10289_v3  ;;  %v2360_v18 = vrot.slane %v2346_v54, %v10289_v3  ;;  %v2421_v61 = vrot.slane %v2413_v63, %v10289_v3  ;;  %v3313_v30 = vcombine.low %v10446_v4, %v10449_v23  ;;  %v1714_v4 = vpop.permute.xlu0 %1713 }
 0x36d   : > { %v3277_v59 = vcombine.low %v3253_v10, %v3269_v58  ;;  %v3278_v37 = vcombine.high %v3253_v10, %v3269_v58  ;;  %v2428_v44 = vrot.slane %v2414_v26, %v10289_v3  ;;  %v3329_v43 = vcombine.low %v10452_v5, %v10455_v22  ;;  %v10723_v5 = vpop.f32.mrb[14].mxu1 }
 0x36e   : > { %v2361_v8 = vcombine.low %v10632_v17, %v2353_v55  ;;  %v2362_v39 = vcombine.high %v10632_v17, %v2353_v55  ;;  %v2377_v31 = vcombine.low %v2344_v15, %v2360_v18  ;;  %v2378_v41 = vcombine.high %v2344_v15, %v2360_v18  ;;  %12351 = vst [vmem:[#allocation56_spill] sm:$0xff] %v10723_v5 }
 0x36f   : > { %v6307_v24 = vpack.c.bf16 %v3277_v59, %v3209_v7  ;;  %v6315_v54 = vpack.c.bf16 %v3278_v37, %v3210_v19  ;;  %v2429_v63 = vcombine.low %v2405_v33, %v2421_v61  ;;  %v2430_v35 = vcombine.high %v2405_v33, %v2421_v61  ;;  %v10729_v33 = vpop.f32.mrb[15].mxu1  ;;  %v1716_v61 = vpop.permute.xlu1 %1715 }
 0x370   : > { %v2369_v23 = vrot.slane %v2361_v8, %v10299_v11  ;;  %v2376_v10 = vrot.slane %v2362_v39, %v10299_v11  ;;  %v2385_v58 = vrot.slane %v2377_v31, %v10299_v11  ;;  %v2392_v26 = vrot.slane %v2378_v41, %v10299_v11  ;;  %12352 = vst [vmem:[#allocation57_spill] sm:$0xff] %v10729_v33 }
 0x371   : > { %v6348_v22 = vsel %vm6337_vm5, %v6307_v24, 0  ;;  %v6415_v17 = vsel %vm6337_vm5, %v6315_v54, 0  ;;  %v2437_v15 = vrot.slane %v2429_v63, %v10299_v11  ;;  %v2444_v55 = vrot.slane %v2430_v35, %v10299_v11  ;;  %v1762_v54 = vpop.permute.xlu0 %1761 }
 0x372   : > { %9301 = vmatpush3.bf16.xpose.msra.mxu0 %v6348_v22  ;;  %9321 = vmatpush3.bf16.xpose.msra.mxu1 %v6415_v17  ;;  %v3417_v18 = vcombine.low %v2369_v23, %v2376_v10  ;;  %v8963_v7 = vcombine.high %v2369_v23, %v2376_v10  ;;  %v3433_v19 = vcombine.low %v2385_v58, %v2392_v26 }
 0x373   : > { %v8964_v59 = vcombine.high %v2385_v58, %v2392_v26  ;;  %v2445_v37 = vcombine.low %v10679_v48, %v2428_v44  ;;  %v2446_v8 = vcombine.high %v10679_v48, %v2428_v44  ;;  %v3485_v39 = vcombine.low %v2437_v15, %v2444_v55  ;;  %9302 = vmatprep.subr.bf16.mxu0 %v12336_v2 }
 0x374   : > { %v10735_v31 = vrot.slane %v3417_v18, %v10289_v3  ;;  %v10738_v35 = vrot.slane %v8963_v7, %v10289_v3  ;;  %v10741_v22 = vrot.slane %v3433_v19, %v10289_v3  ;;  %v8965_v23 = vcombine.high %v2437_v15, %v2444_v55  ;;  %9322 = vmatprep.subr.bf16.mxu1 %v12336_v2 }
 0x375   : > { %v10745_v41 = vrot.slane %v8964_v59, %v10289_v3  ;;  %v2453_v44 = vrot.slane %v2445_v37, %v10299_v11  ;;  %v2460_v48 = vrot.slane %v2446_v8, %v10299_v11  ;;  %v10750_v24 = vrot.slane %v3485_v39, %v10289_v3  ;;  %v1764_v8 = vpop.permute.xlu1 %1763 }
 0x376   : > { %12353 = vst [vmem:[#allocation58_spill] sm:$0xff] %v10741_v22  ;;  %v10753_v63 = vrot.slane %v8965_v23, %v10289_v3  ;;  %v3321_v10 = vrot.slane %v3313_v30, %v10299_v11  ;;  %v3337_v58 = vrot.slane %v3329_v43, %v10299_v11  ;;  %v3381_v26 = vcombine.low %v10458_v20, %v10461_v21 }
 0x377   : > { %12354 = vst [vmem:[#allocation59_spill] sm:$0xff] %v10745_v41  ;;  %12355 = vst [vmem:[#allocation60_spill] sm:$0xff] %v10750_v24  ;;  %v3501_v17 = vcombine.low %v2453_v44, %v2460_v48  ;;  %v8966_v15 = vcombine.high %v2453_v44, %v2460_v48  ;;  %v3397_v55 = vcombine.low %v10464_v13, %v10467_v50 }
 0x378   : > { %12356 = vst [vmem:[#allocation61_spill] sm:$0xff] %v10753_v63  ;;  %v2601_v18 = vcombine.low %v10173_v32, %v1714_v4  ;;  %v3345_v7 = vcombine.low %v3321_v10, %v3337_v58  ;;  %v3389_v19 = vrot.slane %v3381_v26, %v10299_v11  ;;  %v3346_v59 = vcombine.high %v3321_v10, %v3337_v58 }
 0x379   : > { %v2602_v37 = vcombine.high %v10173_v32, %v1714_v4  ;;  %v10765_v30 = vrot.slane %v3501_v17, %v10289_v3  ;;  %v10768_v43 = vrot.slane %v8966_v15, %v10289_v3  ;;  %v3405_v39 = vrot.slane %v3397_v55, %v10299_v11  ;;  %v1718_v15 = vpop.permute.xlu0 %1717 }
 0x37a   : > { %v2609_v23 = vrot.slane %v2601_v18, %v10289_v3  ;;  %v2669_v48 = vcombine.low %v10183_v36, %v1716_v61  ;;  %v2670_v26 = vcombine.high %v10183_v36, %v1716_v61  ;;  %v2617_v10 = vcombine.low %v10695_v56, %v1762_v54 }
 0x37b   : > { %12357 = vst [vmem:[#allocation62_spill] sm:$0xff] %v10765_v30  ;;  %12358 = vst [vmem:[#allocation63_spill] sm:$0xff] %v10768_v43  ;;  %v2616_v44 = vrot.slane %v2602_v37, %v10289_v3  ;;  %v3413_v32 = vcombine.low %v3389_v19, %v3405_v39  ;;  %v3414_v4 = vcombine.high %v3389_v19, %v3405_v39 }
 0x37c   : > { %v2618_v58 = vcombine.high %v10695_v56, %v1762_v54  ;;  %v2685_v17 = vcombine.low %v10712_v49, %v1764_v8  ;;  %v2677_v5 = vrot.slane %v2669_v48, %v10289_v3  ;;  %v2684_v55 = vrot.slane %v2670_v26, %v10289_v3 }
 0x37d   : > { %v2625_v18 = vrot.slane %v2617_v10, %v10289_v3  ;;  %v2686_v37 = vcombine.high %v10712_v49, %v1764_v8  ;;  %v6308_v33 = vpack.c.bf16 %v3413_v32, %v3345_v7  ;;  %v6316_v13 = vpack.c.bf16 %v3414_v4, %v3346_v59 }
 0x37e   : > { %v2632_v36 = vrot.slane %v2618_v58, %v10289_v3  ;;  %v2693_v61 = vrot.slane %v2685_v17, %v10289_v3  ;;  %v2737_v54 = vcombine.low %v10167_v29, %v1718_v15  ;;  %v1720_v17 = vpop.permute.xlu1 %1719 }
 0x37f   : > { %v2633_v19 = vcombine.low %v2609_v23, %v2625_v18  ;;  %v2634_v39 = vcombine.high %v2609_v23, %v2625_v18  ;;  %v2700_v56 = vrot.slane %v2686_v37, %v10289_v3  ;;  %v6351_v48 = vsel %vm6337_vm5, %v6308_v33, 0 }
 0x380   : > { %v6418_v26 = vsel %vm6337_vm5, %v6316_v13, 0  ;;  %v2649_v50 = vcombine.low %v2616_v44, %v2632_v36  ;;  %v2650_v10 = vcombine.high %v2616_v44, %v2632_v36  ;;  %9303 = vmatpush3.bf16.xpose.msra.mxu0 %v6351_v48  ;;  %v2701_v59 = vcombine.low %v2677_v5, %v2693_v61 }
 0x381   : > { %9323 = vmatpush3.bf16.xpose.msra.mxu1 %v6418_v26  ;;  %v2641_v49 = vrot.slane %v2633_v19, %v10299_v11  ;;  %v2648_v7 = vrot.slane %v2634_v39, %v10299_v11  ;;  %v2702_v32 = vcombine.high %v2677_v5, %v2693_v61  ;;  %v2717_v4 = vcombine.low %v2684_v55, %v2700_v56 }
 0x382   : > { %v2657_v8 = vrot.slane %v2649_v50, %v10299_v11  ;;  %v2664_v23 = vrot.slane %v2650_v10, %v10299_v11  ;;  %9304 = vmatprep.subr.bf16.mxu0 %v12336_v2  ;;  %v2709_v13 = vrot.slane %v2701_v59, %v10299_v11  ;;  %v2718_v44 = vcombine.high %v2684_v55, %v2700_v56 }
 0x383   : > { %v3689_v33 = vcombine.low %v2641_v49, %v2648_v7  ;;  %v8971_v58 = vcombine.high %v2641_v49, %v2648_v7  ;;  %9324 = vmatprep.subr.bf16.mxu1 %v12336_v2  ;;  %v2716_v36 = vrot.slane %v2702_v32, %v10299_v11  ;;  %v2725_v50 = vrot.slane %v2717_v4, %v10299_v11  ;;  %v1766_v32 = vpop.permute.xlu0 %1765 }
 0x384   : > { %v3705_v18 = vcombine.low %v2657_v8, %v2664_v23  ;;  %v8972_v37 = vcombine.high %v2657_v8, %v2664_v23  ;;  %v2732_v61 = vrot.slane %v2718_v44, %v10299_v11  ;;  %v2738_v39 = vcombine.high %v10167_v29, %v1718_v15 }
 0x385   : > { %v10798_v19 = vrot.slane %v3689_v33, %v10289_v3  ;;  %v10801_v5 = vrot.slane %v8971_v58, %v10289_v3  ;;  %v3757_v48 = vcombine.low %v2709_v13, %v2716_v36  ;;  %v8973_v26 = vcombine.high %v2709_v13, %v2716_v36  ;;  %v1768_v13 = vpop.permute.xlu1 %1767 }
 0x386   : > { %v10806_v55 = vrot.slane %v3705_v18, %v10289_v3  ;;  %v10809_v56 = vrot.slane %v8972_v37, %v10289_v3  ;;  %v3773_v10 = vcombine.low %v2725_v50, %v2732_v61  ;;  %v8974_v49 = vcombine.high %v2725_v50, %v2732_v61 }
 0x387   : > { %v2745_v7 = vrot.slane %v2737_v54, %v10289_v3  ;;  %v2752_v59 = vrot.slane %v2738_v39, %v10289_v3  ;;  %v10814_v8 = vrot.slane %v3757_v48, %v10289_v3  ;;  %v10817_v23 = vrot.slane %v8973_v26, %v10289_v3 }
 0x388   : > { %v2805_v29 = vcombine.low %v10178_v34, %v1720_v17  ;;  %v2806_v15 = vcombine.high %v10178_v34, %v1720_v17  ;;  %v10822_v4 = vrot.slane %v3773_v10, %v10289_v3  ;;  %v10825_v33 = vrot.slane %v8974_v49, %v10289_v3 }
 0x389   : > { %v3449_v54 = vcombine.low %v10735_v31, %v10738_v35  ;;  %v3465_v58 = vcombine.low %v10741_v22, %v10745_v41  ;;  %v3517_v34 = vcombine.low %v10750_v24, %v10753_v63  ;;  %v3533_v17 = vcombine.low %v10765_v30, %v10768_v43 }
 0x38a   : > { %v2813_v44 = vrot.slane %v2805_v29, %v10289_v3  ;;  %v2820_v18 = vrot.slane %v2806_v15, %v10289_v3  ;;  %v2753_v50 = vcombine.low %v10647_v47, %v1766_v32  ;;  %v2754_v61 = vcombine.high %v10647_v47, %v1766_v32 }
 0x38b   : > { %v3457_v37 = vrot.slane %v3449_v54, %v10299_v11  ;;  %v3473_v36 = vrot.slane %v3465_v58, %v10299_v11  ;;  %v3525_v39 = vrot.slane %v3517_v34, %v10299_v11  ;;  %v3541_v48 = vrot.slane %v3533_v17, %v10299_v11 }
 0x38c   : > { %v2821_v26 = vcombine.low %v10670_v16, %v1768_v13  ;;  %v2822_v10 = vcombine.high %v10670_v16, %v1768_v13  ;;  %v2761_v15 = vrot.slane %v2753_v50, %v10289_v3  ;;  %v2768_v54 = vrot.slane %v2754_v61, %v10289_v3 }
 0x38d   : > { %v3481_v49 = vcombine.low %v3457_v37, %v3473_v36  ;;  %v3482_v29 = vcombine.high %v3457_v37, %v3473_v36  ;;  %v3549_v30 = vcombine.low %v3525_v39, %v3541_v48  ;;  %v3550_v58 = vcombine.high %v3525_v39, %v3541_v48 }
 0x38e   : > { %v2829_v43 = vrot.slane %v2821_v26, %v10289_v3  ;;  %v2836_v47 = vrot.slane %v2822_v10, %v10289_v3  ;;  %v2769_v32 = vcombine.low %v2745_v7, %v2761_v15  ;;  %v2770_v34 = vcombine.high %v2745_v7, %v2761_v15 }
 0x38f   : > { %v2785_v24 = vcombine.low %v2752_v59, %v2768_v54  ;;  %v2786_v17 = vcombine.high %v2752_v59, %v2768_v54  ;;  %v6309_v63 = vpack.c.bf16 %v3549_v30, %v3481_v49  ;;  %v6317_v22 = vpack.c.bf16 %v3550_v58, %v3482_v29 }
 0x390   : > { %v2837_v41 = vcombine.low %v2813_v44, %v2829_v43  ;;  %v2838_v16 = vcombine.high %v2813_v44, %v2829_v43  ;;  %v2777_v13 = vrot.slane %v2769_v32, %v10299_v11  ;;  %v2784_v37 = vrot.slane %v2770_v34, %v10299_v11 }
 0x391   : > { %v2793_v36 = vrot.slane %v2785_v24, %v10299_v11  ;;  %v2800_v50 = vrot.slane %v2786_v17, %v10299_v11  ;;  %v6354_v61 = vsel %vm6337_vm5, %v6309_v63, 0  ;;  %v6421_v39 = vsel %vm6337_vm5, %v6317_v22, 0 }
 0x392   : > { %v2845_v7 = vrot.slane %v2837_v41, %v10299_v11  ;;  %v2852_v59 = vrot.slane %v2838_v16, %v10299_v11  ;;  %9305 = vmatpush3.bf16.xpose.msra.mxu0 %v6354_v61  ;;  %9325 = vmatpush3.bf16.xpose.msra.mxu1 %v6421_v39  ;;  %v3825_v30 = vcombine.low %v2777_v13, %v2784_v37 }
 0x393   : > { %v8975_v43 = vcombine.high %v2777_v13, %v2784_v37  ;;  %v3841_v44 = vcombine.low %v2793_v36, %v2800_v50  ;;  %v8976_v48 = vcombine.high %v2793_v36, %v2800_v50  ;;  %v2853_v26 = vcombine.low %v2820_v18, %v2836_v47  ;;  %9306 = vmatprep.subr.bf16.mxu0 %v12336_v2 }
 0x394   : > { %v2854_v10 = vcombine.high %v2820_v18, %v2836_v47  ;;  %v3893_v49 = vcombine.low %v2845_v7, %v2852_v59  ;;  %v10859_v24 = vrot.slane %v3825_v30, %v10289_v3  ;;  %v8977_v63 = vcombine.high %v2845_v7, %v2852_v59  ;;  %9326 = vmatprep.subr.bf16.mxu1 %v12336_v2 }
 0x395   : > { %v10862_v22 = vrot.slane %v8975_v43, %v10289_v3  ;;  %v10865_v41 = vrot.slane %v3841_v44, %v10289_v3  ;;  %v10869_v29 = vrot.slane %v8976_v48, %v10289_v3  ;;  %v2861_v18 = vrot.slane %v2853_v26, %v10299_v11 }
 0x396   : > { %v2868_v15 = vrot.slane %v2854_v10, %v10299_v11  ;;  %v10874_v54 = vrot.slane %v3893_v49, %v10289_v3  ;;  %v10877_v58 = vrot.slane %v8977_v63, %v10289_v3  ;;  %v3585_v47 = vcombine.low %v10650_v9, %v10653_v12 }
 0x397   : > { %v3601_v32 = vcombine.low %v10657_v51, %v10660_v6  ;;  %v3653_v34 = vcombine.low %v10664_v40, %v10673_v42  ;;  %v3669_v13 = vcombine.low %v10687_v14, %v10690_v0  ;;  %v3721_v37 = vcombine.low %v10798_v19, %v10801_v5 }
 0x398   : > { %v3909_v17 = vcombine.low %v2861_v18, %v2868_v15  ;;  %v8978_v16 = vcombine.high %v2861_v18, %v2868_v15  ;;  %v3593_v36 = vrot.slane %v3585_v47, %v10299_v11  ;;  %v3737_v39 = vcombine.low %v10806_v55, %v10809_v56 }
 0x399   : > { %v3609_v50 = vrot.slane %v3601_v32, %v10299_v11  ;;  %v3661_v61 = vrot.slane %v3653_v34, %v10299_v11  ;;  %v3677_v30 = vrot.slane %v3669_v13, %v10299_v11  ;;  %v3729_v43 = vrot.slane %v3721_v37, %v10299_v11  ;;  %v10909_v34 = vld [vmem:[%s9912_s30] ss:$0 sm:$0xff] }
 0x39a   : > { %v10895_v7 = vrot.slane %v3909_v17, %v10289_v3  ;;  %v10898_v59 = vrot.slane %v8978_v16, %v10289_v3  ;;  %v3745_v26 = vrot.slane %v3737_v39, %v10299_v11  ;;  %v3789_v10 = vcombine.low %v10814_v8, %v10817_v23 }
 0x39b   : > { %v3617_v44 = vcombine.low %v3593_v36, %v3609_v50  ;;  %v3618_v48 = vcombine.high %v3593_v36, %v3609_v50  ;;  %v3685_v49 = vcombine.low %v3661_v61, %v3677_v30  ;;  %v3686_v63 = vcombine.high %v3661_v61, %v3677_v30 }
 0x39c   : > { %v3805_v18 = vcombine.low %v10822_v4, %v10825_v33  ;;  %v3753_v15 = vcombine.low %v3729_v43, %v3745_v26  ;;  %v3797_v47 = vrot.slane %v3789_v10, %v10299_v11  ;;  %v3754_v32 = vcombine.high %v3729_v43, %v3745_v26 }
 0x39d   : > { %v10913_v17 = vadd.f32 %v10909_v34, %v10327_v60  ;;  %v6310_v16 = vpack.c.bf16 %v3685_v49, %v3617_v44  ;;  %v6318_v13 = vpack.c.bf16 %v3686_v63, %v3618_v48  ;;  %v3857_v36 = vcombine.low %v10859_v24, %v10862_v22 }
 0x39e   : > { %v3813_v37 = vrot.slane %v3805_v18, %v10299_v11  ;;  %v3873_v50 = vcombine.low %v10865_v41, %v10869_v29  ;;  %v3925_v61 = vcombine.low %v10874_v54, %v10877_v58  ;;  %v3941_v39 = vcombine.low %v10895_v7, %v10898_v59 }
 0x39f   : > { %12359 = vst [vmem:[#allocation64_spill] sm:$0xff] %v10913_v17  ;;  %3985 = vrot.lane.b32.xlu0 %v10913_v17, %s9825_s16  ;;  %v6357_v60 = vsel %vm6337_vm5, %v6310_v16, 0  ;;  %v6424_v30 = vsel %vm6337_vm5, %v6318_v13, 0  ;;  %v3865_v48 = vrot.slane %v3857_v36, %v10299_v11  ;;  %v10936_v16 = vadd.f32 %v10909_v34, %v10373_v52 }
 0x3a0   : > { %v3821_v43 = vcombine.low %v3797_v47, %v3813_v37  ;;  %v3822_v44 = vcombine.high %v3797_v47, %v3813_v37  ;;  %9307 = vmatpush3.bf16.xpose.msra.mxu0 %v6357_v60  ;;  %9327 = vmatpush3.bf16.xpose.msra.mxu1 %v6424_v30  ;;  %v3881_v26 = vrot.slane %v3873_v50, %v10299_v11  ;;  %v12360_v60 = vld [vmem:[#allocation33_spill] sm:$0xff] }
 0x3a1   : > { %v3933_v10 = vrot.slane %v3925_v61, %v10299_v11  ;;  %9308 = vmatprep.subr.bf16.mxu0 %v12336_v2  ;;  %9328 = vmatprep.subr.bf16.mxu1 %v12336_v2  ;;  %v3949_v18 = vrot.slane %v3941_v39, %v10299_v11  ;;  %v2974_v52 = vcombine.high %v10420_v25, %v10429_v1  ;;  %v12364_v25 = vld [vmem:[#allocation28_spill] sm:$0xff] }
 0x3a2   : > { %v6311_v49 = vpack.c.bf16 %v3821_v43, %v3753_v15  ;;  %v6319_v63 = vpack.c.bf16 %v3822_v44, %v3754_v32  ;;  %v3889_v47 = vcombine.low %v3865_v48, %v3881_v26  ;;  %v3890_v37 = vcombine.high %v3865_v48, %v3881_v26  ;;  %3987 = vrot.lane.b32.xlu1 %v10936_v16, %s9825_s16  ;;  %v10944_v32 = vld [vmem:[#allocation2] sm:$0xff]  ;;  %v12361_v43 = vld [vmem:[#allocation35_spill] sm:$0xff] }
 0x3a3   : > { %4033 = vrot.lane.b32.xlu0 %v10913_v17, %s9826_s18  ;;  %v3957_v13 = vcombine.low %v3933_v10, %v3949_v18  ;;  %v3958_v36 = vcombine.high %v3933_v10, %v3949_v18  ;;  %v2990_v61 = vcombine.high %v10479_v28, %v10485_v38  ;;  %v10952_v39 = vadd.f32 %v10909_v34, %v10323_v53  ;;  %v12362_v44 = vld [vmem:[#allocation34_spill] sm:$0xff]  ;;  %v12366_v38 = vld [vmem:[#allocation32_spill] sm:$0xff] }
 0x3a4   : > { %v6360_v50 = vsel %vm6337_vm5, %v6311_v49, 0  ;;  %v6427_v15 = vsel %vm6337_vm5, %v6319_v63, 0  ;;  %v2906_v30 = vcombine.high %v12360_v60, %v10389_v57  ;;  %v2922_v48 = vcombine.high %v12362_v44, %v12361_v43  ;;  %v12363_v49 = vld [vmem:[#allocation29_spill] sm:$0xff]  ;;  %v12365_v28 = vld [vmem:[#allocation30_spill] sm:$0xff]  ;;  %v12367_v63 = vld [vmem:[#allocation31_spill] sm:$0xff] }
 0x3a5   : > { %v6312_v26 = vpack.c.bf16 %v3957_v13, %v3889_v47  ;;  %v6320_v10 = vpack.c.bf16 %v3958_v36, %v3890_v37  ;;  %v3042_v1 = vcombine.high %v12364_v25, %v12363_v49  ;;  %v10964_v53 = vadd.f32 %v10909_v34, %v12365_v28  ;;  %v12368_v37 = vld [vmem:[#allocation49_spill] sm:$0xff]  ;;  %v12369_v36 = vld [vmem:[#allocation48_spill] sm:$0xff]  ;;  %v12370_v43 = vld [vmem:[#allocation51_spill] sm:$0xff] }
 0x3a6   : > { %v3058_v18 = vcombine.high %v12367_v63, %v12366_v38  ;;  %v2988_v47 = vrot.slane %v2974_v52, %v10299_v11  ;;  %v3004_v13 = vrot.slane %v2990_v61, %v10299_v11  ;;  %v2936_v60 = vrot.slane %v2922_v48, %v10299_v11  ;;  %4035 = vrot.lane.b32.xlu1 %v10936_v16, %s9826_s18  ;;  %v12371_v44 = vld [vmem:[#allocation50_spill] sm:$0xff]  ;;  %v12374_v57 = vld [vmem:[#allocation53_spill] sm:$0xff] }
 0x3a7   : > { %4081 = vrot.lane.b32.xlu0 %v10913_v17, %s9827_s0  ;;  %v3126_v49 = vcombine.high %v12371_v44, %v12370_v43  ;;  %v6363_v52 = vsel %vm6337_vm5, %v6312_v26, 0  ;;  %v6430_v61 = vsel %vm6337_vm5, %v6320_v10, 0  ;;  %v3056_v25 = vrot.slane %v3042_v1, %v10299_v11  ;;  %v12372_v26 = vld [vmem:[#allocation47_spill] sm:$0xff]  ;;  %v12373_v44 = vld [vmem:[#allocation46_spill] sm:$0xff]  ;;  %v12375_v1 = vld [vmem:[#allocation52_spill] sm:$0xff] }
 0x3a8   : > { %9309 = vmatpush3.bf16.xpose.msra.mxu0 %v6360_v50  ;;  %9329 = vmatpush3.bf16.xpose.msra.mxu1 %v6427_v15  ;;  %v3110_v50 = vcombine.high %v12369_v36, %v12368_v37  ;;  %v2920_v15 = vrot.slane %v2906_v30, %v10299_v11  ;;  %v3072_v30 = vrot.slane %v3058_v18, %v10299_v11  ;;  %v6298_v37 = vld [vmem:[#allocation2 + $0x8] sm:$0xff] }
 0x3a9   : > { %9310 = vmatprep.subr.bf16.mxu0 %v12336_v2  ;;  %9330 = vmatprep.subr.bf16.mxu1 %v12336_v2  ;;  %v3140_v48 = vrot.slane %v3126_v49, %v10299_v11  ;;  %v3178_v38 = vcombine.high %v10541_v27, %v10544_v45  ;;  %v3194_v63 = vcombine.high %v10547_v46, %v10551_v62 }
 0x3aa   : > { %v3124_v28 = vrot.slane %v3110_v50, %v10299_v11  ;;  %v3007_v36 = vcombine.low %v2988_v47, %v3004_v13  ;;  %v3008_v43 = vcombine.high %v2988_v47, %v3004_v13  ;;  %v3246_v10 = vcombine.high %v12373_v44, %v12372_v26  ;;  %4083 = vrot.lane.b32.xlu1 %v10936_v16, %s9827_s0  ;;  %v12380_v26 = vld [vmem:[#allocation45_spill] sm:$0xff] }
 0x3ab   : > { %3989 = vrot.lane.b32.xlu0 %v10952_v39, %s9825_s16  ;;  %v3262_v17 = vcombine.high %v12375_v1, %v12374_v57  ;;  %v2939_v50 = vcombine.low %v2920_v15, %v2936_v60  ;;  %v2940_v3 = vcombine.high %v2920_v15, %v2936_v60  ;;  %v11003_v27 = vrot.slane %v3178_v38, %v10299_v11  ;;  %v11014_v15 = vpop.permute.xlu1 %3977  ;;  %v12381_v1 = vld [vmem:[#allocation59_spill] sm:$0xff] }
 0x3ac   : > { %v3143_v18 = vcombine.low %v3124_v28, %v3140_v48  ;;  %v11006_v45 = vrot.slane %v3194_v63, %v10299_v11  ;;  %v11009_v46 = vrot.slane %v3246_v10, %v10299_v11  ;;  %v6302_v57 = vpack.c.bf16 %v6298_v37, %v6298_v37  ;;  %v12379_v37 = vld [vmem:[#allocation42_spill] sm:$0xff] }
 0x3ad   : > { %v11012_v62 = vrot.slane %v3262_v17, %v10299_v11  ;;  %v3075_v47 = vcombine.low %v3056_v25, %v3072_v30  ;;  %v3144_v13 = vcombine.high %v3124_v28, %v3140_v48  ;;  %v6321_v60 = vpack.c.bf16 %v3007_v36, %v2939_v50  ;;  %v12376_v17 = vld [vmem:[#allocation36_spill] sm:$0xff]  ;;  %v12382_v50 = vld [vmem:[#allocation58_spill] sm:$0xff] }
 0x3ae   : > { %v6329_v49 = vpack.c.bf16 %v3008_v43, %v2940_v3  ;;  %v3076_v38 = vcombine.high %v3056_v25, %v3072_v30  ;;  %3991 = vrot.lane.b32.xlu1 %v10964_v53, %s9825_s16  ;;  %v3211_v48 = vcombine.low %v11003_v27, %v11006_v45  ;;  %v3382_v25 = vcombine.high %v10458_v20, %v10461_v21  ;;  %v12378_v30 = vld [vmem:[#allocation43_spill] sm:$0xff] }
 0x3af   : > { %4037 = vrot.lane.b32.xlu0 %v10952_v39, %s9826_s18  ;;  %v6322_v63 = vpack.c.bf16 %v3143_v18, %v3075_v47  ;;  %v3279_v3 = vcombine.low %v11009_v46, %v11012_v62  ;;  %v3398_v36 = vcombine.high %v12379_v37, %v12378_v30  ;;  %v11040_v44 = vadd.f32 %v10909_v34, %v12380_v26  ;;  %v12385_v30 = vld [vmem:[#allocation61_spill] sm:$0xff]  ;;  %v12386_v37 = vld [vmem:[#allocation60_spill] sm:$0xff] }
 0x3b0   : > { %9311 = vmatpush3.bf16.xpose.msra.mxu0 %v6363_v52  ;;  %9331 = vmatpush3.bf16.xpose.msra.mxu1 %v6430_v61  ;;  %v11022_v52 = vadd.f32 %v10909_v34, %v12376_v17  ;;  %v12377_v61 = vld [vmem:[#allocation37_spill] sm:$0xff]  ;;  %v6330_v43 = vpack.c.bf16 %v3144_v13, %v3076_v38  ;;  %v3450_v10 = vcombine.high %v10735_v31, %v10738_v35  ;;  %v12383_v17 = vld [vmem:[#allocation39_spill] sm:$0xff]  ;;  %v6476_v38 = vsel %vm6337_vm5, %v6321_v60, 0 }
 0x3b1   : > { %9336 = vmatprep.subr.bf16.mxu0 %v12336_v2  ;;  %9356 = vmatprep.subr.bf16.mxu1 %v12336_v2  ;;  %v11026_v28 = vadd.f32 %v10909_v34, %v12377_v61  ;;  %v3466_v18 = vcombine.high %v12382_v50, %v12381_v1  ;;  %v3212_v47 = vcombine.high %v11003_v27, %v11006_v45  ;;  %v12384_v61 = vld [vmem:[#allocation38_spill] sm:$0xff]  ;;  %v6543_v60 = vsel %vm6337_vm5, %v6329_v49, 0  ;;  %v12390_v49 = vld [vmem:[#allocation63_spill] sm:$0xff] }
 0x3b2   : > { %v3314_v20 = vcombine.high %v12384_v61, %v12383_v17  ;;  %v11051_v21 = vrot.slane %v3382_v25, %v10299_v11  ;;  %v11054_v13 = vrot.slane %v3398_v36, %v10299_v11  ;;  %4039 = vrot.lane.b32.xlu1 %v10964_v53, %s9826_s18  ;;  %v3464_v31 = vrot.slane %v3450_v10, %v10299_v11  ;;  %v11065_v25 = vpop.permute.xlu1 %4025  ;;  %v12389_v17 = vld [vmem:[#allocation40_spill] sm:$0xff] }
 0x3b3   : > { %4085 = vrot.lane.b32.xlu0 %v10952_v39, %s9827_s0  ;;  %v3480_v35 = vrot.slane %v3466_v18, %v10299_v11  ;;  %v3518_v26 = vcombine.high %v12386_v37, %v12385_v30  ;;  %v12387_v36 = vpack.c.bf16 %v10944_v32, %v10944_v32  ;;  %v11073_v1 = vpack.c.bf16 %v3279_v3, %v3211_v48  ;;  %v12388_v18 = vld [vmem:[#allocation41_spill] sm:$0xff] }
 0x3b4   : > { %v3280_v10 = vcombine.high %v11009_v46, %v11012_v62  ;;  %v3415_v50 = vcombine.low %v11051_v21, %v11054_v13  ;;  %v3330_v61 = vcombine.high %v12389_v17, %v12388_v18  ;;  %v3416_v32 = vcombine.high %v11051_v21, %v11054_v13  ;;  %v12391_v46 = vld [vmem:[#allocation62_spill] sm:$0xff]  ;;  %v12394_v13 = vld [vmem:[#allocation23_spill] sm:$0xff] }
 0x3b5   : > { %v3483_v30 = vcombine.low %v3464_v31, %v3480_v35  ;;  %v3534_v62 = vcombine.high %v12391_v46, %v12390_v49  ;;  %v3484_v48 = vcombine.high %v3464_v31, %v3480_v35  ;;  %v11091_v3 = vrot.slane %v3314_v20, %v10299_v11 }
 0x3b6   : > { %4087 = vrot.lane.b32.xlu1 %v10964_v53, %s9827_s0  ;;  %v3602_v37 = vcombine.high %v10657_v51, %v10660_v6  ;;  %v3654_v35 = vcombine.high %v10664_v40, %v10673_v42  ;;  %v3670_v20 = vcombine.high %v10687_v14, %v10690_v0  ;;  %v3722_v6 = vcombine.high %v10798_v19, %v10801_v5 }
 0x3b7   : > { %3993 = vrot.lane.b32.xlu0 %v11026_v28, %s9825_s16  ;;  %9313 = vmatmul.mubr.msk.bf16.vlgmr.msra.gmra.mrb[16].mxu0 %vm6337_vm5, %v12387_v36  ;;  %v6479_v36 = vsel %vm6337_vm5, %v6322_v63, 0  ;;  %v3548_v31 = vrot.slane %v3534_v62, %v10299_v11  ;;  %v11116_v63 = vpop.permute.xlu1 %4027  ;;  %v3790_v46 = vcombine.high %v10814_v8, %v10817_v23  ;;  %v3806_v62 = vcombine.high %v10822_v4, %v10825_v33  ;;  %v12392_v4 = vld [vmem:[#allocation44_spill] sm:$0xff] }
 0x3b8   : > { %9333 = vmatmul.mubr.msk.bf16.vlgmr.msra.gmra.mrb[16].mxu1 %vm6337_vm5, %v6302_v57  ;;  %9337 = vmatpush3.bf16.xpose.msra.mxu0 %v6476_v38  ;;  %v3532_v57 = vrot.slane %v3518_v26, %v10299_v11  ;;  %v3586_v38 = vcombine.high %v10650_v9, %v10653_v12  ;;  %v11099_v26 = vpop.permute.xlu0 %6609  ;;  %v3344_v9 = vrot.slane %v3330_v61, %v10299_v11 }
 0x3b9   : > { %9357 = vmatpush3.bf16.xpose.msra.mxu1 %v6543_v60  ;;  %9338 = vmatprep.subr.bf16.mxu0 %v12336_v2  ;;  %v3616_v51 = vrot.slane %v3602_v37, %v10299_v11  ;;  %v3668_v14 = vrot.slane %v3654_v35, %v10299_v11  ;;  %v3684_v0 = vrot.slane %v3670_v20, %v10299_v11  ;;  %v6546_v60 = vsel %vm6337_vm5, %v6330_v43, 0 }
 0x3ba   : > { %9358 = vmatprep.subr.bf16.mxu1 %v12336_v2  ;;  %9352 = vmatprep.mubr.msk.bf16.mxu0 %vm9832_vm6, %v12336_v2  ;;  %v3600_v12 = vrot.slane %v3586_v38, %v10299_v11  ;;  %v3551_v40 = vcombine.low %v3532_v57, %v3548_v31  ;;  %v3552_v42 = vcombine.high %v3532_v57, %v3548_v31 }
 0x3bb   : > { %4041 = vrot.lane.b32.xlu0 %v11026_v28, %s9826_s18  ;;  %9372 = vmatprep.mubr.msk.bf16.mxu1 %vm9832_vm6, %v12336_v2  ;;  %v3736_v19 = vrot.slane %v3722_v6, %v10299_v11  ;;  %v3687_v57 = vcombine.low %v3668_v14, %v3684_v0  ;;  %v3688_v49 = vcombine.high %v3668_v14, %v3684_v0  ;;  %v4076_v23 = vpop.permute.xlu1 %4075  ;;  %v6482_v6 = vsel %vm6337_vm5, %v11073_v1, 0 }
 0x3bc   : > { %3995 = vrot.lane.b32.xlu1 %v11040_v44, %s9825_s16  ;;  %v3619_v18 = vcombine.low %v3600_v12, %v3616_v51  ;;  %v3620_v17 = vcombine.high %v3600_v12, %v3616_v51  ;;  %v11126_v5 = vpack.c.bf16 %v3551_v40, %v3483_v30  ;;  %v11128_v61 = vpack.c.bf16 %v3552_v42, %v3484_v48  ;;  %v11136_v38 = vpop.permute.xlu0 %3979 }
 0x3bd   : > { %v3738_v43 = vcombine.high %v10806_v55, %v10809_v56  ;;  %v6331_v30 = vpack.c.bf16 %v3280_v10, %v3212_v47  ;;  %v3804_v56 = vrot.slane %v3790_v46, %v10299_v11  ;;  %v3820_v8 = vrot.slane %v3806_v62, %v10299_v11 }
 0x3be   : > { %v11143_v48 = vpack.c.bf16 %v3687_v57, %v3619_v18  ;;  %v11145_v37 = vpack.c.bf16 %v3688_v49, %v3620_v17  ;;  %v11156_v33 = vadd.f32 %v10909_v34, %v12392_v4  ;;  %v3347_v27 = vcombine.low %v11091_v3, %v3344_v9  ;;  %v12395_v17 = vld [vmem:[#allocation24_spill] sm:$0xff] }
 0x3bf   : > { %4089 = vrot.lane.b32.xlu0 %v11026_v28, %s9827_s0  ;;  %v3752_v55 = vrot.slane %v3738_v43, %v10299_v11  ;;  %v3348_v45 = vcombine.high %v11091_v3, %v3344_v9  ;;  %v3823_v10 = vcombine.low %v3804_v56, %v3820_v8  ;;  %v3824_v31 = vcombine.high %v3804_v56, %v3820_v8  ;;  %v11189_v9 = vpop.permute.xlu1 %3983  ;;  %v12397_v56 = vld [vmem:[#allocation25_spill] sm:$0xff] }
 0x3c0   : > { %9339 = vmatpush3.bf16.xpose.msra.mxu0 %v6479_v36  ;;  %4043 = vrot.lane.b32.xlu1 %v11040_v44, %s9826_s18  ;;  %v3858_v35 = vcombine.high %v10859_v24, %v10862_v22  ;;  %v3874_v20 = vcombine.high %v10865_v41, %v10869_v29  ;;  %v3926_v12 = vcombine.high %v10874_v54, %v10877_v58  ;;  %v6549_v3 = vsel %vm6337_vm5, %v6331_v30, 0  ;;  %v4074_v41 = vpop.permute.xlu0 %4073  ;;  %v12396_v30 = vld [vmem:[#allocation57_spill] sm:$0xff] }
 0x3c1   : > { %9359 = vmatpush3.bf16.xpose.msra.mxu1 %v6546_v60  ;;  %9340 = vmatprep.subr.bf16.mxu0 %v12336_v2  ;;  %v3755_v47 = vcombine.low %v3736_v19, %v3752_v55  ;;  %v3756_v36 = vcombine.high %v3736_v19, %v3752_v55  ;;  %v3942_v51 = vcombine.high %v10895_v7, %v10898_v59 }
 0x3c2   : > { %9360 = vmatprep.subr.bf16.mxu1 %v12336_v2  ;;  %v3872_v29 = vrot.slane %v3858_v35, %v10299_v11  ;;  %v3888_v54 = vrot.slane %v3874_v20, %v10299_v11  ;;  %v3940_v58 = vrot.slane %v3926_v12, %v10299_v11  ;;  %v6324_v59 = vpack.c.bf16 %v3415_v50, %v3347_v27  ;;  %v12393_v50 = vld [vmem:[#allocation55_spill] sm:$0xff] }
 0x3c3   : > { %3997 = vrot.lane.b32.xlu0 %v11022_v52, %s9825_s16  ;;  %v11175_v24 = vpack.c.bf16 %v3823_v10, %v3755_v47  ;;  %v11177_v22 = vpack.c.bf16 %v3824_v31, %v3756_v36  ;;  %v3956_v7 = vrot.slane %v3942_v51, %v10299_v11  ;;  %v6332_v1 = vpack.c.bf16 %v3416_v32, %v3348_v45  ;;  %v4032_v47 = vpop.permute.xlu1 %4031 }
 0x3c4   : > { %4091 = vrot.lane.b32.xlu1 %v11040_v44, %s9827_s0  ;;  %v3891_v40 = vcombine.low %v3872_v29, %v3888_v54  ;;  %v3892_v14 = vcombine.high %v3872_v29, %v3888_v54  ;;  %v11199_v0 = vadd.f32 %v10909_v34, %v12393_v50  ;;  %v4121_v32 = vcombine.low %v12394_v13, %v11065_v25  ;;  %v11215_v62 = vpop.permute.xlu0 %3981 }
 0x3c5   : > { %v3959_v42 = vcombine.low %v3940_v58, %v3956_v7  ;;  %v3960_v21 = vcombine.high %v3940_v58, %v3956_v7  ;;  %v4122_v18 = vcombine.high %v12394_v13, %v11065_v25  ;;  %v4189_v19 = vcombine.low %v12395_v17, %v11116_v63 }
 0x3c6   : > { %v6485_v57 = vsel %vm6337_vm5, %v6324_v59, 0  ;;  %v4190_v43 = vcombine.high %v12395_v17, %v11116_v63  ;;  %v4205_v46 = vcombine.low %v11136_v38, %v4076_v23  ;;  %v11219_v55 = vadd.f32 %v10909_v34, %v12396_v30 }
 0x3c7   : > { %4045 = vrot.lane.b32.xlu0 %v11022_v52, %s9826_s18  ;;  %v11203_v60 = vpack.c.bf16 %v3959_v42, %v3891_v40  ;;  %v11210_v49 = vpack.c.bf16 %v3960_v21, %v3892_v14  ;;  %v4129_v25 = vrot.slane %v4121_v32, %v12397_v56  ;;  %v4197_v8 = vrot.slane %v4189_v19, %v12397_v56 }
 0x3c8   : > { %9341 = vmatpush3.bf16.xpose.msra.mxu0 %v6482_v6  ;;  %3999 = vrot.lane.b32.xlu1 %v11156_v33, %s9825_s16  ;;  %v4206_v4 = vcombine.high %v11136_v38, %v4076_v23  ;;  %v6552_v27 = vsel %vm6337_vm5, %v6332_v1, 0  ;;  %v4204_v63 = vrot.slane %v4190_v43, %v12397_v56  ;;  %v4213_v45 = vrot.slane %v4205_v46, %v12397_v56  ;;  %v12398_v23 = vld [vmem:[#allocation26_spill] sm:$0xff]  ;;  %v4030_v54 = vpop.permute.xlu0 %4029 }
 0x3c9   : > { %9361 = vmatpush3.bf16.xpose.msra.mxu1 %v6549_v3  ;;  %9342 = vmatprep.subr.bf16.mxu0 %v12336_v2  ;;  %v4137_v34 = vcombine.low %v11014_v15, %v4074_v41  ;;  %v4136_v10 = vrot.slane %v4122_v18, %v12397_v56  ;;  %v4138_v38 = vcombine.high %v11014_v15, %v4074_v41  ;;  %v6488_v32 = vsel %vm6337_vm5, %v11126_v5, 0  ;;  %v4080_v5 = vpop.permute.xlu1 %4079 }
 0x3ca   : > { %9362 = vmatprep.subr.bf16.mxu1 %v12336_v2  ;;  %v4220_v36 = vrot.slane %v4206_v4, %v12397_v56  ;;  %v4325_v31 = vcombine.low %v12398_v23, %v4032_v47  ;;  %v4221_v35 = vcombine.low %v4197_v8, %v4213_v45  ;;  %v4222_v20 = vcombine.high %v4197_v8, %v4213_v45 }
 0x3cb   : > { %4093 = vrot.lane.b32.xlu0 %v11022_v52, %s9827_s0  ;;  %v4145_v12 = vrot.slane %v4137_v34, %v12397_v56  ;;  %v4152_v3 = vrot.slane %v4138_v38, %v12397_v56  ;;  %v4326_v17 = vcombine.high %v12398_v23, %v4032_v47  ;;  %v6555_v19 = vsel %vm6337_vm5, %v11128_v61, 0  ;;  %v12399_v34 = vld [vmem:[#allocation27_spill] sm:$0xff] }
 0x3cc   : > { %4047 = vrot.lane.b32.xlu1 %v11156_v33, %s9826_s18  ;;  %v4237_v51 = vcombine.low %v4204_v63, %v4220_v36  ;;  %v4238_v6 = vcombine.high %v4204_v63, %v4220_v36  ;;  %v4229_v15 = vrot.slane %v4221_v35, %v10299_v11  ;;  %v4236_v41 = vrot.slane %v4222_v20, %v10299_v11  ;;  %v4078_v4 = vpop.permute.xlu0 %4077 }
 0x3cd   : > { %v4153_v29 = vcombine.low %v4129_v25, %v4145_v12  ;;  %v4154_v59 = vcombine.high %v4129_v25, %v4145_v12  ;;  %v4169_v1 = vcombine.low %v4136_v10, %v4152_v3  ;;  %v4170_v50 = vcombine.high %v4136_v10, %v4152_v3 }
 0x3ce   : > { %v11247_v58 = vrot.slane %v4237_v51, %v10299_v11  ;;  %v11250_v7 = vrot.slane %v4238_v6, %v10299_v11  ;;  %v5277_v40 = vcombine.low %v4229_v15, %v4236_v41  ;;  %v8981_v42 = vcombine.high %v4229_v15, %v4236_v41 }
 0x3cf   : > { %4001 = vrot.lane.b32.xlu0 %v11199_v0, %s9825_s16  ;;  %v4161_v14 = vrot.slane %v4153_v29, %v10299_v11  ;;  %v4168_v21 = vrot.slane %v4154_v59, %v10299_v11  ;;  %v4177_v13 = vrot.slane %v4169_v1, %v10299_v11  ;;  %v4184_v18 = vrot.slane %v4170_v50, %v10299_v11 }
 0x3d0   : > { %9343 = vmatpush3.bf16.xpose.msra.mxu0 %v6485_v57  ;;  %4095 = vrot.lane.b32.xlu1 %v11156_v33, %s9827_s0  ;;  %v11264_v57 = vrot.slane %v5277_v40, %v12397_v56  ;;  %v5293_v43 = vcombine.low %v11247_v58, %v11250_v7  ;;  %v8982_v46 = vcombine.high %v11247_v58, %v11250_v7  ;;  %v6491_v30 = vsel %vm6337_vm5, %v11143_v48, 0 }
 0x3d1   : > { %9363 = vmatpush3.bf16.xpose.msra.mxu1 %v6552_v27  ;;  %9344 = vmatprep.subr.bf16.mxu0 %v12336_v2  ;;  %v11273_v25 = vrot.slane %v8981_v42, %v12397_v56  ;;  %v5209_v8 = vcombine.low %v4161_v14, %v4168_v21  ;;  %v4333_v61 = vrot.slane %v4325_v31, %v12397_v56  ;;  %v6558_v27 = vsel %vm6337_vm5, %v11145_v37, 0 }
 0x3d2   : > { %9364 = vmatprep.subr.bf16.mxu1 %v12336_v2  ;;  %v8979_v63 = vcombine.high %v4161_v14, %v4168_v21  ;;  %v5225_v45 = vcombine.low %v4177_v13, %v4184_v18  ;;  %v4257_v47 = vcombine.low %v12399_v34, %v4030_v54  ;;  %v8980_v48 = vcombine.high %v4177_v13, %v4184_v18 }
 0x3d3   : > { %4049 = vrot.lane.b32.xlu0 %v11199_v0, %s9826_s18  ;;  %v4340_v10 = vrot.slane %v4326_v17, %v12397_v56  ;;  %v4258_v36 = vcombine.high %v12399_v34, %v4030_v54  ;;  %v4341_v38 = vcombine.low %v11189_v9, %v4080_v5  ;;  %v4342_v31 = vcombine.high %v11189_v9, %v4080_v5 }
 0x3d4   : > { %4003 = vrot.lane.b32.xlu1 %v11219_v55, %s9825_s16  ;;  %v4265_v23 = vrot.slane %v4257_v47, %v12397_v56  ;;  %v4273_v37 = vcombine.low %v11215_v62, %v4078_v4  ;;  %v4274_v35 = vcombine.high %v11215_v62, %v4078_v4  ;;  %v11291_v20 = vrot.slane %v5293_v43, %v12397_v56 }
 0x3d5   : > { %v11294_v12 = vrot.slane %v5209_v8, %v12397_v56  ;;  %v4272_v51 = vrot.slane %v4258_v36, %v12397_v56  ;;  %v4349_v6 = vrot.slane %v4341_v38, %v12397_v56  ;;  %v11299_v3 = vrot.slane %v8979_v63, %v12397_v56 }
 0x3d6   : > { %v4356_v15 = vrot.slane %v4342_v31, %v12397_v56  ;;  %v4281_v9 = vrot.slane %v4273_v37, %v12397_v56  ;;  %v4288_v41 = vrot.slane %v4274_v35, %v12397_v56  ;;  %v11305_v62 = vrot.slane %v5225_v45, %v12397_v56 }
 0x3d7   : > { %v11308_v29 = vrot.slane %v8980_v48, %v12397_v56  ;;  %v4357_v54 = vcombine.low %v4333_v61, %v4349_v6  ;;  %v4358_v58 = vcombine.high %v4333_v61, %v4349_v6  ;;  %v11319_v5 = vrot.slane %v8982_v46, %v12397_v56 }
 0x3d8   : > { %9345 = vmatpush3.bf16.xpose.msra.mxu0 %v6488_v32  ;;  %4051 = vrot.lane.b32.xlu1 %v11219_v55, %s9826_s18  ;;  %v4373_v7 = vcombine.low %v4340_v10, %v4356_v15  ;;  %v4374_v59 = vcombine.high %v4340_v10, %v4356_v15  ;;  %v4289_v1 = vcombine.low %v4265_v23, %v4281_v9  ;;  %v6494_v4 = vsel %vm6337_vm5, %v11175_v24, 0 }
 0x3d9   : > { %9365 = vmatpush3.bf16.xpose.msra.mxu1 %v6555_v19  ;;  %9346 = vmatprep.subr.bf16.mxu0 %v12336_v2  ;;  %v4290_v40 = vcombine.high %v4265_v23, %v4281_v9  ;;  %v4365_v42 = vrot.slane %v4357_v54, %v10299_v11  ;;  %v4372_v14 = vrot.slane %v4358_v58, %v10299_v11 }
 0x3da   : > { %9366 = vmatprep.subr.bf16.mxu1 %v12336_v2  ;;  %v4305_v50 = vcombine.low %v4272_v51, %v4288_v41  ;;  %v4381_v21 = vrot.slane %v4373_v7, %v10299_v11  ;;  %v4388_v13 = vrot.slane %v4374_v59, %v10299_v11  ;;  %v4297_v32 = vrot.slane %v4289_v1, %v10299_v11 }
 0x3db   : > { %v5413_v18 = vcombine.low %v4365_v42, %v4372_v14  ;;  %v8985_v17 = vcombine.high %v4365_v42, %v4372_v14  ;;  %v4304_v19 = vrot.slane %v4290_v40, %v10299_v11  ;;  %v4306_v43 = vcombine.high %v4272_v51, %v4288_v41 }
 0x3dc   : > { %v8986_v8 = vcombine.high %v4381_v21, %v4388_v13  ;;  %v4313_v61 = vrot.slane %v4305_v50, %v10299_v11  ;;  %v5241_v47 = vcombine.low %v11294_v12, %v11299_v3  ;;  %v5257_v46 = vcombine.low %v11305_v62, %v11308_v29 }
 0x3dd   : > { %v4320_v63 = vrot.slane %v4306_v43, %v10299_v11  ;;  %v5345_v45 = vcombine.low %v4297_v32, %v4304_v19  ;;  %v8983_v34 = vcombine.high %v4297_v32, %v4304_v19  ;;  %v5309_v48 = vcombine.low %v11264_v57, %v11273_v25 }
 0x3de   : > { %v11334_v10 = vrot.slane %v5413_v18, %v12397_v56  ;;  %v11337_v24 = vrot.slane %v8985_v17, %v12397_v56  ;;  %v11343_v23 = vrot.slane %v8986_v8, %v12397_v56  ;;  %v5325_v37 = vcombine.low %v11291_v20, %v11319_v5  ;;  %v6299_v18 = vld [vmem:[#allocation2 + $0x10] sm:$0xff]  ;;  %v6300_v17 = vld [vmem:[#allocation2 + $0x18] sm:$0xff] }
 0x3df   : > { %v8984_v36 = vcombine.high %v4313_v61, %v4320_v63  ;;  %v11346_v31 = vrot.slane %v5345_v45, %v12397_v56  ;;  %v11351_v35 = vrot.slane %v8983_v34, %v12397_v56  ;;  %v5249_v15 = vrot.slane %v5241_v47, %v10299_v11 }
 0x3e0   : > { %9347 = vmatpush3.bf16.xpose.msra.mxu0 %v6491_v30  ;;  %v5429_v30 = vcombine.low %v4381_v21, %v4388_v13  ;;  %v5265_v9 = vrot.slane %v5257_v46, %v10299_v11  ;;  %v5317_v41 = vrot.slane %v5309_v48, %v10299_v11  ;;  %v5333_v54 = vrot.slane %v5325_v37, %v10299_v11 }
 0x3e1   : > { %9367 = vmatpush3.bf16.xpose.msra.mxu1 %v6558_v27  ;;  %9348 = vmatprep.subr.bf16.mxu0 %v12336_v2  ;;  %v6561_v27 = vsel %vm6337_vm5, %v11177_v22, 0  ;;  %v5361_v22 = vcombine.low %v4313_v61, %v4320_v63  ;;  %v11357_v6 = vrot.slane %v8984_v36, %v12397_v56  ;;  %v5445_v58 = vcombine.low %v11334_v10, %v11337_v24 }
 0x3e2   : > { %9368 = vmatprep.subr.bf16.mxu1 %v12336_v2  ;;  %v11340_v38 = vrot.slane %v5429_v30, %v12397_v56  ;;  %v5377_v59 = vcombine.low %v11346_v31, %v11351_v35  ;;  %v6497_v40 = vsel %vm6337_vm5, %v11203_v60, 0  ;;  %v6564_v42 = vsel %vm6337_vm5, %v11210_v49, 0 }
 0x3e3   : > { %v11354_v51 = vrot.slane %v5361_v22, %v12397_v56  ;;  %v5273_v14 = vcombine.low %v5249_v15, %v5265_v9  ;;  %v5341_v50 = vcombine.low %v5317_v41, %v5333_v54  ;;  %v5274_v21 = vcombine.high %v5249_v15, %v5265_v9 }
 0x3e4   : > { %v5461_v7 = vcombine.low %v11340_v38, %v11343_v23  ;;  %v5453_v13 = vrot.slane %v5445_v58, %v10299_v11  ;;  %v5342_v19 = vcombine.high %v5317_v41, %v5333_v54  ;;  %v5385_v43 = vrot.slane %v5377_v59, %v10299_v11 }
 0x3e5   : > { %v5393_v1 = vcombine.low %v11354_v51, %v11357_v6  ;;  %v6303_v60 = vpack.c.bf16 %v6299_v18, %v6299_v18  ;;  %v6304_v49 = vpack.c.bf16 %v6300_v17, %v6300_v17  ;;  %v5242_v46 = vcombine.high %v11294_v12, %v11299_v3 }
 0x3e6   : > { %v5469_v32 = vrot.slane %v5461_v7, %v10299_v11  ;;  %v5258_v48 = vcombine.high %v11305_v62, %v11308_v29  ;;  %v5310_v22 = vcombine.high %v11264_v57, %v11273_v25  ;;  %v5326_v36 = vcombine.high %v11291_v20, %v11319_v5 }
 0x3e7   : > { %v5401_v30 = vrot.slane %v5393_v1, %v10299_v11  ;;  %v5378_v37 = vcombine.high %v11346_v31, %v11351_v35  ;;  %v5394_v15 = vcombine.high %v11354_v51, %v11357_v6  ;;  %v5446_v9 = vcombine.high %v11334_v10, %v11337_v24 }
 0x3e8   : > { %9349 = vmatpush3.bf16.xpose.msra.mxu0 %v6494_v4  ;;  %v5477_v8 = vcombine.low %v5453_v13, %v5469_v32  ;;  %v5478_v61 = vcombine.high %v5453_v13, %v5469_v32  ;;  %v6739_v4 = vpack.c.bf16 %v5341_v50, %v5273_v14  ;;  %v5462_v12 = vcombine.high %v11340_v38, %v11343_v23 }
 0x3e9   : > { %9369 = vmatpush3.bf16.xpose.msra.mxu1 %v6561_v27  ;;  %9350 = vmatprep.subr.bf16.mxu0 %v12336_v2  ;;  %v6747_v27 = vpack.c.bf16 %v5342_v19, %v5274_v21  ;;  %v5409_v63 = vcombine.low %v5385_v43, %v5401_v30  ;;  %v5410_v45 = vcombine.high %v5385_v43, %v5401_v30 }
 0x3ea   : > { %9370 = vmatprep.subr.bf16.mxu1 %v12336_v2  ;;  %v5256_v3 = vrot.slane %v5242_v46, %v10299_v11  ;;  %v5272_v62 = vrot.slane %v5258_v48, %v10299_v11  ;;  %v5324_v57 = vrot.slane %v5310_v22, %v10299_v11  ;;  %v5340_v25 = vrot.slane %v5326_v36, %v10299_v11 }
 0x3eb   : > { %v6740_v34 = vpack.c.bf16 %v5477_v8, %v5409_v63  ;;  %v6748_v47 = vpack.c.bf16 %v5478_v61, %v5410_v45  ;;  %v5392_v20 = vrot.slane %v5378_v37, %v10299_v11  ;;  %v5408_v29 = vrot.slane %v5394_v15, %v10299_v11 }
 0x3ec   : > { %v5460_v5 = vrot.slane %v5446_v9, %v10299_v11  ;;  %v5476_v31 = vrot.slane %v5462_v12, %v10299_v11  ;;  %v5275_v10 = vcombine.low %v5256_v3, %v5272_v62  ;;  %v5343_v24 = vcombine.low %v5324_v57, %v5340_v25 }
 0x3ed   : > { %v5276_v35 = vcombine.high %v5256_v3, %v5272_v62  ;;  %v5344_v38 = vcombine.high %v5324_v57, %v5340_v25  ;;  %v5411_v23 = vcombine.low %v5392_v20, %v5408_v29  ;;  %v5412_v6 = vcombine.high %v5392_v20, %v5408_v29 }
 0x3ee   : > { %v5479_v51 = vcombine.low %v5460_v5, %v5476_v31  ;;  %v5480_v41 = vcombine.high %v5460_v5, %v5476_v31  ;;  %v11417_v54 = vpack.c.bf16 %v5343_v24, %v5275_v10 }
 0x3ef   : > { %v11419_v58 = vpack.c.bf16 %v5344_v38, %v5276_v35 }
 0x3f0   : > { %9351 = vmatpush3.bf16.xpose.msra.mxu0 %v6497_v40  ;;  %v11421_v7 = vpack.c.bf16 %v5479_v51, %v5411_v23  ;;  %v11423_v59 = vpack.c.bf16 %v5480_v41, %v5412_v6 }
 0x3f1   : > { %9371 = vmatpush3.bf16.xpose.msra.mxu1 %v6564_v42  ;;  %9376 = vmatprep.subr.bf16.mxu0 %v12336_v2  ;;  %v12400_v42 = vld [vmem:[#allocation64_spill] sm:$0xff] }
 0x3f2   : > { %9396 = vmatprep.subr.bf16.mxu1 %v12336_v2 }
 0x3f7   : > { %9353 = vmatmul.mubr.msk.bf16.vlgmr.msra.gmra.mrb[20].mxu0 %vm6337_vm5, %v6303_v60 }
 0x3f8   : > { %9373 = vmatmul.mubr.msk.bf16.vlgmr.msra.gmra.mrb[20].mxu1 %vm6337_vm5, %v6304_v49  ;;  %9377 = vmatpush3.bf16.msra.mxu0 %v6739_v4 }
 0x3f9   : > { %9397 = vmatpush3.bf16.msra.mxu1 %v6747_v27  ;;  %9378 = vmatprep.subr.bf16.mxu0 %v12336_v2 }
 0x3fa   : > { %9398 = vmatprep.subr.bf16.mxu1 %v12336_v2  ;;  %9392 = vmatprep.mubr.msk.bf16.mxu0 %vm9832_vm6, %v12336_v2 }
 0x3fb   : > { %9412 = vmatprep.mubr.msk.bf16.mxu1 %vm9832_vm6, %v12336_v2 }
 0x3fc   : > { %9379 = vmatpush3.bf16.msra.mxu0 %v6740_v34 }
 0x3fd   : > { %9399 = vmatpush3.bf16.msra.mxu1 %v6748_v47  ;;  %9380 = vmatprep.subr.bf16.mxu0 %v12336_v2 }
 0x3fe   : > { %9400 = vmatprep.subr.bf16.mxu1 %v12336_v2 }
 0x411   : > { %v3986_v1 = vpop.permute.xlu0 %3985 }
 0x414   : > { %v3988_v50 = vpop.permute.xlu1 %3987 }
 0x415   : > { %v4034_v40 = vpop.permute.xlu0 %4033 }
 0x416   : > { %v4393_v14 = vcombine.low %v12400_v42, %v4034_v40  ;;  %v4394_v21 = vcombine.high %v12400_v42, %v4034_v40 }
 0x418   : > { %v4401_v32 = vrot.slane %v4393_v14, %v12397_v56  ;;  %v4408_v19 = vrot.slane %v4394_v21, %v12397_v56  ;;  %v4036_v60 = vpop.permute.xlu1 %4035 }
 0x419   : > { %v4082_v13 = vpop.permute.xlu0 %4081  ;;  %v4461_v8 = vcombine.low %v10936_v16, %v4036_v60  ;;  %v4462_v61 = vcombine.high %v10936_v16, %v4036_v60 }
 0x41a   : > { %v4409_v18 = vcombine.low %v3986_v1, %v4082_v13  ;;  %v4410_v17 = vcombine.high %v3986_v1, %v4082_v13 }
 0x41b   : > { %v4469_v46 = vrot.slane %v4461_v8, %v12397_v56  ;;  %v4476_v48 = vrot.slane %v4462_v61, %v12397_v56 }
 0x41c   : > { %v4417_v43 = vrot.slane %v4409_v18, %v12397_v56  ;;  %v4424_v30 = vrot.slane %v4410_v17, %v12397_v56  ;;  %v4084_v22 = vpop.permute.xlu1 %4083 }
 0x41d   : > { %v3990_v49 = vpop.permute.xlu0 %3989  ;;  %v4477_v9 = vcombine.low %v3988_v50, %v4084_v22  ;;  %v4478_v16 = vcombine.high %v3988_v50, %v4084_v22 }
 0x41e   : > { %v4425_v4 = vcombine.low %v4401_v32, %v4417_v43  ;;  %v4426_v27 = vcombine.high %v4401_v32, %v4417_v43  ;;  %v4441_v63 = vcombine.low %v4408_v19, %v4424_v30  ;;  %v4442_v45 = vcombine.high %v4408_v19, %v4424_v30 }
 0x41f   : > { %v4485_v29 = vrot.slane %v4477_v9, %v12397_v56  ;;  %v4492_v5 = vrot.slane %v4478_v16, %v12397_v56 }
 0x420   : > { %v4433_v34 = vrot.slane %v4425_v4, %v10299_v11  ;;  %v4440_v47 = vrot.slane %v4426_v27, %v10299_v11  ;;  %v4449_v36 = vrot.slane %v4441_v63, %v10299_v11  ;;  %v4456_v37 = vrot.slane %v4442_v45, %v10299_v11  ;;  %v3992_v38 = vpop.permute.xlu1 %3991 }
 0x421   : > { %v4038_v15 = vpop.permute.xlu0 %4037  ;;  %v4493_v6 = vcombine.low %v4469_v46, %v4485_v29  ;;  %v4494_v41 = vcombine.high %v4469_v46, %v4485_v29  ;;  %v4509_v1 = vcombine.low %v4476_v48, %v4492_v5  ;;  %v4510_v40 = vcombine.high %v4476_v48, %v4492_v5 }
 0x422   : > { %v5481_v12 = vcombine.low %v4433_v34, %v4440_v47  ;;  %v8987_v3 = vcombine.high %v4433_v34, %v4440_v47  ;;  %v5497_v62 = vcombine.low %v4449_v36, %v4456_v37  ;;  %v8988_v57 = vcombine.high %v4449_v36, %v4456_v37 }
 0x423   : > { %v4529_v25 = vcombine.low %v10952_v39, %v4038_v15  ;;  %v4530_v20 = vcombine.high %v10952_v39, %v4038_v15  ;;  %v4501_v13 = vrot.slane %v4493_v6, %v10299_v11  ;;  %v4508_v32 = vrot.slane %v4494_v41, %v10299_v11 }
 0x424   : > { %v11444_v31 = vrot.slane %v5481_v12, %v12397_v56  ;;  %v11447_v10 = vrot.slane %v8987_v3, %v12397_v56  ;;  %v11450_v24 = vrot.slane %v5497_v62, %v12397_v56  ;;  %v11453_v35 = vrot.slane %v8988_v57, %v12397_v56  ;;  %v4040_v19 = vpop.permute.xlu1 %4039 }
 0x425   : > { %v4537_v23 = vrot.slane %v4529_v25, %v12397_v56  ;;  %v4544_v39 = vrot.slane %v4530_v20, %v12397_v56  ;;  %v4086_v51 = vpop.permute.xlu0 %4085  ;;  %v4517_v18 = vrot.slane %v4509_v1, %v10299_v11  ;;  %v4524_v17 = vrot.slane %v4510_v40, %v10299_v11 }
 0x426   : > { %v4545_v42 = vcombine.low %v3990_v49, %v4086_v51  ;;  %v4546_v14 = vcombine.high %v3990_v49, %v4086_v51  ;;  %v5513_v50 = vcombine.low %v11444_v31, %v11447_v10  ;;  %v5529_v21 = vcombine.low %v11450_v24, %v11453_v35 }
 0x427   : > { %v5549_v61 = vcombine.low %v4501_v13, %v4508_v32  ;;  %v8989_v4 = vcombine.high %v4501_v13, %v4508_v32  ;;  %v5565_v27 = vcombine.low %v4517_v18, %v4524_v17  ;;  %v8990_v63 = vcombine.high %v4517_v18, %v4524_v17 }
 0x428   : > { %v4553_v43 = vrot.slane %v4545_v42, %v12397_v56  ;;  %v4560_v30 = vrot.slane %v4546_v14, %v12397_v56  ;;  %v11468_v49 = vrot.slane %v5513_v50, %v10299_v11  ;;  %v11471_v8 = vrot.slane %v5529_v21, %v10299_v11  ;;  %v4088_v16 = vpop.permute.xlu1 %4087 }
 0x429   : > { %v3994_v60 = vpop.permute.xlu0 %3993  ;;  %v4597_v45 = vcombine.low %v10964_v53, %v4040_v19  ;;  %v4598_v34 = vcombine.high %v10964_v53, %v4040_v19  ;;  %v11476_v48 = vrot.slane %v5549_v61, %v12397_v56  ;;  %v11479_v22 = vrot.slane %v8989_v4, %v12397_v56 }
 0x42a   : > { %v4561_v47 = vcombine.low %v4537_v23, %v4553_v43  ;;  %v4562_v46 = vcombine.high %v4537_v23, %v4553_v43  ;;  %v11482_v36 = vrot.slane %v5565_v27, %v12397_v56  ;;  %v11485_v37 = vrot.slane %v8990_v63, %v12397_v56 }
 0x42b   : > { %v4605_v15 = vrot.slane %v4597_v45, %v12397_v56  ;;  %v4612_v9 = vrot.slane %v4598_v34, %v12397_v56  ;;  %v4613_v62 = vcombine.low %v3992_v38, %v4088_v16  ;;  %v4614_v57 = vcombine.high %v3992_v38, %v4088_v16 }
 0x42c   : > { %v4569_v53 = vrot.slane %v4561_v47, %v10299_v11  ;;  %v4576_v12 = vrot.slane %v4562_v46, %v10299_v11  ;;  %v4577_v25 = vcombine.low %v4544_v39, %v4560_v30  ;;  %v4578_v20 = vcombine.high %v4544_v39, %v4560_v30 }
 0x42d   : > { %v4042_v3 = vpop.permute.xlu0 %4041  ;;  %v4621_v6 = vrot.slane %v4613_v62, %v12397_v56  ;;  %v4628_v41 = vrot.slane %v4614_v57, %v12397_v56 }
 0x42e   : > { %v5617_v29 = vcombine.low %v4569_v53, %v4576_v12  ;;  %v8991_v5 = vcombine.high %v4569_v53, %v4576_v12  ;;  %v4665_v23 = vcombine.low %v11026_v28, %v4042_v3  ;;  %v4666_v51 = vcombine.high %v11026_v28, %v4042_v3  ;;  %v3996_v39 = vpop.permute.xlu1 %3995 }
 0x42f   : > { %v4585_v1 = vrot.slane %v4577_v25, %v10299_v11  ;;  %v4592_v40 = vrot.slane %v4578_v20, %v10299_v11  ;;  %v4629_v28 = vcombine.low %v4605_v15, %v4621_v6  ;;  %v4630_v21 = vcombine.high %v4605_v15, %v4621_v6 }
 0x430   : > { %v11498_v42 = vrot.slane %v5617_v29, %v12397_v56  ;;  %v11501_v38 = vrot.slane %v8991_v5, %v12397_v56  ;;  %v4673_v14 = vrot.slane %v4665_v23, %v12397_v56  ;;  %v4680_v50 = vrot.slane %v4666_v51, %v12397_v56 }
 0x431   : > { %v4645_v13 = vcombine.low %v4612_v9, %v4628_v41  ;;  %v4646_v32 = vcombine.high %v4612_v9, %v4628_v41  ;;  %v4090_v18 = vpop.permute.xlu0 %4089  ;;  %v5633_v17 = vcombine.low %v4585_v1, %v4592_v40  ;;  %v8992_v19 = vcombine.high %v4585_v1, %v4592_v40 }
 0x432   : > { %v4681_v43 = vcombine.low %v3994_v60, %v4090_v18  ;;  %v4682_v30 = vcombine.high %v3994_v60, %v4090_v18  ;;  %v4637_v61 = vrot.slane %v4629_v28, %v10299_v11  ;;  %v4644_v4 = vrot.slane %v4630_v21, %v10299_v11  ;;  %v4044_v47 = vpop.permute.xlu1 %4043 }
 0x433   : > { %v4653_v27 = vrot.slane %v4645_v13, %v10299_v11  ;;  %v4660_v63 = vrot.slane %v4646_v32, %v10299_v11  ;;  %v11510_v45 = vrot.slane %v5633_v17, %v12397_v56  ;;  %v11513_v34 = vrot.slane %v8992_v19, %v12397_v56 }
 0x434   : > { %v4689_v46 = vrot.slane %v4681_v43, %v12397_v56  ;;  %v4696_v15 = vrot.slane %v4682_v30, %v12397_v56  ;;  %v5685_v60 = vcombine.low %v4637_v61, %v4644_v4  ;;  %v8993_v9 = vcombine.high %v4637_v61, %v4644_v4 }
 0x435   : > { %v5701_v16 = vcombine.low %v4653_v27, %v4660_v63  ;;  %v8994_v53 = vcombine.high %v4653_v27, %v4660_v63  ;;  %v4733_v12 = vcombine.low %v11040_v44, %v4044_v47  ;;  %v4734_v3 = vcombine.high %v11040_v44, %v4044_v47  ;;  %v11535_v21 = vpop.permute.xlu0 %3997 }
 0x436   : > { %v4697_v62 = vcombine.low %v4673_v14, %v4689_v46  ;;  %v4698_v57 = vcombine.high %v4673_v14, %v4689_v46  ;;  %v11520_v25 = vrot.slane %v5685_v60, %v12397_v56  ;;  %v11523_v20 = vrot.slane %v8993_v9, %v12397_v56  ;;  %v4092_v6 = vpop.permute.xlu1 %4091 }
 0x437   : > { %v11526_v29 = vrot.slane %v5701_v16, %v12397_v56  ;;  %v11529_v5 = vrot.slane %v8994_v53, %v12397_v56  ;;  %v4741_v23 = vrot.slane %v4733_v12, %v12397_v56  ;;  %v4748_v51 = vrot.slane %v4734_v3, %v12397_v56 }
 0x438   : > { %v4705_v44 = vrot.slane %v4697_v62, %v10299_v11  ;;  %v4712_v41 = vrot.slane %v4698_v57, %v10299_v11  ;;  %v4749_v1 = vcombine.low %v3996_v39, %v4092_v6  ;;  %v4750_v40 = vcombine.high %v3996_v39, %v4092_v6 }
 0x439   : > { %v4713_v14 = vcombine.low %v4680_v50, %v4696_v15  ;;  %v4714_v28 = vcombine.high %v4680_v50, %v4696_v15  ;;  %v5545_v18 = vcombine.low %v11468_v49, %v11471_v8  ;;  %v5581_v17 = vcombine.low %v11476_v48, %v11479_v22 }
 0x43a   : > { %v5753_v13 = vcombine.low %v4705_v44, %v4712_v41  ;;  %v8995_v32 = vcombine.high %v4705_v44, %v4712_v41  ;;  %v4757_v19 = vrot.slane %v4749_v1, %v12397_v56  ;;  %v4764_v43 = vrot.slane %v4750_v40, %v12397_v56  ;;  %v4000_v4 = vpop.permute.xlu1 %3999  ;;  %v4046_v44 = vpop.permute.xlu0 %4045 }
 0x43b   : > { %v4721_v30 = vrot.slane %v4713_v14, %v10299_v11  ;;  %v4728_v39 = vrot.slane %v4714_v28, %v10299_v11  ;;  %v5589_v27 = vrot.slane %v5581_v17, %v10299_v11  ;;  %v5597_v63 = vcombine.low %v11482_v36, %v11485_v37 }
 0x43c   : > { %v11546_v50 = vrot.slane %v5753_v13, %v12397_v56  ;;  %v11549_v61 = vrot.slane %v8995_v32, %v12397_v56  ;;  %v4765_v47 = vcombine.low %v4741_v23, %v4757_v19  ;;  %v4766_v46 = vcombine.high %v4741_v23, %v4757_v19 }
 0x43d   : > { %v4781_v15 = vcombine.low %v4748_v51, %v4764_v43  ;;  %v4782_v60 = vcombine.high %v4748_v51, %v4764_v43  ;;  %v5769_v9 = vcombine.low %v4721_v30, %v4728_v39  ;;  %v8996_v16 = vcombine.high %v4721_v30, %v4728_v39 }
 0x43e   : > { %v5605_v53 = vrot.slane %v5597_v63, %v10299_v11  ;;  %v5546_v12 = vcombine.high %v11468_v49, %v11471_v8  ;;  %v4773_v3 = vrot.slane %v4765_v47, %v10299_v11  ;;  %v4780_v62 = vrot.slane %v4766_v46, %v10299_v11  ;;  %v4048_v40 = vpop.permute.xlu1 %4047 }
 0x43f   : > { %v4789_v57 = vrot.slane %v4781_v15, %v10299_v11  ;;  %v4796_v6 = vrot.slane %v4782_v60, %v10299_v11  ;;  %v11562_v23 = vrot.slane %v5769_v9, %v12397_v56  ;;  %v11565_v51 = vrot.slane %v8996_v16, %v12397_v56  ;;  %v4094_v9 = vpop.permute.xlu0 %4093 }
 0x440   : > { %v5613_v41 = vcombine.low %v5589_v27, %v5605_v53  ;;  %v5614_v1 = vcombine.high %v5589_v27, %v5605_v53  ;;  %v5821_v14 = vcombine.low %v4773_v3, %v4780_v62  ;;  %v8997_v49 = vcombine.high %v4773_v3, %v4780_v62 }
 0x441   : > { %v5837_v8 = vcombine.low %v4789_v57, %v4796_v6  ;;  %v8998_v28 = vcombine.high %v4789_v57, %v4796_v6  ;;  %v4869_v17 = vcombine.low %v11156_v33, %v4048_v40  ;;  %v4870_v19 = vcombine.high %v11156_v33, %v4048_v40 }
 0x442   : > { %v6741_v13 = vpack.c.bf16 %v5613_v41, %v5545_v18  ;;  %v6749_v32 = vpack.c.bf16 %v5614_v1, %v5546_v12  ;;  %v11570_v43 = vrot.slane %v5821_v14, %v12397_v56  ;;  %v11573_v30 = vrot.slane %v8997_v49, %v12397_v56  ;;  %v4096_v47 = vpop.permute.xlu1 %4095 }
 0x443   : > { %v11576_v39 = vrot.slane %v5837_v8, %v12397_v56  ;;  %v11579_v27 = vrot.slane %v8998_v28, %v12397_v56  ;;  %v4877_v18 = vrot.slane %v4869_v17, %v12397_v56  ;;  %v4884_v63 = vrot.slane %v4870_v19, %v12397_v56 }
 0x444   : > { %9381 = vmatpush3.bf16.msra.mxu0 %v6741_v13  ;;  %9401 = vmatpush3.bf16.msra.mxu1 %v6749_v32  ;;  %v4801_v33 = vcombine.low %v11022_v52, %v4046_v44  ;;  %v4802_v46 = vcombine.high %v11022_v52, %v4046_v44  ;;  %v5649_v15 = vcombine.low %v11498_v42, %v11501_v38 }
 0x445   : > { %9382 = vmatprep.subr.bf16.mxu0 %v12336_v2  ;;  %9402 = vmatprep.subr.bf16.mxu1 %v12336_v2  ;;  %v5665_v60 = vcombine.low %v11510_v45, %v11513_v34  ;;  %v5717_v53 = vcombine.low %v11520_v25, %v11523_v20  ;;  %v5733_v12 = vcombine.low %v11526_v29, %v11529_v5 }
 0x446   : > { %v4809_v16 = vrot.slane %v4801_v33, %v12397_v56  ;;  %v4885_v3 = vcombine.low %v4000_v4, %v4096_v47  ;;  %v4816_v62 = vrot.slane %v4802_v46, %v12397_v56  ;;  %v5657_v52 = vrot.slane %v5649_v15, %v10299_v11 }
 0x447   : > { %v5673_v57 = vrot.slane %v5665_v60, %v10299_v11  ;;  %v4886_v6 = vcombine.high %v4000_v4, %v4096_v47  ;;  %v5725_v44 = vrot.slane %v5717_v53, %v10299_v11  ;;  %v5741_v41 = vrot.slane %v5733_v12, %v10299_v11 }
 0x448   : > { %v4893_v1 = vrot.slane %v4885_v3, %v12397_v56  ;;  %v4817_v40 = vcombine.low %v11535_v21, %v4094_v9  ;;  %v4818_v28 = vcombine.high %v11535_v21, %v4094_v9 }
 0x449   : > { %v5681_v14 = vcombine.low %v5657_v52, %v5673_v57  ;;  %v5682_v49 = vcombine.high %v5657_v52, %v5673_v57  ;;  %v4900_v8 = vrot.slane %v4886_v6, %v12397_v56  ;;  %v5749_v13 = vcombine.low %v5725_v44, %v5741_v41 }
 0x44a   : > { %v5750_v32 = vcombine.high %v5725_v44, %v5741_v41  ;;  %v4901_v17 = vcombine.low %v4877_v18, %v4893_v1  ;;  %v4902_v19 = vcombine.high %v4877_v18, %v4893_v1  ;;  %v4825_v47 = vrot.slane %v4817_v40, %v12397_v56 }
 0x44b   : > { %v4917_v33 = vcombine.low %v4884_v63, %v4900_v8  ;;  %v4918_v4 = vcombine.high %v4884_v63, %v4900_v8  ;;  %v4832_v46 = vrot.slane %v4818_v28, %v12397_v56  ;;  %v6742_v15 = vpack.c.bf16 %v5749_v13, %v5681_v14 }
 0x44c   : > { %v6750_v60 = vpack.c.bf16 %v5750_v32, %v5682_v49  ;;  %v4909_v53 = vrot.slane %v4901_v17, %v10299_v11  ;;  %v4916_v12 = vrot.slane %v4902_v19, %v10299_v11  ;;  %v4833_v9 = vcombine.low %v4809_v16, %v4825_v47 }
 0x44d   : > { %v4925_v3 = vrot.slane %v4917_v33, %v10299_v11  ;;  %v4932_v21 = vrot.slane %v4918_v4, %v10299_v11  ;;  %v4834_v52 = vcombine.high %v4809_v16, %v4825_v47  ;;  %9383 = vmatpush3.bf16.msra.mxu0 %v6742_v15  ;;  %v4849_v57 = vcombine.low %v4816_v62, %v4832_v46 }
 0x44e   : > { %9403 = vmatpush3.bf16.msra.mxu1 %v6750_v60  ;;  %v5957_v18 = vcombine.low %v4909_v53, %v4916_v12  ;;  %v9001_v63 = vcombine.high %v4909_v53, %v4916_v12  ;;  %v4841_v41 = vrot.slane %v4833_v9, %v10299_v11  ;;  %9384 = vmatprep.subr.bf16.mxu0 %v12336_v2 }
 0x44f   : > { %v5973_v6 = vcombine.low %v4925_v3, %v4932_v21  ;;  %v9002_v44 = vcombine.high %v4925_v3, %v4932_v21  ;;  %v4848_v1 = vrot.slane %v4834_v52, %v10299_v11  ;;  %v4850_v16 = vcombine.high %v4816_v62, %v4832_v46  ;;  %9404 = vmatprep.subr.bf16.mxu1 %v12336_v2 }
 0x450   : > { %v11615_v40 = vrot.slane %v5957_v18, %v12397_v56  ;;  %v11618_v14 = vrot.slane %v9001_v63, %v12397_v56  ;;  %v4857_v49 = vrot.slane %v4849_v57, %v10299_v11  ;;  %v5785_v19 = vcombine.low %v11546_v50, %v11549_v61 }
 0x451   : > { %v11623_v8 = vrot.slane %v5973_v6, %v12397_v56  ;;  %v11626_v28 = vrot.slane %v9002_v44, %v12397_v56  ;;  %v5889_v13 = vcombine.low %v4841_v41, %v4848_v1  ;;  %v8999_v32 = vcombine.high %v4841_v41, %v4848_v1 }
 0x452   : > { %v4864_v17 = vrot.slane %v4850_v16, %v10299_v11  ;;  %v5801_v62 = vcombine.low %v11562_v23, %v11565_v51  ;;  %v5853_v33 = vcombine.low %v11570_v43, %v11573_v30  ;;  %v5869_v46 = vcombine.low %v11576_v39, %v11579_v27 }
 0x453   : > { %v11636_v4 = vrot.slane %v5889_v13, %v12397_v56  ;;  %v11639_v47 = vrot.slane %v8999_v32, %v12397_v56  ;;  %v5989_v15 = vcombine.low %v11615_v40, %v11618_v14  ;;  %v5793_v12 = vrot.slane %v5785_v19, %v10299_v11 }
 0x454   : > { %v5905_v60 = vcombine.low %v4857_v49, %v4864_v17  ;;  %v9000_v53 = vcombine.high %v4857_v49, %v4864_v17  ;;  %v5809_v3 = vrot.slane %v5801_v62, %v10299_v11  ;;  %v5861_v21 = vrot.slane %v5853_v33, %v10299_v11 }
 0x455   : > { %v5877_v9 = vrot.slane %v5869_v46, %v10299_v11  ;;  %v5921_v52 = vcombine.low %v11636_v4, %v11639_v47  ;;  %v5997_v1 = vrot.slane %v5989_v15, %v10299_v11  ;;  %v6005_v16 = vcombine.low %v11623_v8, %v11626_v28 }
 0x456   : > { %v11652_v18 = vrot.slane %v5905_v60, %v12397_v56  ;;  %v11655_v63 = vrot.slane %v9000_v53, %v12397_v56  ;;  %v5817_v57 = vcombine.low %v5793_v12, %v5809_v3  ;;  %v5818_v6 = vcombine.high %v5793_v12, %v5809_v3 }
 0x457   : > { %v5885_v44 = vcombine.low %v5861_v21, %v5877_v9  ;;  %v5886_v41 = vcombine.high %v5861_v21, %v5877_v9  ;;  %v5929_v49 = vrot.slane %v5921_v52, %v10299_v11  ;;  %v6013_v19 = vrot.slane %v6005_v16, %v10299_v11 }
 0x458   : > { %v5937_v13 = vcombine.low %v11652_v18, %v11655_v63  ;;  %v5514_v53 = vcombine.high %v11444_v31, %v11447_v10  ;;  %v5530_v12 = vcombine.high %v11450_v24, %v11453_v35  ;;  %v5582_v3 = vcombine.high %v11476_v48, %v11479_v22 }
 0x459   : > { %v6743_v32 = vpack.c.bf16 %v5885_v44, %v5817_v57  ;;  %v6751_v17 = vpack.c.bf16 %v5886_v41, %v5818_v6  ;;  %v6021_v33 = vcombine.low %v5997_v1, %v6013_v19  ;;  %v6022_v46 = vcombine.high %v5997_v1, %v6013_v19 }
 0x45a   : > { %v5945_v62 = vrot.slane %v5937_v13, %v10299_v11  ;;  %v5598_v21 = vcombine.high %v11482_v36, %v11485_v37  ;;  %v5650_v9 = vcombine.high %v11498_v42, %v11501_v38  ;;  %v5528_v6 = vrot.slane %v5514_v53, %v10299_v11 }
 0x45b   : > { %9385 = vmatpush3.bf16.msra.mxu0 %v6743_v32  ;;  %9405 = vmatpush3.bf16.msra.mxu1 %v6751_v17  ;;  %v5666_v44 = vcombine.high %v11510_v45, %v11513_v34  ;;  %v5544_v31 = vrot.slane %v5530_v12, %v10299_v11  ;;  %v5596_v10 = vrot.slane %v5582_v3, %v10299_v11 }
 0x45c   : > { %9386 = vmatprep.subr.bf16.mxu0 %v12336_v2  ;;  %9406 = vmatprep.subr.bf16.mxu1 %v12336_v2  ;;  %v5953_v15 = vcombine.low %v5929_v49, %v5945_v62  ;;  %v5954_v60 = vcombine.high %v5929_v49, %v5945_v62  ;;  %v5612_v24 = vrot.slane %v5598_v21, %v10299_v11 }
 0x45d   : > { %v5664_v35 = vrot.slane %v5650_v9, %v10299_v11  ;;  %v5680_v48 = vrot.slane %v5666_v44, %v10299_v11  ;;  %v5718_v22 = vcombine.high %v11520_v25, %v11523_v20  ;;  %v5734_v36 = vcombine.high %v11526_v29, %v11529_v5 }
 0x45e   : > { %v6744_v52 = vpack.c.bf16 %v6021_v33, %v5953_v15  ;;  %v6752_v57 = vpack.c.bf16 %v6022_v46, %v5954_v60  ;;  %v5547_v37 = vcombine.low %v5528_v6, %v5544_v31  ;;  %v5615_v42 = vcombine.low %v5596_v10, %v5612_v24 }
 0x45f   : > { %v5548_v38 = vcombine.high %v5528_v6, %v5544_v31  ;;  %v5616_v45 = vcombine.high %v5596_v10, %v5612_v24  ;;  %v5683_v34 = vcombine.low %v5664_v35, %v5680_v48  ;;  %v5732_v41 = vrot.slane %v5718_v22, %v10299_v11 }
 0x460   : > { %9387 = vmatpush3.bf16.msra.mxu0 %v6744_v52  ;;  %9407 = vmatpush3.bf16.msra.mxu1 %v6752_v57  ;;  %v5748_v1 = vrot.slane %v5734_v36, %v10299_v11  ;;  %v11693_v16 = vpack.c.bf16 %v5615_v42, %v5547_v37  ;;  %v5684_v49 = vcombine.high %v5664_v35, %v5680_v48 }
 0x461   : > { %9388 = vmatprep.subr.bf16.mxu0 %v12336_v2  ;;  %9408 = vmatprep.subr.bf16.mxu1 %v12336_v2  ;;  %v5786_v25 = vcombine.high %v11546_v50, %v11549_v61  ;;  %v5802_v20 = vcombine.high %v11562_v23, %v11565_v51  ;;  %v11699_v29 = vpack.c.bf16 %v5616_v45, %v5548_v38 }
 0x462   : > { %v5751_v5 = vcombine.low %v5732_v41, %v5748_v1  ;;  %v5752_v13 = vcombine.high %v5732_v41, %v5748_v1  ;;  %v5854_v32 = vcombine.high %v11570_v43, %v11573_v30  ;;  %v5870_v62 = vcombine.high %v11576_v39, %v11579_v27 }
 0x463   : > { %v5800_v17 = vrot.slane %v5786_v25, %v10299_v11  ;;  %v5816_v19 = vrot.slane %v5802_v20, %v10299_v11  ;;  %v5922_v50 = vcombine.high %v11636_v4, %v11639_v47  ;;  %v5938_v33 = vcombine.high %v11652_v18, %v11655_v63  ;;  %v9687_v20 = vld [vmem:[%s9912_s30] ss:$0 sm:$0xff] }
 0x464   : > { %v11709_v61 = vpack.c.bf16 %v5751_v5, %v5683_v34  ;;  %v11711_v23 = vpack.c.bf16 %v5752_v13, %v5684_v49  ;;  %v5868_v51 = vrot.slane %v5854_v32, %v10299_v11  ;;  %v5884_v30 = vrot.slane %v5870_v62, %v10299_v11  ;;  %v12401_v5 = vld [vmem:[#allocation56_spill] sm:$0xff]  ;;  %v12402_v32 = vld [vmem:[#allocation54_spill] sm:$0xff] }
 0x465   : > { %v5819_v43 = vcombine.low %v5800_v17, %v5816_v19  ;;  %v5820_v46 = vcombine.high %v5800_v17, %v5816_v19  ;;  %v5936_v15 = vrot.slane %v5922_v50, %v10299_v11  ;;  %v5952_v39 = vrot.slane %v5938_v33, %v10299_v11  ;;  %v4002_v19 = vpop.permute.xlu0 %4001  ;;  %v11782_v33 = vld [vmem:[#allocation3 + $0x8] sm:$0xff] }
 0x466   : > { %v5990_v27 = vcombine.high %v11615_v40, %v11618_v14  ;;  %v6006_v4 = vcombine.high %v11623_v8, %v11626_v28  ;;  %v5887_v47 = vcombine.low %v5868_v51, %v5884_v30  ;;  %v5888_v60 = vcombine.high %v5868_v51, %v5884_v30  ;;  %v9015_v14 = vld [vmem:[%s982_s28] ss:$0 sm:$0xff]  ;;  %s9837_s28 = smov (!%p9016_p6), 16  }
 0x467   : > { %v5955_v53 = vcombine.low %v5936_v15, %v5952_v39  ;;  %v5956_v21 = vcombine.high %v5936_v15, %v5952_v39  ;;  %vm6615_vm7 = vcmp.eq.s32.totalorder %v11099_v26, %v9015_v14  ;;  %v11763_v13 = vadd.f32 %v9687_v20, %v12401_v5  ;;  %v4004_v26 = vpop.permute.xlu1 %4003  ;;  %v11780_v51 = vld [vmem:[#allocation3] sm:$0xff] }
 0x468   : > { %v6004_v18 = vrot.slane %v5990_v27, %v10299_v11  ;;  %v6020_v63 = vrot.slane %v6006_v4, %v10299_v11  ;;  %v11725_v12 = vpack.c.bf16 %v5887_v47, %v5819_v43  ;;  %v11727_v3 = vpack.c.bf16 %v5888_v60, %v5820_v46 }
 0x469   : > { %v11768_v17 = vadd.f32 %v9687_v20, %v12402_v32  ;;  %v4050_v50 = vpop.permute.xlu0 %4049 }
 0x46a   : > { %v6023_v9 = vcombine.low %v6004_v18, %v6020_v63  ;;  %v6024_v52 = vcombine.high %v6004_v18, %v6020_v63  ;;  %v4937_v47 = vcombine.low %v11199_v0, %v4050_v50  ;;  %v4938_v60 = vcombine.high %v11199_v0, %v4050_v50 }
 0x46b   : > { %v4052_v62 = vpop.permute.xlu1 %4051 }
 0x46c   : > { %v11729_v57 = vpack.c.bf16 %v6023_v9, %v5955_v53  ;;  %v11731_v40 = vpack.c.bf16 %v6024_v52, %v5956_v21  ;;  %v5005_v39 = vcombine.low %v11219_v55, %v4052_v62  ;;  %v5006_v27 = vcombine.high %v11219_v55, %v4052_v62 }
 0x46e   : > { %v5013_v52 = vrot.slane %v5005_v39, %v12397_v56  ;;  %v5020_v14 = vrot.slane %v5006_v27, %v12397_v56 }
 0x48a   : > { %v6399_v8 = vpop.f32.mrb[16].mxu0 }
 0x48b   : > { %v6466_v28 = vpop.f32.mrb[16].mxu1  ;;  %v9314_v6 = vpop.f32.mrb[17].mxu0  ;;  %v11743_v10 = vsel %vm6615_vm7, %v6399_v8, -1e+09 }
 0x48c   : > { %v9334_v44 = vpop.f32.mrb[17].mxu1  ;;  %v11739_v31 = vsel %vm6615_vm7, %v6466_v28, -1e+09  ;;  %v6402_v24 = vpop.f32.mrb[18].mxu0  ;;  %6626 = vmax.xlane.f32.xlu1 %v11743_v10  ;;  %v4945_v6 = vrot.slane %v4937_v47, %v12397_v56 }
 0x48d   : > { %v6469_v35 = vpop.f32.mrb[18].mxu1  ;;  %6628 = vmax.xlane.f32.xlu0 %v11739_v31  ;;  %v9315_v48 = vpop.f32.mrb[19].mxu0  ;;  %v4952_v44 = vrot.slane %v4938_v60, %v12397_v56 }
 0x48e   : > { %v9335_v22 = vpop.f32.mrb[19].mxu1 }
 0x49d   : > { %4099 = vrot.lane.b32.xlu1 %v11219_v55, %s9827_s0 }
 0x4a3   : > { %4097 = vrot.lane.b32.xlu0 %v11199_v0, %s9827_s0 }
 0x4ca   : > { %v6533_v36 = vpop.f32.mrb[20].mxu0 }
 0x4cb   : > { %v6600_v37 = vpop.f32.mrb[20].mxu1  ;;  %v9354_v42 = vpop.f32.mrb[21].mxu0  ;;  %v11757_v34 = vsel %vm6615_vm7, %v6533_v36, -1e+09 }
 0x4cc   : > { %v9374_v38 = vpop.f32.mrb[21].mxu1  ;;  %v11753_v45 = vsel %vm6615_vm7, %v6600_v37, -1e+09  ;;  %v6536_v41 = vpop.f32.mrb[22].mxu0  ;;  %6630 = vmax.xlane.f32.xlu1 %v11757_v34 }
 0x4cd   : > { %v6603_v1 = vpop.f32.mrb[22].mxu1  ;;  %6632 = vmax.xlane.f32.xlu0 %v11753_v45  ;;  %v9355_v49 = vpop.f32.mrb[23].mxu0 }
 0x4ce   : > { %v9375_v25 = vpop.f32.mrb[23].mxu1 }
 0x4dd   : > { %4007 = vrot.lane.b32.xlu1 %v11763_v13, %s9825_s16 }
 0x4e1   : > { %4055 = vrot.lane.b32.xlu1 %v11763_v13, %s9826_s18 }
 0x4e3   : > { %4005 = vrot.lane.b32.xlu0 %v11768_v17, %s9825_s16  ;;  %s9839_s16 = smov (!%p9016_p6), 96  }
 0x4e5   : > { %4103 = vrot.lane.b32.xlu1 %v11763_v13, %s9827_s0 }
 0x4e7   : > { %4053 = vrot.lane.b32.xlu0 %v11768_v17, %s9826_s18  ;;  %s9840_s18 = smov (!%p9016_p6), 112  }
 0x4eb   : > { %4101 = vrot.lane.b32.xlu0 %v11768_v17, %s9827_s0  ;;  %s9841_s0 = smov (!%p9016_p6), 80  }
 0x519   : > { %v6627_v43 = vpop.xlane.xlu1 %6626 }
 0x51a   : > { %v6629_v30 = vpop.xlane.xlu0 %6628  ;;  %v11785_v46 = vmax.f32 %v11780_v51, %v6627_v43 }
 0x51b   : > { %v11788_v15 = vmax.f32 %v11782_v33, %v6629_v30 }
 0x51c   : > { %6939 = vst.msk [vmem:[#allocation3] sm:$0xff] %vm6702_vm8, %v11785_v46  ;;  %6652 = vperm.xlu0 %9660, %v11785_v46  }
 0x51d   : > { %v6639_v4 = vsub.f32 %v11782_v33, %v11788_v15  ;;  %6940 = vst.msk [vmem:[#allocation3 + $0x8] sm:$0xff] %vm6702_vm8, %v11788_v15  ;;  %6657 = vperm.xlu1 %9661, %v11788_v15   ;;  %v4100_v53 = vpop.permute.xlu1 %4099 }
 0x51e   : > { %v4098_v18 = vpop.permute.xlu0 %4097  ;;  %v5021_v55 = vcombine.low %v4004_v26, %v4100_v53  ;;  %v5022_v63 = vcombine.high %v4004_v26, %v4100_v53 }
 0x51f   : > { %v4953_v21 = vcombine.low %v4002_v19, %v4098_v18  ;;  %v4954_v9 = vcombine.high %v4002_v19, %v4098_v18 }
 0x520   : > { %v5029_v8 = vrot.slane %v5021_v55, %v12397_v56  ;;  %v5036_v28 = vrot.slane %v5022_v63, %v12397_v56 }
 0x521   : > { %v4961_v0 = vrot.slane %v4953_v21, %v12397_v56  ;;  %v4968_v24 = vrot.slane %v4954_v9, %v12397_v56 }
 0x522   : > { %v5037_v35 = vcombine.low %v5013_v52, %v5029_v8  ;;  %v5038_v48 = vcombine.high %v5013_v52, %v5029_v8  ;;  %v5053_v22 = vcombine.low %v5020_v14, %v5036_v28  ;;  %v5054_v36 = vcombine.high %v5020_v14, %v5036_v28 }
 0x523   : > { %v4969_v37 = vcombine.low %v4945_v6, %v4961_v0  ;;  %v4970_v42 = vcombine.high %v4945_v6, %v4961_v0  ;;  %v4985_v38 = vcombine.low %v4952_v44, %v4968_v24  ;;  %v4986_v41 = vcombine.high %v4952_v44, %v4968_v24 }
 0x524   : > { %v5045_v1 = vrot.slane %v5037_v35, %v10299_v11  ;;  %v5052_v49 = vrot.slane %v5038_v48, %v10299_v11  ;;  %v5061_v25 = vrot.slane %v5053_v22, %v10299_v11  ;;  %v5068_v20 = vrot.slane %v5054_v36, %v10299_v11 }
 0x525   : > { %v4977_v5 = vrot.slane %v4969_v37, %v10299_v11  ;;  %v4984_v32 = vrot.slane %v4970_v42, %v10299_v11  ;;  %v4993_v26 = vrot.slane %v4985_v38, %v10299_v11  ;;  %v5000_v19 = vrot.slane %v4986_v41, %v10299_v11 }
 0x526   : > { %v6093_v62 = vcombine.low %v5045_v1, %v5052_v49  ;;  %v9005_v50 = vcombine.high %v5045_v1, %v5052_v49  ;;  %v6109_v43 = vcombine.low %v5061_v25, %v5068_v20  ;;  %v9006_v30 = vcombine.high %v5061_v25, %v5068_v20 }
 0x527   : > { %v6025_v39 = vcombine.low %v4977_v5, %v4984_v32  ;;  %v9003_v27 = vcombine.high %v4977_v5, %v4984_v32  ;;  %v6041_v47 = vcombine.low %v4993_v26, %v5000_v19  ;;  %v9004_v60 = vcombine.high %v4993_v26, %v5000_v19 }
 0x528   : > { %v6100_v53 = vrot.slane %v6093_v62, %v12397_v56  ;;  %v6108_v18 = vrot.slane %v9005_v50, %v12397_v56  ;;  %v6116_v55 = vrot.slane %v6109_v43, %v12397_v56  ;;  %v6124_v63 = vrot.slane %v9006_v30, %v12397_v56 }
 0x529   : > { %v6032_v21 = vrot.slane %v6025_v39, %v12397_v56  ;;  %v6040_v9 = vrot.slane %v9003_v27, %v12397_v56  ;;  %v6048_v52 = vrot.slane %v6041_v47, %v12397_v56  ;;  %v6056_v14 = vrot.slane %v9004_v60, %v12397_v56 }
 0x52a   : > { %v6125_v8 = vcombine.low %v6100_v53, %v6108_v18  ;;  %v6141_v28 = vcombine.low %v6116_v55, %v6124_v63  ;;  %v6126_v6 = vcombine.high %v6100_v53, %v6108_v18  ;;  %v6142_v44 = vcombine.high %v6116_v55, %v6124_v63  ;;  %v11842_v53 = vld [vmem:[#allocation3 + $0x10] sm:$0xff]  ;;  %v11844_v18 = vld [vmem:[#allocation3 + $0x18] sm:$0xff] }
 0x52b   : > { %v6057_v0 = vcombine.low %v6032_v21, %v6040_v9  ;;  %v6073_v24 = vcombine.low %v6048_v52, %v6056_v14  ;;  %v6058_v35 = vcombine.high %v6032_v21, %v6040_v9  ;;  %v6074_v48 = vcombine.high %v6048_v52, %v6056_v14 }
 0x52c   : > { %v6133_v22 = vrot.slane %v6125_v8, %v10299_v11  ;;  %v6149_v36 = vrot.slane %v6141_v28, %v10299_v11  ;;  %v6140_v37 = vrot.slane %v6126_v6, %v10299_v11  ;;  %v6156_v42 = vrot.slane %v6142_v44, %v10299_v11 }
 0x52d   : > { %v6065_v38 = vrot.slane %v6057_v0, %v10299_v11  ;;  %v6081_v41 = vrot.slane %v6073_v24, %v10299_v11  ;;  %v6072_v1 = vrot.slane %v6058_v35, %v10299_v11  ;;  %v6088_v49 = vrot.slane %v6074_v48, %v10299_v11 }
 0x52e   : > { %v6157_v25 = vcombine.low %v6133_v22, %v6149_v36  ;;  %v6158_v20 = vcombine.high %v6133_v22, %v6149_v36  ;;  %v6159_v5 = vcombine.low %v6140_v37, %v6156_v42  ;;  %v6160_v32 = vcombine.high %v6140_v37, %v6156_v42 }
 0x52f   : > { %v6089_v26 = vcombine.low %v6065_v38, %v6081_v41  ;;  %v6090_v19 = vcombine.high %v6065_v38, %v6081_v41  ;;  %v6091_v62 = vcombine.low %v6072_v1, %v6088_v49  ;;  %v6092_v50 = vcombine.high %v6072_v1, %v6088_v49 }
 0x530   : > { %v6638_v47 = vsub.f32 %v11780_v51, %v11785_v46 }
 0x531   : > { %v6745_v43 = vpack.c.bf16 %v6157_v25, %v6089_v26  ;;  %v6753_v30 = vpack.c.bf16 %v6158_v20, %v6090_v19  ;;  %v11834_v39 = vpack.c.bf16 %v6159_v5, %v6091_v62  ;;  %v11836_v27 = vpack.c.bf16 %v6160_v32, %v6092_v50 }
 0x532   : > { %v6642_v60 = vmul.f32 1.442695, %v6638_v47 }
 0x533   : > { %9389 = vmatpush3.bf16.msra.mxu0 %v6745_v43  ;;  %9409 = vmatpush3.bf16.msra.mxu1 %v6753_v30 }
 0x534   : > { %9390 = vmatprep.subr.bf16.mxu0 %v12336_v2  ;;  %9410 = vmatprep.subr.bf16.mxu1 %v12336_v2  ;;  %9670 = vpow2.f32 %v6642_v60 }
 0x53e   : > { %v11862_v8 = vpop.eup %9670 }
 0x559   : > { %v6631_v55 = vpop.xlane.xlu1 %6630 }
 0x55a   : > { %v6633_v63 = vpop.xlane.xlu0 %6632  ;;  %v11847_v21 = vmax.f32 %v11842_v53, %v6631_v55 }
 0x55b   : > { %v11850_v9 = vmax.f32 %v11844_v18, %v6633_v63 }
 0x55c   : > { %v6640_v52 = vsub.f32 %v11842_v53, %v11847_v21  ;;  %6941 = vst.msk [vmem:[#allocation3 + $0x10] sm:$0xff] %vm6702_vm8, %v11847_v21  ;;  %6662 = vperm.xlu0 %9660, %v11847_v21  }
 0x55d   : > { %v6641_v51 = vsub.f32 %v11844_v18, %v11850_v9  ;;  %6942 = vst.msk [vmem:[#allocation3 + $0x18] sm:$0xff] %vm6702_vm8, %v11850_v9  ;;  %6667 = vperm.xlu1 %9661, %v11850_v9   ;;  %v4008_v46 = vpop.permute.xlu1 %4007 }
 0x55e   : > { %v4006_v14 = vpop.permute.xlu0 %4005 }
 0x561   : > { %6713 = vperm.xlu1 %9661, %v11862_v8   ;;  %v4056_v28 = vpop.permute.xlu1 %4055 }
 0x562   : > { %v4054_v6 = vpop.permute.xlu0 %4053  ;;  %v5141_v44 = vcombine.low %v11763_v13, %v4056_v28  ;;  %v5142_v0 = vcombine.high %v11763_v13, %v4056_v28 }
 0x563   : > { %v5073_v24 = vcombine.low %v11768_v17, %v4054_v6  ;;  %v5074_v35 = vcombine.high %v11768_v17, %v4054_v6 }
 0x564   : > { %v5149_v41 = vrot.slane %v5141_v44, %v12397_v56  ;;  %v5156_v1 = vrot.slane %v5142_v0, %v12397_v56 }
 0x565   : > { %v4104_v48 = vpop.permute.xlu1 %4103  ;;  %v5081_v17 = vrot.slane %v5073_v24, %v12397_v56  ;;  %v5088_v5 = vrot.slane %v5074_v35, %v12397_v56 }
 0x566   : > { %v4102_v22 = vpop.permute.xlu0 %4101  ;;  %v5157_v36 = vcombine.low %v4008_v46, %v4104_v48  ;;  %v5158_v37 = vcombine.high %v4008_v46, %v4104_v48 }
 0x567   : > { %v5089_v42 = vcombine.low %v4006_v14, %v4102_v22  ;;  %v5090_v38 = vcombine.high %v4006_v14, %v4102_v22 }
 0x568   : > { %v5165_v49 = vrot.slane %v5157_v36, %v12397_v56  ;;  %v5172_v25 = vrot.slane %v5158_v37, %v12397_v56 }
 0x569   : > { %v5097_v13 = vrot.slane %v5089_v42, %v12397_v56  ;;  %v5104_v20 = vrot.slane %v5090_v38, %v12397_v56 }
 0x56a   : > { %v5173_v32 = vcombine.low %v5149_v41, %v5165_v49  ;;  %v5174_v26 = vcombine.high %v5149_v41, %v5165_v49  ;;  %v5189_v19 = vcombine.low %v5156_v1, %v5172_v25  ;;  %v5190_v62 = vcombine.high %v5156_v1, %v5172_v25 }
 0x56b   : > { %v5105_v50 = vcombine.low %v5081_v17, %v5097_v13  ;;  %v5106_v43 = vcombine.high %v5081_v17, %v5097_v13  ;;  %v5121_v30 = vcombine.low %v5088_v5, %v5104_v20  ;;  %v5122_v47 = vcombine.high %v5088_v5, %v5104_v20 }
 0x56c   : > { %v5181_v60 = vrot.slane %v5173_v32, %v10299_v11  ;;  %v5188_v55 = vrot.slane %v5174_v26, %v10299_v11  ;;  %v5197_v63 = vrot.slane %v5189_v19, %v10299_v11  ;;  %v5204_v46 = vrot.slane %v5190_v62, %v10299_v11 }
 0x56d   : > { %v5113_v14 = vrot.slane %v5105_v50, %v10299_v11  ;;  %v5120_v28 = vrot.slane %v5106_v43, %v10299_v11  ;;  %v5129_v6 = vrot.slane %v5121_v30, %v10299_v11  ;;  %v5136_v44 = vrot.slane %v5122_v47, %v10299_v11 }
 0x56e   : > { %v6229_v0 = vcombine.low %v5181_v60, %v5188_v55  ;;  %v9009_v24 = vcombine.high %v5181_v60, %v5188_v55  ;;  %v6245_v35 = vcombine.low %v5197_v63, %v5204_v46  ;;  %v9010_v48 = vcombine.high %v5197_v63, %v5204_v46 }
 0x56f   : > { %v6161_v22 = vcombine.low %v5113_v14, %v5120_v28  ;;  %v9007_v36 = vcombine.high %v5113_v14, %v5120_v28  ;;  %v6177_v37 = vcombine.low %v5129_v6, %v5136_v44  ;;  %v9008_v42 = vcombine.high %v5129_v6, %v5136_v44 }
 0x570   : > { %v6236_v38 = vrot.slane %v6229_v0, %v12397_v56  ;;  %v6244_v41 = vrot.slane %v9009_v24, %v12397_v56  ;;  %v6252_v1 = vrot.slane %v6245_v35, %v12397_v56  ;;  %v6260_v49 = vrot.slane %v9010_v48, %v12397_v56 }
 0x571   : > { %v6168_v25 = vrot.slane %v6161_v22, %v12397_v56  ;;  %v6176_v13 = vrot.slane %v9007_v36, %v12397_v56  ;;  %v6184_v20 = vrot.slane %v6177_v37, %v12397_v56  ;;  %v6192_v17 = vrot.slane %v9008_v42, %v12397_v56 }
 0x572   : > { %v6261_v5 = vcombine.low %v6236_v38, %v6244_v41  ;;  %v6277_v32 = vcombine.low %v6252_v1, %v6260_v49  ;;  %v6262_v26 = vcombine.high %v6236_v38, %v6244_v41  ;;  %v6278_v19 = vcombine.high %v6252_v1, %v6260_v49 }
 0x573   : > { %v6193_v62 = vcombine.low %v6168_v25, %v6176_v13  ;;  %v6209_v50 = vcombine.low %v6184_v20, %v6192_v17  ;;  %v6194_v43 = vcombine.high %v6168_v25, %v6176_v13  ;;  %v6210_v30 = vcombine.high %v6184_v20, %v6192_v17 }
 0x574   : > { %v6269_v47 = vrot.slane %v6261_v5, %v10299_v11  ;;  %v6285_v60 = vrot.slane %v6277_v32, %v10299_v11  ;;  %v6276_v55 = vrot.slane %v6262_v26, %v10299_v11  ;;  %v6292_v63 = vrot.slane %v6278_v19, %v10299_v11 }
 0x575   : > { %v6201_v46 = vrot.slane %v6193_v62, %v10299_v11  ;;  %v6217_v56 = vrot.slane %v6209_v50, %v10299_v11  ;;  %v6208_v14 = vrot.slane %v6194_v43, %v10299_v11  ;;  %v6224_v28 = vrot.slane %v6210_v30, %v10299_v11  ;;  %v6707_v30 = vld [vmem:[#allocation5] sm:$0xff] }
 0x576   : > { %v6293_v6 = vcombine.low %v6269_v47, %v6285_v60  ;;  %v6294_v44 = vcombine.high %v6269_v47, %v6285_v60  ;;  %v6295_v0 = vcombine.low %v6276_v55, %v6292_v63  ;;  %v6296_v24 = vcombine.high %v6276_v55, %v6292_v63 }
 0x577   : > { %v6225_v35 = vcombine.low %v6201_v46, %v6217_v56  ;;  %v6226_v48 = vcombine.high %v6201_v46, %v6217_v56  ;;  %v6227_v22 = vcombine.low %v6208_v14, %v6224_v28  ;;  %v6228_v36 = vcombine.high %v6208_v14, %v6224_v28 }
 0x578   : > { %v6646_v62 = vmul.f32 1.442695, %v6640_v52 }
 0x579   : > { %v6746_v37 = vpack.c.bf16 %v6293_v6, %v6225_v35  ;;  %v6754_v42 = vpack.c.bf16 %v6294_v44, %v6226_v48  ;;  %v6762_v38 = vpack.c.bf16 %v6295_v0, %v6227_v22  ;;  %v6770_v41 = vpack.c.bf16 %v6296_v24, %v6228_v36  ;;  %v6708_v0 = vld [vmem:[#allocation5 + $0x8] sm:$0xff] }
 0x57b   : > { %9391 = vmatpush3.bf16.msra.mxu0 %v6746_v37  ;;  %9411 = vmatpush3.bf16.msra.mxu1 %v6754_v42  ;;  %v6710_v37 = vld [vmem:[#allocation5 + $0x18] sm:$0xff] }
 0x57c   : > { %9416 = vmatprep.subr.bf16.mxu0 %v12336_v2  ;;  %9436 = vmatprep.subr.bf16.mxu1 %v12336_v2 }
 0x59b   : > { %v6653_v49 = vpop.permute.xlu0 %6652 }
 0x59c   : > { %v6658_v1 = vpop.permute.xlu1 %6657  ;;  %v6670_v13 = vsub.f32 %v11743_v10, %v6653_v49 }
 0x59d   : > { %v6671_v25 = vsub.f32 %v11739_v31, %v6658_v1  ;;  %v6648_v31 = vmul.f32 1.442695, %v6641_v51  ;;  %v6684_v51 = vld [vmem:[#allocation4 + $0x10] sm:$0xff] }
 0x59e   : > { %v6674_v17 = vmul.f32 1.442695, %v6670_v13 }
 0x59f   : > { %v6676_v20 = vmul.f32 1.442695, %v6671_v25 }
 0x5a1   : > { %9672 = vpow2.f32 %v6676_v20 }
 0x5a2   : > { %9674 = vpow2.f32 %v6674_v17 }
 0x5a3   : > { %9676 = vpow2.f32 %v6646_v62 }
 0x5a4   : > { %9678 = vpow2.f32 %v6648_v31 }
 0x5ab   : > { %v9673_v5 = vpop.eup %9672 }
 0x5ac   : > { %v9675_v32 = vpop.eup %9674  ;;  %6692 = vadd.xlane.f32.xlu1 %v9673_v5  ;;  %v6736_v26 = vpack.c.bf16 %v9673_v5, %v9673_v5 }
 0x5ad   : > { %6690 = vadd.xlane.f32.xlu0 %v9675_v32  ;;  %v6735_v19 = vpack.c.bf16 %v9675_v32, %v9675_v32 }
 0x5ae   : > { %9413 = vmatmul.mubr.bf16.vlgmr.msra.gmra.mrb[24].mxu1 %v6736_v26 }
 0x5af   : > { %9393 = vmatmul.mubr.bf16.vlgmr.msra.gmra.mrb[24].mxu0 %v6735_v19  ;;  %9437 = vmatpush3.bf16.msra.mxu1 %v11419_v58 }
 0x5b0   : > { %9417 = vmatpush3.bf16.msra.mxu0 %v11417_v54  ;;  %9438 = vmatprep.subr.bf16.mxu1 %v12336_v2  ;;  %v9677_v54 = vpop.eup %9676 }
 0x5b1   : > { %9418 = vmatprep.subr.bf16.mxu0 %v12336_v2  ;;  %9432 = vmatprep.mubr.msk.bf16.mxu0 %vm9832_vm6, %v12336_v2  ;;  %v9679_v58 = vpop.eup %9678  ;;  %v6688_v33 = vmul.f32 %v9677_v54, %v6684_v51 }
 0x5b2   : > { %9452 = vmatprep.mubr.msk.bf16.mxu1 %vm9832_vm6, %v12336_v2 }
 0x5b3   : > { %9439 = vmatpush3.bf16.msra.mxu1 %v11423_v59 }
 0x5b4   : > { %9419 = vmatpush3.bf16.msra.mxu0 %v11421_v7  ;;  %9440 = vmatprep.subr.bf16.mxu1 %v12336_v2 }
 0x5b5   : > { %9420 = vmatprep.subr.bf16.mxu0 %v12336_v2 }
 0x5b7   : > { %9441 = vmatpush3.bf16.msra.mxu1 %v11699_v29 }
 0x5b8   : > { %9421 = vmatpush3.bf16.msra.mxu0 %v11693_v16  ;;  %9442 = vmatprep.subr.bf16.mxu1 %v12336_v2 }
 0x5b9   : > { %9422 = vmatprep.subr.bf16.mxu0 %v12336_v2 }
 0x5bb   : > { %9443 = vmatpush3.bf16.msra.mxu1 %v11711_v23 }
 0x5bc   : > { %9423 = vmatpush3.bf16.msra.mxu0 %v11709_v61  ;;  %9444 = vmatprep.subr.bf16.mxu1 %v12336_v2 }
 0x5bd   : > { %6723 = vperm.xlu1 %9661, %v9677_v54   ;;  %9424 = vmatprep.subr.bf16.mxu0 %v12336_v2 }
 0x5bf   : > { %9445 = vmatpush3.bf16.msra.mxu1 %v11727_v3 }
 0x5c0   : > { %9425 = vmatpush3.bf16.msra.mxu0 %v11725_v12  ;;  %9446 = vmatprep.subr.bf16.mxu1 %v12336_v2 }
 0x5c1   : > { %6728 = vperm.xlu1 %9661, %v9679_v58   ;;  %9426 = vmatprep.subr.bf16.mxu0 %v12336_v2 }
 0x5c3   : > { %9447 = vmatpush3.bf16.msra.mxu1 %v11731_v40 }
 0x5c4   : > { %9427 = vmatpush3.bf16.msra.mxu0 %v11729_v57  ;;  %9448 = vmatprep.subr.bf16.mxu1 %v12336_v2 }
 0x5c5   : > { %9428 = vmatprep.subr.bf16.mxu0 %v12336_v2 }
 0x5c7   : > { %9449 = vmatpush3.bf16.msra.mxu1 %v11836_v27 }
 0x5c8   : > { %9429 = vmatpush3.bf16.msra.mxu0 %v11834_v39  ;;  %9450 = vmatprep.subr.bf16.mxu1 %v12336_v2  ;;  %v6682_v39 = vld [vmem:[#allocation4] sm:$0xff] }
 0x5c9   : > { %9430 = vmatprep.subr.bf16.mxu0 %v12336_v2  ;;  %v6644_v2 = vmul.f32 1.442695, %v6639_v4  ;;  %v6686_v18 = vmul.f32 %v11862_v8, %v6682_v39  ;;  %v6685_v4 = vld [vmem:[#allocation4 + $0x18] sm:$0xff] }
 0x5ca   : > { %v6689_v43 = vmul.f32 %v9679_v58, %v6685_v4 }
 0x5cb   : > { %9451 = vmatpush3.bf16.msra.mxu1 %v6770_v41 }
 0x5cc   : > { %9431 = vmatpush3.bf16.msra.mxu0 %v6762_v38  ;;  %v6709_v38 = vld [vmem:[#allocation5 + $0x10] sm:$0xff] }
 0x5db   : > { %v6663_v59 = vpop.permute.xlu0 %6662 }
 0x5dc   : > { %v6668_v7 = vpop.permute.xlu1 %6667  ;;  %v6672_v29 = vsub.f32 %v11757_v34, %v6663_v59  ;;  %v6683_v34 = vld [vmem:[#allocation4 + $0x8] sm:$0xff] }
 0x5dd   : > { %v6673_v16 = vsub.f32 %v11753_v45, %v6668_v7  ;;  %v9833_v7 = vmov (!%p9016_p6), 0  }
 0x5de   : > { %v6678_v23 = vmul.f32 1.442695, %v6672_v29  ;;  %9689 = vset.pattern.permute.xlu1 (!%p9016_p6), %v9833_v7 }
 0x5df   : > { %v6680_v61 = vmul.f32 1.442695, %v6673_v16 }
 0x5e0   : > { %v6714_v45 = vpop.permute.xlu1 %6713 }
 0x5e1   : > { %9680 = vpow2.f32 %v6680_v61  ;;  %v6731_v55 = vmul.f32 %v6714_v45, %v6707_v30 }
 0x5e2   : > { %9682 = vpow2.f32 %v6678_v23 }
 0x5e3   : > { %9684 = vpow2.f32 %v6644_v2 }
 0x5eb   : > { %v9681_v12 = vpop.eup %9680 }
 0x5ec   : > { %v9683_v3 = vpop.eup %9682  ;;  %v6738_v57 = vpack.c.bf16 %v9681_v12, %v9681_v12 }
 0x5ed   : > { %6694 = vadd.xlane.f32.xlu0 %v9683_v3  ;;  %v6737_v40 = vpack.c.bf16 %v9683_v3, %v9683_v3  ;;  %v9685_v10 = vpop.eup %9684  ;;  %v9834_v3 = vmov (!%p9016_p6), 0.0  }
 0x5ee   : > { %9453 = vmatmul.mubr.bf16.vlgmr.msra.gmra.mrb[28].mxu1 %v6738_v57  ;;  %v6687_v27 = vmul.f32 %v9685_v10, %v6683_v34  ;;  %9456 = vmatprep.subr.bf16.mxu1 (!%p9016_p6), %v9834_v3  ;;  %v9691_v57 = vld [vmem:[%s9917_s6 + $0x8] sm:$0xff] (!%p9016_p6)  }
 0x5ef   : > { %9433 = vmatmul.mubr.bf16.vlgmr.msra.gmra.mrb[28].mxu0 %v6737_v40  ;;  %9480 = vmatprep.subr.bf16.mxu0 (!%p9016_p6), %v9834_v3 }
 0x5f0   : > { %9464 = vmatprep.mubr.msk.bf16.mxu1 (!%p9016_p6), %vm9835_vm9, %v9834_v3  ;;  %9488 = vmatprep.mubr.msk.bf16.mxu0 (!%p9016_p6), %vm9835_vm9, %v9834_v3 }
 0x5f1   : > { %6696 = vadd.xlane.f32.xlu0 %v9681_v12  ;;  %v9690_v12 = vld [vmem:[%s9917_s6] sm:$0xff] (!%p9016_p6)  }
 0x5f2   : > { %9457 = vmatpush3.bf16.msra.mxu1 (!%p9016_p6), %v9690_v12  ;;  %v9024_v12 = vld [vmem:[%s9922_s12] ss:$0 sm:$0xff] (!%p9016_p6) }
 0x5f3   : > { %9458 = vmatprep.subr.bf16.mxu1 (!%p9016_p6), %v9834_v3 }
 0x5f6   : > { %9459 = vmatpush3.bf16.msra.mxu1 (!%p9016_p6), %v9691_v57 }
 0x5f7   : > { %9460 = vmatprep.subr.bf16.mxu1 (!%p9016_p6), %v9834_v3 }
 0x607   : > { %6718 = vperm.xlu0 %9660, %v9685_v10  }
 0x60b   : > { %9688 = vset.pattern.permute.xlu0 (!%p9016_p6), %v9833_v7 }
 0x639   : > { %v6693_v53 = vpop.xlane.xlu1 %6692 }
 0x63a   : > { %v6699_v21 = vadd.f32 %v6693_v53, %v6687_v27  ;;  %v6691_v9 = vpop.xlane.xlu0 %6690 }
 0x63b   : > { %v6698_v52 = vadd.f32 %v6691_v9, %v6686_v18 }
 0x63c   : > { %6704 = vst.msk [vmem:[#allocation4 + $0x8] sm:$0xff] %vm6702_vm8, %v6699_v21 }
 0x63d   : > { %6703 = vst.msk [vmem:[#allocation4] sm:$0xff] %vm6702_vm8, %v6698_v52  ;;  %v6724_v36 = vpop.permute.xlu1 %6723 }
 0x63e   : > { %v6733_v1 = vmul.f32 %v6724_v36, %v6709_v38 }
 0x641   : > { %v6729_v42 = vpop.permute.xlu1 %6728 }
 0x642   : > { %v6734_v41 = vmul.f32 %v6729_v42, %v6710_v37 }
 0x643   : > { %v6953_v59 = vld [vmem:[#allocation4 + $0x8] sm:$0xff] (!%p9016_p6) }
 0x644   : > { %v6952_v54 = vld [vmem:[#allocation4] sm:$0xff] (!%p9016_p6) }
 0x67a   : > { %v6695_v15 = vpop.xlane.xlu0 %6694 }
 0x67b   : > { %v6700_v50 = vadd.f32 %v6695_v15, %v6688_v33 }
 0x67d   : > { %6705 = vst.msk [vmem:[#allocation4 + $0x10] sm:$0xff] %vm6702_vm8, %v6700_v50  ;;  %v12403_v50 = vld [vmem:[#allocation25_spill] sm:$0xff] (!%p9016_p6) }
 0x67e   : > { %v6697_v47 = vpop.xlane.xlu0 %6696 }
 0x67f   : > { %v6701_v60 = vadd.f32 %v6697_v47, %v6689_v43 }
 0x681   : > { %6706 = vst.msk [vmem:[#allocation4 + $0x18] sm:$0xff] %vm6702_vm8, %v6701_v60  ;;  %v6845_v8 = vpop.f32.mrb[24].mxu1 }
 0x682   : > { %v6805_v63 = vpop.f32.mrb[24].mxu0  ;;  %v9414_v46 = vpop.f32.mrb[25].mxu1 }
 0x683   : > { %v6931_v56 = vadd.f32 %v6805_v63, %v6731_v55  ;;  %v9394_v14 = vpop.f32.mrb[25].mxu0  ;;  %v6848_v28 = vpop.f32.mrb[26].mxu1  ;;  %v9692_v55 = vld [vmem:[%s9917_s6 + $0x10] sm:$0xff] (!%p9016_p6)  }
 0x684   : > { %v6808_v6 = vpop.f32.mrb[26].mxu0  ;;  %v9415_v44 = vpop.f32.mrb[27].mxu1  ;;  %v6954_v31 = vld [vmem:[#allocation4 + $0x10] sm:$0xff] (!%p9016_p6)  ;;  %9461 = vmatpush3.bf16.msra.mxu1 (!%p9016_p6), %v9692_v55 }
 0x685   : > { %6935 = vst.msk [vmem:[#allocation5] sm:$0xff] %vm6337_vm5, %v6931_v56  ;;  %v9395_v24 = vpop.f32.mrb[27].mxu0  ;;  %9718 = vrcp.f32 (!%p9016_p6), %v6954_v31  ;;  %9462 = vmatprep.subr.bf16.mxu1 (!%p9016_p6), %v9834_v3 }
 0x686   : > { %v6719_v35 = vpop.permute.xlu0 %6718  ;;  %9720 = vrcp.f32 (!%p9016_p6), %v6952_v54 }
 0x687   : > { %v6732_v48 = vmul.f32 %v6719_v35, %v6708_v0  ;;  %v9693_v0 = vld [vmem:[%s9917_s6 + $0x18] sm:$0xff] (!%p9016_p6)  }
 0x688   : > { %v6955_v58 = vld [vmem:[#allocation4 + $0x18] sm:$0xff] (!%p9016_p6)  ;;  %9463 = vmatpush3.bf16.msra.mxu1 (!%p9016_p6), %v9693_v0 }
 0x689   : > { %v6932_v22 = vadd.f32 %v6845_v8, %v6732_v48  ;;  %9722 = vrcp.f32 (!%p9016_p6), %v6955_v58  ;;  %9468 = vmatprep.subr.bf16.mxu1 (!%p9016_p6), %v9834_v3 }
 0x68a   : > { %9724 = vrcp.f32 (!%p9016_p6), %v6953_v59 }
 0x68b   : > { %6936 = vst.msk [vmem:[#allocation5 + $0x8] sm:$0xff] %vm6337_vm5, %v6932_v22 }
 0x68c   : > { %v6948_v2 = vld [vmem:[#allocation5] sm:$0xff] (!%p9016_p6) }
 0x68f   : > { %v9719_v16 = vpop.eup (!%p9016_p6), %9718 }
 0x690   : > { %v9721_v29 = vpop.eup (!%p9016_p6), %9720  ;;  %6972 = vperm.xlu1 (!%p9016_p6), %9689, %v9719_v16  }
 0x691   : > { %6962 = vperm.xlu0 (!%p9016_p6), %9688, %v9721_v29  }
 0x692   : > { %v6949_v53 = vld [vmem:[#allocation5 + $0x8] sm:$0xff] (!%p9016_p6) }
 0x693   : > { %v9723_v61 = vpop.eup (!%p9016_p6), %9722 }
 0x694   : > { %v9725_v23 = vpop.eup (!%p9016_p6), %9724  ;;  %6977 = vperm.xlu1 (!%p9016_p6), %9689, %v9723_v61   ;;  %v6947_v61 = vld [vmem:[%s9852_s5] sm:$0xff] (!%p9016_p6) }
 0x695   : > { %6967 = vperm.xlu0 (!%p9016_p6), %9688, %v9725_v23  }
 0x6bf   : > { %6946 = sbr.rel (%p9016_p6) target bundleno = 5185 (0x1441), region = 152 }
 0x6c1   : > { %v6925_v49 = vpop.f32.mrb[28].mxu1 }
 0x6c2   : > { %v6885_v25 = vpop.f32.mrb[28].mxu0  ;;  %v6934_v13 = vadd.f32 %v6925_v49, %v6734_v41  ;;  %v9454_v20 = vpop.f32.mrb[29].mxu1 }
 0x6c3   : > { %v6933_v17 = vadd.f32 %v6885_v25, %v6733_v1  ;;  %v9434_v5 = vpop.f32.mrb[29].mxu0  ;;  %v6928_v32 = vpop.f32.mrb[30].mxu1 }
 0x6c4   : > { %6938 = vst.msk [vmem:[#allocation5 + $0x18] sm:$0xff] %vm6337_vm5, %v6934_v13  ;;  %v6888_v26 = vpop.f32.mrb[30].mxu0  ;;  %v9455_v19 = vpop.f32.mrb[31].mxu1 }
 0x6c5   : > { %6937 = vst.msk [vmem:[#allocation5 + $0x10] sm:$0xff] %vm6337_vm5, %v6933_v17  ;;  %v9435_v62 = vpop.f32.mrb[31].mxu0 }
 0x6cb   : > { %v6951_v27 = vld [vmem:[#allocation5 + $0x18] sm:$0xff] }
 0x6cc   : > { %v6950_v40 = vld [vmem:[#allocation5 + $0x10] sm:$0xff] }
 0x70f   : > { %v6973_v10 = vpop.permute.xlu1 %6972 }
 0x710   : > { %v6963_v45 = vpop.permute.xlu0 %6962  ;;  %v6982_v34 = vmul.f32 %v6973_v10, %v6950_v40 }
 0x711   : > { %v6980_v39 = vmul.f32 %v6963_v45, %v6948_v2 }
 0x713   : > { %v6978_v18 = vpop.permute.xlu1 %6977  ;;  %v6984_v52 = vcombine.low %v6980_v39, %v6982_v34  ;;  %v6985_v51 = vcombine.high %v6980_v39, %v6982_v34 }
 0x714   : > { %v6983_v21 = vmul.f32 %v6978_v18, %v6951_v27  ;;  %v6968_v9 = vpop.permute.xlu0 %6967 }
 0x715   : > { %v6981_v33 = vmul.f32 %v6968_v9, %v6949_v53  ;;  %v6992_v43 = vrot.slane %v6984_v52, %v12403_v50  ;;  %v6999_v30 = vrot.slane %v6985_v51, %v12403_v50  ;;  %v9694_v9 = vld [vmem:[%s12404_s2] sm:$0xff]   ;;  %v9696_v51 = vld [vmem:[%s12404_s2 + $0x8] sm:$0xff]  }
 0x716   : > { %v9695_v52 = vld [vmem:[%s12405_s7] sm:$0xff]   ;;  %9481 = vmatpush3.bf16.msra.mxu0 %v9694_v9 }
 0x717   : > { %v7000_v15 = vcombine.low %v6981_v33, %v6983_v21  ;;  %v7001_v4 = vcombine.high %v6981_v33, %v6983_v21  ;;  %v9697_v33 = vld [vmem:[%s12405_s7 + $0x8] sm:$0xff]   ;;  %9482 = vmatprep.subr.bf16.mxu0 %v9834_v3 }
 0x719   : > { %v7008_v47 = vrot.slane %v7000_v15, %v12403_v50  ;;  %v7015_v60 = vrot.slane %v7001_v4, %v12403_v50  ;;  %v9698_v15 = vld [vmem:[%s12404_s2 + $0x10] sm:$0xff]  }
 0x71a   : > { %9483 = vmatpush3.bf16.msra.mxu0 %v9696_v51  ;;  %v9699_v4 = vld [vmem:[%s12405_s7 + $0x10] sm:$0xff]  }
 0x71b   : > { %v7016_v8 = vcombine.low %v6992_v43, %v7008_v47  ;;  %v7017_v63 = vcombine.high %v6992_v43, %v7008_v47  ;;  %v7032_v46 = vcombine.low %v6999_v30, %v7015_v60  ;;  %v7033_v56 = vcombine.high %v6999_v30, %v7015_v60  ;;  %9484 = vmatprep.subr.bf16.mxu0 %v9834_v3  ;;  %v9700_v43 = vld [vmem:[%s12404_s2 + $0x18] sm:$0xff]  }
 0x71c   : > { %v9701_v30 = vld [vmem:[%s12405_s7 + $0x18] sm:$0xff]  }
 0x71d   : > { %v7024_v14 = vrot.slane %v7016_v8, %v10299_v11  ;;  %v7031_v28 = vrot.slane %v7017_v63, %v10299_v11  ;;  %v7040_v6 = vrot.slane %v7032_v46, %v10299_v11  ;;  %v7047_v44 = vrot.slane %v7033_v56, %v10299_v11  ;;  %v9025_v63 = vld [vmem:[%s12406_s10] ss:$0 sm:$0xff]  ;;  %s9842_s10 = smov 64  }
 0x71e   : > { %9485 = vmatpush3.bf16.msra.mxu0 %v9698_v15  ;;  %v9026_v56 = vld [vmem:[%s12407_s11] ss:$0 sm:$0xff]  ;;  %s12409_s11 = sld [smem:[#allocation9_spill]] }
 0x71f   : > { %v7052_v24 = vcombine.low %v7024_v14, %v7031_v28  ;;  %v9017_v35 = vcombine.high %v7024_v14, %v7031_v28  ;;  %v7068_v48 = vcombine.low %v7040_v6, %v7047_v44  ;;  %v9018_v22 = vcombine.high %v7040_v6, %v7047_v44  ;;  %9486 = vmatprep.subr.bf16.mxu0 %v9834_v3  ;;  %v7252_v28 = vld [vmem:[%s9857_s9] sm:$0xff] }
 0x721   : > { %v7059_v36 = vrot.slane %v7052_v24, %v12403_v50  ;;  %v7067_v37 = vrot.slane %v9017_v35, %v12403_v50  ;;  %v7075_v42 = vrot.slane %v7068_v48, %v12403_v50  ;;  %v7083_v38 = vrot.slane %v9018_v22, %v12403_v50  ;;  %v9027_v48 = vld [vmem:[%s12408_s15] ss:$0 sm:$0xff]  ;;  %s12410_s15 = sld [smem:[#allocation15_spill]] }
 0x722   : > { %9487 = vmatpush3.bf16.msra.mxu0 %v9700_v43 }
 0x723   : > { %v7085_v41 = vcombine.high %v7059_v36, %v7067_v37  ;;  %v7101_v1 = vcombine.high %v7075_v42, %v7083_v38  ;;  %v7084_v49 = vcombine.low %v7059_v36, %v7067_v37  ;;  %v7100_v25 = vcombine.low %v7075_v42, %v7083_v38  ;;  %9504 = vmatprep.subr.bf16.mxu0 %v9834_v3 }
 0x725   : > { %v7099_v13 = vrot.slane %v7085_v41, %v10299_v11  ;;  %v7115_v20 = vrot.slane %v7101_v1, %v10299_v11  ;;  %v7092_v17 = vrot.slane %v7084_v49, %v10299_v11  ;;  %v7108_v5 = vrot.slane %v7100_v25, %v10299_v11 }
 0x727   : > { %v7118_v32 = vcombine.low %v7099_v13, %v7115_v20  ;;  %v7117_v26 = vcombine.high %v7092_v17, %v7108_v5  ;;  %v7116_v19 = vcombine.low %v7092_v17, %v7108_v5  ;;  %v7119_v62 = vcombine.high %v7099_v13, %v7115_v20  ;;  %v8060_v5 = vld [vmem:[%s9862_s13] sm:$0xff] }
 0x729   : > { %7125 = vrot.lane.b32.xlu1 %v7118_v32, %s9836_s26  ;;  %7121 = vrot.lane.b32.xlu0 %v7117_v26, %s9837_s28 }
 0x72d   : > { %7129 = vrot.lane.b32.xlu0 %v7119_v62, %s9838_s1 }
 0x79b   : > { %v7122_v31 = vpop.permute.xlu0 %7121  ;;  %v7126_v54 = vpop.permute.xlu1 %7125 }
 0x79c   : > { %v7132_v58 = vsel %vm6337_vm5, %v7116_v19, %v7122_v31 }
 0x79d   : > { %v7134_v7 = vsel %vm7133_vm10, %v7132_v58, %v7126_v54 }
 0x79f   : > { %v7130_v59 = vpop.permute.xlu0 %7129 }
 0x7a0   : > { %v7136_v16 = vsel %vm7135_vm11, %v7134_v7, %v7130_v59 }
 0x7a1   : > { %v7137_v29 = vpack.c.bf16 %v7136_v16, %v7136_v16 }
 0x7a3   : > { %9465 = vmatmul.mubr.msk.bf16.vlgmr.msra.gmra.mrb[0].mxu1 %vm1335_vm4, %v7137_v29 }
 0x7a4   : > { %9476 = vmatprep.mubr.msk.bf16.mxu1 %vm9835_vm9, %v9834_v3  ;;  %9469 = vmatpush3.bf16.msra.mxu1 %v9695_v52 }
 0x7a5   : > { %9470 = vmatprep.subr.bf16.mxu1 %v9834_v3 }
 0x7a8   : > { %9471 = vmatpush3.bf16.msra.mxu1 %v9697_v33 }
 0x7a9   : > { %9472 = vmatprep.subr.bf16.mxu1 %v9834_v3 }
 0x7ac   : > { %9473 = vmatpush3.bf16.msra.mxu1 %v9699_v4 }
 0x7ad   : > { %9474 = vmatprep.subr.bf16.mxu1 %v9834_v3 }
 0x7b0   : > { %9475 = vmatpush3.bf16.msra.mxu1 %v9701_v30 }
 0x7b1   : > { %9492 = vmatprep.subr.bf16.mxu1 %v9834_v3 }
 0x876   : > { %v7207_v23 = vpop.f32.mrb[0].mxu1 }
 0x877   : > { %v7213_v57 = vadd.f32 %v7207_v23, %v6947_v61  ;;  %v9466_v40 = vpop.f32.mrb[1].mxu1 }
 0x878   : > { %v7210_v2 = vpop.f32.mrb[2].mxu1 }
 0x879   : > { %v9467_v10 = vpop.f32.mrb[3].mxu1  ;;  %v7221_v45 = vadd.f32 %v9024_v12, %v7213_v57 }
 0x87b   : > { %v7224_v34 = vsel %vm1335_vm4, %v7221_v45, 0.0 }
 0x87c   : > { %7225 = vadd.xlane.f32.xlu1 %v7224_v34 }
 0x909   : > { %v7226_v39 = vpop.xlane.xlu1 %7225 }
 0x90a   : > { %v7228_v27 = vmul.f32 0.015625, %v7226_v39 }
 0x90c   : > { %v7229_v53 = vsub.f32 %v7221_v45, %v7228_v27 }
 0x90e   : > { %v7230_v18 = vmul.f32 %v7229_v53, %v7229_v53 }
 0x910   : > { %v7231_v21 = vsel %vm1335_vm4, %v7230_v18, 0.0 }
 0x911   : > { %7232 = vadd.xlane.f32.xlu0 %v7231_v21 }
 0x99e   : > { %v7233_v47 = vpop.xlane.xlu0 %7232 }
 0x99f   : > { %v7234_v60 = vmul.f32 0.015625, %v7233_v47 }
 0x9a1   : > { %v7235_v55 = vadd.f32 1e-05, %v7234_v60 }
 0x9a3   : > { %9726 = vrsqrt.f32 %v7235_v55 }
 0x9ad   : > { %v9727_v8 = vpop.eup %9726 }
 0x9ae   : > { %v7237_v46 = vmul.f32 %v9727_v8, %v7229_v53 }
 0x9b0   : > { %v7244_v14 = vmul.f32 %v9025_v63, %v7237_v46 }
 0x9b2   : > { %v12020_v6 = vadd.f32 %v9026_v56, %v7244_v14 }
 0x9b4   : > { %v7337_v44 = vpack.c.bf16 %v12020_v6, %v12020_v6  ;;  %v7253_v0 = vadd.f32 %v7252_v28, %v12020_v6 }
 0x9b6   : > { %9489 = vmatmul.mubr.msk.bf16.vlgmr.msra.gmra.mrb[0].mxu0 %vm1335_vm4, %v7337_v44  ;;  %v7254_v24 = vpack.c.bf16 %v7253_v0, %v7253_v0 }
 0x9b7   : > { %9506 = vmatprep.mubr.msk.bf16.mxu0 %vm9835_vm9, %v9834_v3 }
 0x9b8   : > { %9477 = vmatmul.mubr.msk.bf16.vlgmr.msra.gmra.mrb[4].mxu1 %vm1335_vm4, %v7254_v24 }
 0x9b9   : > { %9494 = vmatprep.mubr.msk.bf16.mxu1 %vm9835_vm9, %v9834_v3 }
 0xa89   : > { %v12031_v35 = vpop.f32.mrb[0].mxu0 }
 0xa8a   : > { %v9490_v22 = vpop.f32.mrb[1].mxu0 }
 0xa8b   : > { %v7331_v36 = vpop.f32.mrb[4].mxu1  ;;  %v7417_v37 = vpop.f32.mrb[2].mxu0 }
 0xa8c   : > { %v7332_v42 = vadd.f32 %v9027_v48, %v7331_v36  ;;  %v9478_v38 = vpop.f32.mrb[5].mxu1  ;;  %v9491_v41 = vpop.f32.mrb[3].mxu0 }
 0xa8d   : > { %v7334_v1 = vpop.f32.mrb[6].mxu1 }
 0xa8e   : > { %7570 = vrot.lane.b32.xlu1 %v7332_v42, %s9839_s16  ;;  %7568 = vrot.lane.b32.xlu0 %v7332_v42, %s9840_s18  ;;  %v9479_v49 = vpop.f32.mrb[7].mxu1  ;;  %v7420_v20 = vmul.f32 0.25, %v7332_v42 }
 0xa92   : > { %7572 = vrot.lane.b32.xlu1 %v7332_v42, %s9841_s0  ;;  %7574 = vrot.lane.b32.xlu0 %v7332_v42, %s9842_s10 }
 0xb00   : > { %v7571_v25 = vpop.permute.xlu1 %7570  ;;  %v7569_v13 = vpop.permute.xlu0 %7568 }
 0xb01   : > { %7578 = vrot.lane.b32.xlu0 %v7571_v25, %s9842_s10  ;;  %7576 = vrot.lane.b32.xlu1 %v7569_v13, %s9842_s10 }
 0xb04   : > { %v7573_v17 = vpop.permute.xlu1 %7572  ;;  %v7575_v32 = vpop.permute.xlu0 %7574 }
 0xb05   : > { %7580 = vrot.lane.b32.xlu1 %v7573_v17, %s9842_s10  ;;  %7422 = vrot.lane.b32.xlu0 %v7420_v20, %s9840_s18  ;;  %s12417_s10 = sld [smem:[#allocation21_spill]] }
 0xb09   : > { %7425 = vrot.lane.b32.xlu1 %v7420_v20, %s9839_s16  ;;  %7428 = vrot.lane.b32.xlu0 %v7420_v20, %s9841_s0 }
 0xb0d   : > { %8063 = vperm.xlu1 %9689, %v8060_v5  }
 0xb73   : > { %v7577_v26 = vpop.permute.xlu1 %7576  ;;  %v7579_v19 = vpop.permute.xlu0 %7578 }
 0xb74   : > { %v7586_v62 = vcombine.low %v7575_v32, %v7579_v19  ;;  %v7587_v31 = vcombine.high %v7575_v32, %v7579_v19 }
 0xb76   : > { %v7594_v16 = vrot.slane %v7586_v62, %v12403_v50  ;;  %v7601_v29 = vrot.slane %v7587_v31, %v12403_v50 }
 0xb77   : > { %v7581_v54 = vpop.permute.xlu1 %7580  ;;  %v7423_v58 = vpop.permute.xlu0 %7422 }
 0xb78   : > { %v7602_v7 = vcombine.low %v7577_v26, %v7581_v54  ;;  %v7603_v59 = vcombine.high %v7577_v26, %v7581_v54 }
 0xb7a   : > { %v7610_v61 = vrot.slane %v7602_v7, %v12403_v50  ;;  %v7617_v23 = vrot.slane %v7603_v59, %v12403_v50 }
 0xb7b   : > { %v7426_v12 = vpop.permute.xlu1 %7425  ;;  %v7429_v57 = vpop.permute.xlu0 %7428 }
 0xb7c   : > { %v7618_v40 = vcombine.low %v7594_v16, %v7610_v61  ;;  %v7619_v2 = vcombine.high %v7594_v16, %v7610_v61  ;;  %v7634_v10 = vcombine.low %v7601_v29, %v7617_v23  ;;  %v7635_v45 = vcombine.high %v7601_v29, %v7617_v23 }
 0xb7d   : > { %v7431_v34 = vcombine.low %v7420_v20, %v7426_v12  ;;  %v7432_v39 = vcombine.high %v7420_v20, %v7426_v12  ;;  %v7447_v27 = vcombine.low %v7423_v58, %v7429_v57  ;;  %v7448_v53 = vcombine.high %v7423_v58, %v7429_v57 }
 0xb7e   : > { %v7626_v18 = vrot.slane %v7618_v40, %v10299_v11  ;;  %v7633_v21 = vrot.slane %v7619_v2, %v10299_v11  ;;  %v7642_v9 = vrot.slane %v7634_v10, %v10299_v11  ;;  %v7649_v52 = vrot.slane %v7635_v45, %v10299_v11 }
 0xb7f   : > { %v7439_v51 = vrot.slane %v7431_v34, %v12403_v50  ;;  %v7446_v33 = vrot.slane %v7432_v39, %v12403_v50  ;;  %v7455_v15 = vrot.slane %v7447_v27, %v12403_v50  ;;  %v7462_v4 = vrot.slane %v7448_v53, %v12403_v50 }
 0xb80   : > { %v7654_v43 = vcombine.low %v7626_v18, %v7633_v21  ;;  %v9041_v30 = vcombine.high %v7626_v18, %v7633_v21  ;;  %v7670_v47 = vcombine.low %v7642_v9, %v7649_v52  ;;  %v9042_v60 = vcombine.high %v7642_v9, %v7649_v52 }
 0xb81   : > { %v7463_v55 = vcombine.low %v7439_v51, %v7455_v15  ;;  %v7464_v8 = vcombine.high %v7439_v51, %v7455_v15  ;;  %v7479_v63 = vcombine.low %v7446_v33, %v7462_v4  ;;  %v7480_v46 = vcombine.high %v7446_v33, %v7462_v4 }
 0xb82   : > { %v7661_v56 = vrot.slane %v7654_v43, %v12403_v50  ;;  %v7669_v14 = vrot.slane %v9041_v30, %v12403_v50  ;;  %v7677_v28 = vrot.slane %v7670_v47, %v12403_v50  ;;  %v7685_v44 = vrot.slane %v9042_v60, %v12403_v50  ;;  %v9049_v30 = vld [vmem:[%s12409_s11] ss:$0 sm:$0xff] }
 0xb83   : > { %v7471_v0 = vrot.slane %v7463_v55, %v10299_v11  ;;  %v7478_v24 = vrot.slane %v7464_v8, %v10299_v11  ;;  %v7487_v48 = vrot.slane %v7479_v63, %v10299_v11  ;;  %v7494_v22 = vrot.slane %v7480_v46, %v10299_v11 }
 0xb84   : > { %v7686_v36 = vcombine.low %v7661_v56, %v7669_v14  ;;  %v7702_v37 = vcombine.low %v7677_v28, %v7685_v44  ;;  %v7687_v42 = vcombine.high %v7661_v56, %v7669_v14  ;;  %v7703_v38 = vcombine.high %v7677_v28, %v7685_v44 }
 0xb85   : > { %v7499_v41 = vcombine.low %v7471_v0, %v7478_v24  ;;  %v9039_v1 = vcombine.high %v7471_v0, %v7478_v24  ;;  %v7515_v49 = vcombine.low %v7487_v48, %v7494_v22  ;;  %v9040_v25 = vcombine.high %v7487_v48, %v7494_v22 }
 0xb86   : > { %v7694_v13 = vrot.slane %v7686_v36, %v10299_v11  ;;  %v7710_v20 = vrot.slane %v7702_v37, %v10299_v11  ;;  %v7701_v17 = vrot.slane %v7687_v42, %v10299_v11  ;;  %v7717_v5 = vrot.slane %v7703_v38, %v10299_v11 }
 0xb87   : > { %v7506_v32 = vrot.slane %v7499_v41, %v12403_v50  ;;  %v7514_v26 = vrot.slane %v9039_v1, %v12403_v50  ;;  %v7522_v19 = vrot.slane %v7515_v49, %v12403_v50  ;;  %v7530_v62 = vrot.slane %v9040_v25, %v12403_v50 }
 0xb88   : > { %v7718_v31 = vcombine.low %v7694_v13, %v7710_v20  ;;  %v7720_v54 = vcombine.low %v7701_v17, %v7717_v5  ;;  %v7719_v45 = vcombine.high %v7694_v13, %v7710_v20  ;;  %v7721_v9 = vcombine.high %v7701_v17, %v7717_v5  ;;  %v9033_v5 = vld [vmem:[%s12410_s15] ss:$0 sm:$0xff] }
 0xb89   : > { %v7531_v58 = vcombine.low %v7506_v32, %v7514_v26  ;;  %v7532_v7 = vcombine.high %v7506_v32, %v7514_v26  ;;  %v7547_v59 = vcombine.low %v7522_v19, %v7530_v62  ;;  %v7548_v16 = vcombine.high %v7522_v19, %v7530_v62 }
 0xb8a   : > { %v7872_v29 = vpack.c.bf16 %v7718_v31, %v7718_v31  ;;  %v7874_v61 = vpack.c.bf16 %v7720_v54, %v7720_v54  ;;  %v7873_v27 = vpack.c.bf16 %v7719_v45, %v7719_v45  ;;  %v7875_v51 = vpack.c.bf16 %v7721_v9, %v7721_v9 }
 0xb8b   : > { %v7539_v23 = vrot.slane %v7531_v58, %v10299_v11  ;;  %v7546_v12 = vrot.slane %v7532_v7, %v10299_v11  ;;  %v7555_v57 = vrot.slane %v7547_v59, %v10299_v11  ;;  %v7562_v40 = vrot.slane %v7548_v16, %v10299_v11 }
 0xb8c   : > { %v7880_v2 = vsel %vm6337_vm5, %v7872_v29, 0  ;;  %v7972_v10 = vsel %vm6337_vm5, %v7874_v61, 0  ;;  %v7926_v21 = vsel %vm6337_vm5, %v7873_v27, 0  ;;  %v8018_v15 = vsel %vm6337_vm5, %v7875_v51, 0  ;;  %v8064_v47 = vpop.permute.xlu1 %8063 }
 0xb8d   : > { %9493 = vmatpush3.bf16.xpose.msra.mxu1 %v7880_v2  ;;  %9505 = vmatpush3.bf16.xpose.msra.mxu0 %v7972_v10  ;;  %v7563_v34 = vcombine.low %v7539_v23, %v7555_v57  ;;  %v7565_v39 = vcombine.low %v7546_v12, %v7562_v40  ;;  %v7564_v52 = vcombine.high %v7539_v23, %v7555_v57 }
 0xb8e   : > { %9498 = vmatprep.subr.bf16.mxu1 %v9834_v3  ;;  %9516 = vmatprep.subr.bf16.mxu0 %v9834_v3  ;;  %v7566_v4 = vcombine.high %v7546_v12, %v7562_v40  ;;  %vm8069_vm13 = vcmp.eq.s32.totalorder %v8064_v47, %v9049_v30  ;;  %v7415_v32 = vadd.f32 %v9033_v5, %v12031_v35 }
 0xb8f   : > { %v7868_v53 = vpack.c.bf16 %v7563_v34, %v7563_v34  ;;  %v7870_v18 = vpack.c.bf16 %v7565_v39, %v7565_v39  ;;  %v7869_v33 = vpack.c.bf16 %v7564_v52, %v7564_v52 }
 0xb90   : > { %v7871_v43 = vpack.c.bf16 %v7566_v4, %v7566_v4 }
 0xb94   : > { %9495 = vmatmul.mubr.msk.bf16.vlgmr.msra.gmra.mrb[8].mxu1 %vm6337_vm5, %v7868_v53  ;;  %9507 = vmatmul.mubr.msk.bf16.vlgmr.msra.gmra.mrb[4].mxu0 %vm6337_vm5, %v7870_v18 }
 0xb95   : > { %9499 = vmatpush3.bf16.xpose.msra.mxu1 %v7926_v21  ;;  %9500 = vmatprep.mubr.msk.bf16.mxu1 %vm9835_vm9, %v9834_v3 }
 0xb96   : > { %9510 = vmatprep.subr.bf16.mxu1 %v9834_v3  ;;  %9518 = vmatprep.mubr.msk.bf16.mxu0 %vm9835_vm9, %v9834_v3 }
 0xb9c   : > { %9501 = vmatmul.mubr.msk.bf16.vlgmr.msra.gmra.mrb[12].mxu1 %vm6337_vm5, %v7869_v33 }
 0xb9d   : > { %9511 = vmatpush3.bf16.xpose.msra.mxu1 %v8018_v15  ;;  %9512 = vmatprep.mubr.msk.bf16.mxu1 %vm9835_vm9, %v9834_v3 }
 0xb9e   : > { %9522 = vmatprep.subr.bf16.mxu1 %v9834_v3 }
 0xba4   : > { %9513 = vmatmul.mubr.msk.bf16.vlgmr.msra.gmra.mrb[16].mxu1 %vm6337_vm5, %v7871_v43 }
 0xba5   : > { %9524 = vmatprep.mubr.msk.bf16.mxu1 %vm9835_vm9, %v9834_v3 }
 0xc67   : > { %v7916_v60 = vpop.f32.mrb[8].mxu1  ;;  %v8008_v55 = vpop.f32.mrb[4].mxu0 }
 0xc68   : > { %v8072_v8 = vsel %vm8069_vm13, %v7916_v60, -1e+09  ;;  %v9496_v63 = vpop.f32.mrb[9].mxu1  ;;  %v9508_v46 = vpop.f32.mrb[5].mxu0  ;;  %v8074_v44 = vsel %vm8069_vm13, %v8008_v55, -1e+09 }
 0xc69   : > { %v7919_v56 = vpop.f32.mrb[10].mxu1  ;;  %v8011_v14 = vpop.f32.mrb[6].mxu0  ;;  %v8077_v28 = vsel %vm8076_vm12, %v8072_v8, -inf  ;;  %v8083_v48 = vsel %vm8076_vm12, %v8074_v44, -inf }
 0xc6a   : > { %v9509_v0 = vpop.f32.mrb[7].mxu0  ;;  %8078 = vmax.xlane.f32.xlu0 %v8077_v28  ;;  %v9497_v24 = vpop.f32.mrb[11].mxu1 }
 0xc6e   : > { %8084 = vmax.xlane.f32.xlu0 %v8083_v48 }
 0xc6f   : > { %v7962_v22 = vpop.f32.mrb[12].mxu1 }
 0xc70   : > { %v8073_v36 = vsel %vm8069_vm13, %v7962_v22, -1e+09  ;;  %v9502_v37 = vpop.f32.mrb[13].mxu1 }
 0xc71   : > { %v7965_v42 = vpop.f32.mrb[14].mxu1  ;;  %v8080_v38 = vsel %vm8076_vm12, %v8073_v36, -inf }
 0xc72   : > { %8081 = vmax.xlane.f32.xlu1 %v8080_v38  ;;  %v9503_v41 = vpop.f32.mrb[15].mxu1 }
 0xc77   : > { %v8054_v1 = vpop.f32.mrb[16].mxu1 }
 0xc78   : > { %v8075_v49 = vsel %vm8069_vm13, %v8054_v1, -1e+09  ;;  %v9514_v25 = vpop.f32.mrb[17].mxu1 }
 0xc79   : > { %v8057_v13 = vpop.f32.mrb[18].mxu1  ;;  %v8086_v20 = vsel %vm8076_vm12, %v8075_v49, -inf }
 0xc7a   : > { %8087 = vmax.xlane.f32.xlu0 %v8086_v20  ;;  %v9515_v17 = vpop.f32.mrb[19].mxu1 }
 0xc83   : > { %7723 = vrot.lane.b32.xlu1 %v7415_v32, %s9840_s18  ;;  %s12412_s18 = sld [smem:[#allocation17_spill]] }
 0xcf7   : > { %v8079_v26 = vpop.xlane.xlu0 %8078 }
 0xcf8   : > { %v8089_v19 = vsub.f32 %v8072_v8, %v8079_v26 }
 0xcfa   : > { %v8093_v62 = vmul.f32 1.442695, %v8089_v19 }
 0xcfb   : > { %v8085_v29 = vpop.xlane.xlu0 %8084 }
 0xcfc   : > { %9728 = vpow2.f32 %v8093_v62  ;;  %v8091_v61 = vsub.f32 %v8074_v44, %v8085_v29 }
 0xcfe   : > { %v8097_v23 = vmul.f32 1.442695, %v8091_v61 }
 0xcff   : > { %v8082_v31 = vpop.xlane.xlu1 %8081 }
 0xd00   : > { %v8090_v54 = vsub.f32 %v8073_v36, %v8082_v31 }
 0xd02   : > { %v8095_v58 = vmul.f32 1.442695, %v8090_v54 }
 0xd03   : > { %v7724_v39 = vpop.permute.xlu1 %7723 }
 0xd04   : > { %9730 = vpow2.f32 %v8095_v58 }
 0xd05   : > { %9732 = vpow2.f32 %v8097_v23 }
 0xd06   : > { %v12105_v7 = vpop.eup %9728 }
 0xd07   : > { %v8101_v59 = vsel %vm8076_vm12, %v12105_v7, 0.0  ;;  %v8088_v12 = vpop.xlane.xlu0 %8087 }
 0xd08   : > { %8102 = vadd.xlane.f32.xlu1 %v8101_v59  ;;  %v8092_v57 = vsub.f32 %v8075_v49, %v8088_v12 }
 0xd0a   : > { %v8099_v40 = vmul.f32 1.442695, %v8092_v57 }
 0xd0c   : > { %9734 = vpow2.f32 %v8099_v40 }
 0xd0e   : > { %v12109_v16 = vpop.eup %9730 }
 0xd0f   : > { %v8104_v35 = vsel %vm8076_vm12, %v12109_v16, 0.0  ;;  %v12115_v2 = vpop.eup %9732 }
 0xd10   : > { %8105 = vadd.xlane.f32.xlu0 %v8104_v35  ;;  %v8107_v10 = vsel %vm8076_vm12, %v12115_v2, 0.0 }
 0xd16   : > { %v12119_v45 = vpop.eup %9734 }
 0xd17   : > { %v8110_v34 = vsel %vm8076_vm12, %v12119_v45, 0.0 }
 0xd19   : > { %7729 = vrot.lane.b32.xlu1 %v7415_v32, %s9841_s0  ;;  %s12416_s0 = sld [smem:[#allocation19_spill]] }
 0xd26   : > { %7726 = vrot.lane.b32.xlu0 %v7415_v32, %s9839_s16  ;;  %s12411_s16 = sld [smem:[#allocation16_spill]] }
 0xd3d   : > { %8108 = vadd.xlane.f32.xlu1 %v8107_v10 }
 0xd45   : > { %8111 = vadd.xlane.f32.xlu0 %v8110_v34 }
 0xd95   : > { %v8103_v27 = vpop.xlane.xlu1 %8102 }
 0xd96   : > { %9736 = vrcp.f32 %v8103_v27 }
 0xd99   : > { %v7730_v53 = vpop.permute.xlu1 %7729 }
 0xd9a   : > { %v7748_v21 = vcombine.low %v7724_v39, %v7730_v53  ;;  %v7749_v9 = vcombine.high %v7724_v39, %v7730_v53 }
 0xd9c   : > { %v7756_v15 = vrot.slane %v7748_v21, %v12403_v50  ;;  %v7763_v4 = vrot.slane %v7749_v9, %v12403_v50  ;;  %v9702_v9 = vld [vmem:[%s12411_s16] sm:$0xff]  }
 0xd9d   : > { %v8106_v18 = vpop.xlane.xlu0 %8105 }
 0xd9e   : > { %9738 = vrcp.f32 %v8106_v18 }
 0xda0   : > { %v9737_v49 = vpop.eup %9736 }
 0xda1   : > { %v7727_v52 = vpop.permute.xlu0 %7726  ;;  %v8117_v31 = vmul.f32 %v9737_v49, %v12105_v7  ;;  %v9704_v49 = vld [vmem:[%s12411_s16 + $0x10] sm:$0xff]  }
 0xda2   : > { %v7732_v51 = vcombine.low %v7415_v32, %v7727_v52  ;;  %v7733_v33 = vcombine.high %v7415_v32, %v7727_v52  ;;  %v9703_v52 = vld [vmem:[%s12411_s16 + $0x8] sm:$0xff]  }
 0xda3   : > { %v8121_v12 = vpack.c.bf16 %v8117_v31, %v8117_v31 }
 0xda4   : > { %v7740_v43 = vrot.slane %v7732_v51, %v12403_v50  ;;  %v7747_v30 = vrot.slane %v7733_v33, %v12403_v50 }
 0xda6   : > { %v7764_v47 = vcombine.low %v7740_v43, %v7756_v15  ;;  %v7765_v60 = vcombine.high %v7740_v43, %v7756_v15  ;;  %v7780_v55 = vcombine.low %v7747_v30, %v7763_v4  ;;  %v7781_v8 = vcombine.high %v7747_v30, %v7763_v4 }
 0xda8   : > { %v7772_v63 = vrot.slane %v7764_v47, %v10299_v11  ;;  %v7779_v46 = vrot.slane %v7765_v60, %v10299_v11  ;;  %v7788_v56 = vrot.slane %v7780_v55, %v10299_v11  ;;  %v7795_v14 = vrot.slane %v7781_v8, %v10299_v11  ;;  %v9739_v5 = vpop.eup %9738 }
 0xda9   : > { %v8118_v54 = vmul.f32 %v9739_v5, %v12109_v16 }
 0xdaa   : > { %v7800_v28 = vcombine.low %v7772_v63, %v7779_v46  ;;  %v9043_v44 = vcombine.high %v7772_v63, %v7779_v46  ;;  %v7816_v0 = vcombine.low %v7788_v56, %v7795_v14  ;;  %v9044_v24 = vcombine.high %v7788_v56, %v7795_v14 }
 0xdab   : > { %v8122_v57 = vpack.c.bf16 %v8118_v54, %v8118_v54 }
 0xdac   : > { %v7807_v48 = vrot.slane %v7800_v28, %v12403_v50  ;;  %v7815_v22 = vrot.slane %v9043_v44, %v12403_v50  ;;  %v7823_v36 = vrot.slane %v7816_v0, %v12403_v50  ;;  %v7831_v37 = vrot.slane %v9044_v24, %v12403_v50 }
 0xdae   : > { %v7832_v42 = vcombine.low %v7807_v48, %v7815_v22  ;;  %v7848_v38 = vcombine.low %v7823_v36, %v7831_v37  ;;  %v7833_v41 = vcombine.high %v7807_v48, %v7815_v22  ;;  %v7849_v1 = vcombine.high %v7823_v36, %v7831_v37 }
 0xdb0   : > { %v7840_v25 = vrot.slane %v7832_v42, %v10299_v11  ;;  %v7856_v13 = vrot.slane %v7848_v38, %v10299_v11  ;;  %v7847_v20 = vrot.slane %v7833_v41, %v10299_v11  ;;  %v7863_v17 = vrot.slane %v7849_v1, %v10299_v11 }
 0xdb2   : > { %v7864_v32 = vcombine.low %v7840_v25, %v7856_v13  ;;  %v7865_v26 = vcombine.high %v7840_v25, %v7856_v13  ;;  %v7866_v19 = vcombine.low %v7847_v20, %v7863_v17  ;;  %v7867_v62 = vcombine.high %v7847_v20, %v7863_v17 }
 0xdb4   : > { %v8125_v58 = vpack.c.bf16 %v7864_v32, %v7864_v32  ;;  %v8126_v59 = vpack.c.bf16 %v7865_v26, %v7865_v26  ;;  %v8127_v61 = vpack.c.bf16 %v7866_v19, %v7866_v19  ;;  %v8128_v23 = vpack.c.bf16 %v7867_v62, %v7867_v62  ;;  %v9705_v62 = vld [vmem:[%s12411_s16 + $0x18] sm:$0xff]  }
 0xdb6   : > { %v8134_v35 = vsel %vm8132_vm14, %v8125_v58, 0  ;;  %v8180_v29 = vsel %vm8132_vm14, %v8126_v59, 0  ;;  %v8226_v7 = vsel %vm8132_vm14, %v8127_v61, 0  ;;  %v8272_v16 = vsel %vm8132_vm14, %v8128_v23, 0 }
 0xdb7   : > { %9517 = vmatpush3.bf16.msra.mxu0 %v8134_v35  ;;  %9523 = vmatpush3.bf16.msra.mxu1 %v8180_v29 }
 0xdb8   : > { %9528 = vmatprep.subr.bf16.mxu0 %v9834_v3  ;;  %9534 = vmatprep.subr.bf16.mxu1 %v9834_v3 }
 0xdba   : > { %9519 = vmatmul.mubr.msk.bf16.vlgmr.msra.gmra.mrb[8].mxu0 %vm8076_vm12, %v8121_v12  ;;  %9525 = vmatmul.mubr.msk.bf16.vlgmr.msra.gmra.mrb[20].mxu1 %vm8076_vm12, %v8122_v57 }
 0xdbb   : > { %9529 = vmatpush3.bf16.msra.mxu0 %v8226_v7  ;;  %9535 = vmatpush3.bf16.msra.mxu1 %v8272_v16 }
 0xdbc   : > { %9530 = vmatprep.mubr.msk.bf16.mxu0 %vm9835_vm9, %v9834_v3  ;;  %9536 = vmatprep.mubr.msk.bf16.mxu1 %vm9835_vm9, %v9834_v3 }
 0xdbd   : > { %9540 = vmatprep.subr.bf16.mxu0 %v9834_v3  ;;  %9552 = vmatprep.subr.bf16.mxu1 %v9834_v3 }
 0xdca   : > { %v8109_v40 = vpop.xlane.xlu1 %8108 }
 0xdcb   : > { %9740 = vrcp.f32 %v8109_v40 }
 0xdd2   : > { %v8112_v10 = vpop.xlane.xlu0 %8111 }
 0xdd3   : > { %9742 = vrcp.f32 %v8112_v10 }
 0xdd5   : > { %v9741_v34 = vpop.eup %9740 }
 0xdd6   : > { %v8119_v39 = vmul.f32 %v9741_v34, %v12115_v2 }
 0xdd8   : > { %v8123_v27 = vpack.c.bf16 %v8119_v39, %v8119_v39 }
 0xdda   : > { %9531 = vmatmul.mubr.msk.bf16.vlgmr.msra.gmra.mrb[12].mxu0 %vm8076_vm12, %v8123_v27 }
 0xddb   : > { %9548 = vmatprep.mubr.msk.bf16.mxu0 %vm9835_vm9, %v9834_v3  ;;  %9541 = vmatpush3.bf16.msra.mxu0 %v9702_v9 }
 0xddc   : > { %9542 = vmatprep.subr.bf16.mxu0 %v9834_v3 }
 0xddd   : > { %v9743_v53 = vpop.eup %9742 }
 0xdde   : > { %v8120_v18 = vmul.f32 %v9743_v53, %v12119_v45 }
 0xddf   : > { %9543 = vmatpush3.bf16.msra.mxu0 %v9703_v52 }
 0xde0   : > { %v8124_v21 = vpack.c.bf16 %v8120_v18, %v8120_v18  ;;  %9544 = vmatprep.subr.bf16.mxu0 %v9834_v3 }
 0xde2   : > { %9537 = vmatmul.mubr.msk.bf16.vlgmr.msra.gmra.mrb[24].mxu1 %vm8076_vm12, %v8124_v21 }
 0xde3   : > { %9560 = vmatprep.mubr.msk.bf16.mxu1 %vm9835_vm9, %v9834_v3  ;;  %9545 = vmatpush3.bf16.msra.mxu0 %v9704_v49 }
 0xde4   : > { %9546 = vmatprep.subr.bf16.mxu0 %v9834_v3 }
 0xde7   : > { %9547 = vmatpush3.bf16.msra.mxu0 %v9705_v62 }
 0xde8   : > { %9564 = vmatprep.subr.bf16.mxu0 %v9834_v3 }
 0xe8d   : > { %v8170_v2 = vpop.f32.mrb[8].mxu0  ;;  %v8216_v51 = vpop.f32.mrb[20].mxu1 }
 0xe8e   : > { %v9520_v33 = vpop.f32.mrb[9].mxu0  ;;  %v9526_v15 = vpop.f32.mrb[21].mxu1 }
 0xe8f   : > { %v8173_v4 = vpop.f32.mrb[10].mxu0  ;;  %v8219_v45 = vpop.f32.mrb[22].mxu1 }
 0xe90   : > { %v9521_v43 = vpop.f32.mrb[11].mxu0  ;;  %v9527_v30 = vpop.f32.mrb[23].mxu1 }
 0xead   : > { %v8262_v47 = vpop.f32.mrb[12].mxu0 }
 0xeae   : > { %v8314_v60 = vcombine.low %v8170_v2, %v8262_v47  ;;  %v8315_v55 = vcombine.high %v8170_v2, %v8262_v47  ;;  %v9532_v8 = vpop.f32.mrb[13].mxu0  ;;  %v9061_v2 = vld [vmem:[%s12412_s18] ss:$0 sm:$0xff] }
 0xeaf   : > { %v8265_v63 = vpop.f32.mrb[14].mxu0 }
 0xeb0   : > { %v9533_v46 = vpop.f32.mrb[15].mxu0  ;;  %v8322_v24 = vrot.slane %v8314_v60, %v12403_v50  ;;  %v8329_v48 = vrot.slane %v8315_v55, %v12403_v50 }
 0xeb5   : > { %v8308_v56 = vpop.f32.mrb[24].mxu1 }
 0xeb6   : > { %v8330_v14 = vcombine.low %v8216_v51, %v8308_v56  ;;  %v8331_v28 = vcombine.high %v8216_v51, %v8308_v56  ;;  %v9538_v44 = vpop.f32.mrb[25].mxu1 }
 0xeb7   : > { %v8311_v0 = vpop.f32.mrb[26].mxu1 }
 0xeb8   : > { %v8338_v22 = vrot.slane %v8330_v14, %v12403_v50  ;;  %v8345_v36 = vrot.slane %v8331_v28, %v12403_v50  ;;  %v9539_v37 = vpop.f32.mrb[27].mxu1 }
 0xeba   : > { %v8346_v42 = vcombine.low %v8322_v24, %v8338_v22  ;;  %v8347_v38 = vcombine.high %v8322_v24, %v8338_v22  ;;  %v8362_v41 = vcombine.low %v8329_v48, %v8345_v36  ;;  %v8363_v1 = vcombine.high %v8329_v48, %v8345_v36 }
 0xebc   : > { %v8354_v25 = vrot.slane %v8346_v42, %v10299_v11  ;;  %v8361_v13 = vrot.slane %v8347_v38, %v10299_v11  ;;  %v8370_v20 = vrot.slane %v8362_v41, %v10299_v11  ;;  %v8377_v17 = vrot.slane %v8363_v1, %v10299_v11  ;;  %v9063_v1 = vld [vmem:[%s12416_s0] ss:$0 sm:$0xff] }
 0xebe   : > { %v8382_v5 = vcombine.low %v8354_v25, %v8361_v13  ;;  %v9054_v32 = vcombine.high %v8354_v25, %v8361_v13  ;;  %v8398_v26 = vcombine.low %v8370_v20, %v8377_v17  ;;  %v9055_v19 = vcombine.high %v8370_v20, %v8377_v17 }
 0xec0   : > { %v8389_v31 = vrot.slane %v8382_v5, %v12403_v50  ;;  %v8397_v54 = vrot.slane %v9054_v32, %v12403_v50  ;;  %v8405_v58 = vrot.slane %v8398_v26, %v12403_v50  ;;  %v8413_v59 = vrot.slane %v9055_v19, %v12403_v50  ;;  %v9064_v5 = vld [vmem:[%s12417_s10] ss:$0 sm:$0xff] }
 0xec2   : > { %v8415_v35 = vcombine.high %v8389_v31, %v8397_v54  ;;  %v8431_v29 = vcombine.high %v8405_v58, %v8413_v59  ;;  %v8414_v61 = vcombine.low %v8389_v31, %v8397_v54  ;;  %v8430_v23 = vcombine.low %v8405_v58, %v8413_v59  ;;  %v9070_v59 = vld [vmem:[%s9992_s27] ss:$0 sm:$0xff] }
 0xec4   : > { %v8429_v12 = vrot.slane %v8415_v35, %v10299_v11  ;;  %v8445_v57 = vrot.slane %v8431_v29, %v10299_v11  ;;  %v8422_v7 = vrot.slane %v8414_v61, %v10299_v11  ;;  %v8438_v16 = vrot.slane %v8430_v23, %v10299_v11 }
 0xec6   : > { %v8448_v40 = vcombine.low %v8429_v12, %v8445_v57  ;;  %v8447_v10 = vcombine.high %v8422_v7, %v8438_v16  ;;  %v8449_v34 = vcombine.high %v8429_v12, %v8445_v57  ;;  %v8446_v50 = vcombine.low %v8422_v7, %v8438_v16 }
 0xec8   : > { %8455 = vrot.lane.b32.xlu1 %v8448_v40, %s9836_s26  ;;  %8451 = vrot.lane.b32.xlu0 %v8447_v10, %s9837_s28  ;;  %s12413_s26 = sld [smem:[#allocation20_spill]]  ;;  %s12414_s28 = sld [smem:[#allocation22_spill]] }
 0xecc   : > { %8459 = vrot.lane.b32.xlu1 %v8449_v34, %s9838_s1  ;;  %s12415_s1 = sld [smem:[#allocation18_spill]] }
 0xece   : > { %v9707_v63 = vld [vmem:[%s12413_s26 + $0x8] sm:$0xff]   ;;  %v9708_v46 = vld [vmem:[%s12413_s26 + $0x10] sm:$0xff]   ;;  %v9709_v56 = vld [vmem:[%s12413_s26 + $0x18] sm:$0xff]  }
 0xecf   : > { %v9710_v14 = vld [vmem:[%s12414_s28] sm:$0xff]   ;;  %v9711_v28 = vld [vmem:[%s12414_s28 + $0x8] sm:$0xff]   ;;  %v9712_v44 = vld [vmem:[%s12414_s28 + $0x10] sm:$0xff]  }
 0xed0   : > { %v9713_v0 = vld [vmem:[%s12414_s28 + $0x18] sm:$0xff]   ;;  %v9714_v24 = vld [vmem:[%s12414_s28 + $0x20] sm:$0xff]   ;;  %v9715_v48 = vld [vmem:[%s12414_s28 + $0x28] sm:$0xff]  }
 0xed1   : > { %v9716_v20 = vld [vmem:[%s12414_s28 + $0x30] sm:$0xff]   ;;  %v9717_v17 = vld [vmem:[%s12414_s28 + $0x38] sm:$0xff]  }
 0xed2   : > { %v9062_v38 = vld [vmem:[%s12415_s1] ss:$0 sm:$0xff] }
 0xf3a   : > { %v8456_v39 = vpop.permute.xlu1 %8455  ;;  %v8452_v27 = vpop.permute.xlu0 %8451 }
 0xf3b   : > { %v8462_v53 = vsel %vm6337_vm5, %v8446_v50, %v8452_v27 }
 0xf3c   : > { %v8463_v18 = vsel %vm7133_vm10, %v8462_v53, %v8456_v39 }
 0xf3e   : > { %v8460_v21 = vpop.permute.xlu1 %8459 }
 0xf3f   : > { %v8464_v11 = vsel %vm7135_vm11, %v8463_v18, %v8460_v21  ;;  %v9079_v18 = vld [vmem:[%s9997_s4] ss:$0 sm:$0xff] }
 0xf40   : > { %v8465_v9 = vpack.c.bf16 %v8464_v11, %v8464_v11  ;;  %v9080_v11 = vld [vmem:[%s10002_s17] ss:$0 sm:$0xff] }
 0xf42   : > { %9549 = vmatmul.mubr.msk.bf16.vlgmr.msra.gmra.mrb[16].mxu0 %vm1335_vm4, %v8465_v9 }
 0xf43   : > { %9580 = vmatprep.mubr.msk.bf16.mxu0 %vm9835_vm9, %v9834_v3  ;;  %9565 = vmatpush3.bf16.msra.mxu0 %v9710_v14 }
 0xf44   : > { %9566 = vmatprep.subr.bf16.mxu0 %v9834_v3 }
 0xf47   : > { %9567 = vmatpush3.bf16.msra.mxu0 %v9711_v28 }
 0xf48   : > { %9568 = vmatprep.subr.bf16.mxu0 %v9834_v3 }
 0xf4b   : > { %9569 = vmatpush3.bf16.msra.mxu0 %v9712_v44 }
 0xf4c   : > { %9570 = vmatprep.subr.bf16.mxu0 %v9834_v3 }
 0xf4f   : > { %9571 = vmatpush3.bf16.msra.mxu0 %v9713_v0 }
 0xf50   : > { %9572 = vmatprep.subr.bf16.mxu0 %v9834_v3 }
 0xf53   : > { %9573 = vmatpush3.bf16.msra.mxu0 %v9714_v24 }
 0xf54   : > { %9574 = vmatprep.subr.bf16.mxu0 %v9834_v3 }
 0xf57   : > { %9575 = vmatpush3.bf16.msra.mxu0 %v9715_v48 }
 0xf58   : > { %9576 = vmatprep.subr.bf16.mxu0 %v9834_v3 }
 0xf5b   : > { %9577 = vmatpush3.bf16.msra.mxu0 %v9716_v20 }
 0xf5c   : > { %9578 = vmatprep.subr.bf16.mxu0 %v9834_v3 }
 0xf5f   : > { %9579 = vmatpush3.bf16.msra.mxu0 %v9717_v17 }
0x1015   : > { %v8535_v52 = vpop.f32.mrb[16].mxu0 }
0x1016   : > { %v8541_v51 = vadd.f32 %v8535_v52, %v12020_v6  ;;  %v9550_v33 = vpop.f32.mrb[17].mxu0  ;;  %v9706_v6 = vld [vmem:[%s12413_s26] sm:$0xff]  }
0x1017   : > { %v8538_v15 = vpop.f32.mrb[18].mxu0  ;;  %9553 = vmatpush3.bf16.msra.mxu1 %v9706_v6 }
0x1018   : > { %v9551_v4 = vpop.f32.mrb[19].mxu0  ;;  %v8549_v45 = vadd.f32 %v9061_v2, %v8541_v51  ;;  %9554 = vmatprep.subr.bf16.mxu1 %v9834_v3 }
0x101a   : > { %v8552_v43 = vsel %vm1335_vm4, %v8549_v45, 0.0 }
0x101b   : > { %8553 = vadd.xlane.f32.xlu0 %v8552_v43  ;;  %9555 = vmatpush3.bf16.msra.mxu1 %v9707_v63 }
0x101c   : > { %9556 = vmatprep.subr.bf16.mxu1 %v9834_v3 }
0x101f   : > { %9557 = vmatpush3.bf16.msra.mxu1 %v9708_v46 }
0x1020   : > { %9558 = vmatprep.subr.bf16.mxu1 %v9834_v3 }
0x1023   : > { %9559 = vmatpush3.bf16.msra.mxu1 %v9709_v56 }
0x10a8   : > { %v8554_v30 = vpop.xlane.xlu0 %8553 }
0x10a9   : > { %v8555_v47 = vmul.f32 0.015625, %v8554_v30 }
0x10ab   : > { %v8556_v60 = vsub.f32 %v8549_v45, %v8555_v47 }
0x10ad   : > { %v8557_v55 = vmul.f32 %v8556_v60, %v8556_v60 }
0x10af   : > { %v8558_v8 = vsel %vm1335_vm4, %v8557_v55, 0.0 }
0x10b0   : > { %8559 = vadd.xlane.f32.xlu1 %v8558_v8 }
0x113d   : > { %v8560_v22 = vpop.xlane.xlu1 %8559 }
0x113e   : > { %v8561_v36 = vmul.f32 0.015625, %v8560_v22 }
0x1140   : > { %v8562_v37 = vadd.f32 1e-05, %v8561_v36 }
0x1142   : > { %9744 = vrsqrt.f32 %v8562_v37 }
0x114c   : > { %v9745_v42 = vpop.eup %9744 }
0x114d   : > { %v8564_v41 = vmul.f32 %v9745_v42, %v8556_v60 }
0x114f   : > { %v8571_v49 = vmul.f32 %v9062_v38, %v8564_v41 }
0x1151   : > { %v8578_v25 = vadd.f32 %v9063_v1, %v8571_v49 }
0x1153   : > { %v8579_v13 = vpack.c.bf16 %v8578_v25, %v8578_v25 }
0x1155   : > { %9561 = vmatmul.mubr.msk.bf16.vlgmr.msra.gmra.mrb[28].mxu1 %vm1335_vm4, %v8579_v13 }
0x1228   : > { %v8656_v32 = vpop.f32.mrb[28].mxu1 }
0x1229   : > { %v8657_v26 = vadd.f32 %v9064_v5, %v8656_v32  ;;  %v9562_v19 = vpop.f32.mrb[29].mxu1 }
0x122a   : > { %v8659_v62 = vpop.f32.mrb[30].mxu1 }
0x122b   : > { %v8662_v31 = vmax.f32 %v8657_v26, 0.0  ;;  %v9563_v54 = vpop.f32.mrb[31].mxu1 }
0x122d   : > { %v8663_v58 = vpack.c.bf16 %v8662_v31, %v8662_v31 }
0x122f   : > { %9581 = vmatmul.mubr.bf16.vlgmr.msra.gmra.mrb[20].mxu0 %v8663_v58 }
0x1302   : > { %v8769_v35 = vpop.f32.mrb[20].mxu0 }
0x1303   : > { %v8770_v29 = vadd.f32 %v9070_v59, %v8769_v35  ;;  %v9582_v61 = vpop.f32.mrb[21].mxu0 }
0x1304   : > { %v8772_v23 = vpop.f32.mrb[22].mxu0 }
0x1305   : > { %v9583_v12 = vpop.f32.mrb[23].mxu0  ;;  %v8775_v57 = vadd.f32 %v8770_v29, %v8578_v25 }
0x1307   : > { %v8778_v3 = vsel %vm1335_vm4, %v8775_v57, 0.0 }
0x1308   : > { %8779 = vadd.xlane.f32.xlu0 %v8778_v3 }
0x1395   : > { %v8780_v7 = vpop.xlane.xlu0 %8779 }
0x1396   : > { %v8781_v16 = vmul.f32 0.015625, %v8780_v7 }
0x1398   : > { %v8782_v40 = vsub.f32 %v8775_v57, %v8781_v16 }
0x139a   : > { %v8783_v10 = vmul.f32 %v8782_v40, %v8782_v40 }
0x139c   : > { %v8784_v34 = vsel %vm1335_vm4, %v8783_v10, 0.0 }
0x139d   : > { %8785 = vadd.xlane.f32.xlu0 %v8784_v34 }
0x142a   : > { %v8786_v50 = vpop.xlane.xlu0 %8785 }
0x142b   : > { %v8787_v39 = vmul.f32 0.015625, %v8786_v50 }
0x142d   : > { %v8788_v27 = vadd.f32 1e-05, %v8787_v39 }
0x142f   : > { %9746 = vrsqrt.f32 %v8788_v27 }
0x1439   : > { %v9747_v53 = vpop.eup %9746 }
0x143a   : > { %v8790_v21 = vmul.f32 %v9747_v53, %v8782_v40 }
0x143c   : > { %v8797_v9 = vmul.f32 %v9079_v18, %v8790_v21 }
0x143e   : > { %v8804_v52 = vadd.f32 %v9080_v11, %v8797_v9 }
0x1440   : > { %8805 = vst.msk [vmem:[#allocation6] sm:$0xff] %vm1335_vm4, %v8804_v52 }
0x1441 PF: > { %p9588_p7 = scmp.eq.s32.totalorder %s10015_s23, 2  ;;  %s9843_s11 = smov [#allocation6]  }
0x1442   : > { %s8813_s15 = sshll.u32 %s9843_s11, 4  ;;  %s8814_s15 = int_to_ptr.vmem [resolvable:$true] %s8813_s15 }
0x1443   : > { %s9748_s18 = scalar_lea.vmem %s8814_s15, 128  ;;  %p9755_p11 = scmp.lt.s32.totalorder %s8814_s15, %s8814_s15 }
0x1444   : > { %p9749_p8 = scmp.ne.s32.totalorder %s8814_s15, %s9748_s18  ;;  %p9756_p12 = scmp.lt.s32.totalorder %s9748_s18, %s9748_s18 }
0x1446   : > { %p9750_p9 = pnand %p9749_p8, %p9588_p7  ;;  %p9757_p13 = por %p9756_p12, %p9755_p11 }
0x1448   : > { %p9751_p10 = pneg %p9750_p9 }
0x144a   : > { %p9758_p0 = pnand %p9757_p13, %p9751_p10 }
0x144c   : > { %9761 = shalt.err (!%p9758_p0)
}
0x144d   : > { %s9762_s1 = scalar_lea.hbm %s10007_s20, 128 }
0x144e   : > { %p9763_p1 = scmp.ne.s32.totalorder %s10007_s20, %s9762_s1  ;;  %p9768_p4 = scmp.lt.u32.totalorder %s9762_s1, %s10007_s20 }
0x1450   : > { %p9764_p2 = pnand %p9763_p1, %p9588_p7 }
0x1452   : > { %p9765_p3 = pneg %p9764_p2 }
0x1454   : > { %p9770_p5 = pnand %p9768_p4, %p9765_p3 }
0x1456   : > { %9773 = shalt.err (!%p9770_p5)
}
0x1457   : > { %9585 = dma.vmem_to_hbm [thread:$0]  (%p9588_p7), %s8814_s15, 128, %s10007_s20, [#allocation7]  }
0x1458   : > { %9779 = dma.done.wait (%p9588_p7), [#allocation7], 128  }
0x1459   : > { %9781 = vsyncadd (%p9588_p7), [#allocation7], 4294967168 }
0x145a PF: > { %s74_s22 = sadd.s32 1, %s9784_s22  }
0x145b   : > { %p71_p6 = scmp.ge.s32.totalorder %s74_s22, 5  }
0x145d   :  { %73 = sbr.rel (!%p71_p6) target bundleno = 56 (0x38), region = 216 }
0x1464   :  { %8826 = vsyncpa [#allocation7], 1 }
0x1465   :  { %8828 = vsyncpa [#allocation7 + $0x1], 1 }

</bundles_post_ra>
